<compile_context>
chip_gen: v7x
topology: tpu7x:2x2x1
jax: 0.10.0
libtpu: 0.0.40
codegen_flags: <defaults>
</compile_context>

<pallas_src>
import functools
import math

import jax
import jax.numpy as jnp
from jax import lax
from jax.experimental import pallas as pl
from jax.experimental.pallas import tpu as pltpu


# ----------------------------------------------------------------------------
# Fused kernel: entire GroupAttention forward for one batch element.
# ----------------------------------------------------------------------------
def group_attention_kernel(x_ref, wqkv_ref, wout_ref, bout_ref,
                           o_ref, logits_ref,
                           *, heads, groups, n_tok, k_sparse, scale,
                           use_bf16_matmul):
    H, G, N, K = heads, groups, n_tok, k_sparse
    dim = x_ref.shape[-1]
    d = dim // H
    Nk = G * K + (N - K)
    mm_dtype = jnp.bfloat16 if use_bf16_matmul else jnp.float32

    # ---- qkv projection: one lane-dense (G*N, dim) @ (dim, 3*dim) matmul ----
    x = x_ref[0]                                        # (G*N, dim)
    wqkv = wqkv_ref[...]
    if use_bf16_matmul:
        x = x.astype(mm_dtype)
        wqkv = wqkv.astype(mm_dtype)
    qkv = jnp.dot(x, wqkv, preferred_element_type=jnp.float32)   # (G*N, 3*dim)

    q = qkv[:, 0 * dim:1 * dim]                         # (G*N, dim)
    k = qkv[:, 1 * dim:2 * dim]
    v = qkv[:, 2 * dim:3 * dim]

    # ---- keypoint-shared key/value slabs, built once at full channel width ----
    # keypoint tokens of every group, group-major (matches torch flatten(2, 3))
    k_kp = jnp.concatenate([k[g * N:g * N + K, :] for g in range(G)], axis=0)  # (G*K, dim)
    v_kp = jnp.concatenate([v[g * N:g * N + K, :] for g in range(G)], axis=0)
    # rows for group g = [shared keypoints, group-g tokens K..N-1]
    k_ext = jnp.concatenate(
        [jnp.concatenate([k_kp, k[g * N + K:(g + 1) * N, :]], axis=0)
         for g in range(G)], axis=0)                                           # (G*Nk, dim)
    v_ext = jnp.concatenate(
        [jnp.concatenate([v_kp, v[g * N + K:(g + 1) * N, :]], axis=0)
         for g in range(G)], axis=0)                                           # (G*Nk, dim)

    # ---- per-(head, group) operands via static 2-D slices (h-major, g-minor) ----
    qs = jnp.stack([q[g * N:(g + 1) * N, h * d:(h + 1) * d]
                    for h in range(H) for g in range(G)], axis=0)      # (H*G, N,  d)
    ks = jnp.stack([k_ext[g * Nk:(g + 1) * Nk, h * d:(h + 1) * d]
                    for h in range(H) for g in range(G)], axis=0)      # (H*G, Nk, d)
    vs = jnp.stack([v_ext[g * Nk:(g + 1) * Nk, h * d:(h + 1) * d]
                    for h in range(H) for g in range(G)], axis=0)      # (H*G, Nk, d)
    if use_bf16_matmul:
        qs, ks, vs = (t.astype(mm_dtype) for t in (qs, ks, vs))

    # ---- attention scores: one batched matmul over head*group ----
    dots = jnp.einsum('bid,bjd->bij', qs, ks,
                      preferred_element_type=jnp.float32) * scale      # (H*G, N, Nk)

    # mask: key j == 0 always masked; group 0, query i == 0 fully masked.
    bid = lax.broadcasted_iota(jnp.int32, dots.shape, 0)
    iid = lax.broadcasted_iota(jnp.int32, dots.shape, 1)
    jid = lax.broadcasted_iota(jnp.int32, dots.shape, 2)
    gid = bid % G                       # (h, g) blocks are h-major / g-minor
    masked = (jid == 0) | ((gid == 0) & (iid == 0))
    neg = jnp.float32(-jnp.finfo(jnp.float32).max)
    dots = jnp.where(masked, neg, dots)

    logits_ref[0] = dots                # attn_logit output (masked, as in torch)

    # ---- softmax (f32 elementwise; exact division to match reference) ----
    m = jnp.max(dots, axis=-1, keepdims=True)
    e = jnp.exp(dots - m)
    attn = e / jnp.sum(e, axis=-1, keepdims=True)

    # ---- attention-weighted values: one batched matmul ----
    attn_mm = attn.astype(mm_dtype) if use_bf16_matmul else attn
    out = jnp.einsum('bij,bjd->bid', attn_mm, vs,
                     preferred_element_type=jnp.float32)               # (H*G, N, d)

    # ---- (H*G, N, d) -> (G*N, H*d) via static slices / concats (no transposes) ----
    out_flat = jnp.concatenate(
        [jnp.concatenate([out[h * G + g] for g in range(G)], axis=0)   # (G*N, d)
         for h in range(H)], axis=1)                                   # (G*N, dim)

    # ---- output projection + bias ----
    wout = wout_ref[...]
    if use_bf16_matmul:
        out_flat = out_flat.astype(mm_dtype)
        wout = wout.astype(mm_dtype)
    y = jnp.dot(out_flat, wout, preferred_element_type=jnp.float32) + bout_ref[...]
    # TODO(synk): nn.Dropout(p) after the projection — eval-mode no-op here.
    o_ref[0] = y


# ----------------------------------------------------------------------------
# Wrapper
# ----------------------------------------------------------------------------
def group_attention_forward(x, params, *, heads=8, num_sparse=6, num_patches=256,
                            scale_with_head=False, use_bf16_matmul=False):
    B, G, N, dim = x.shape
    assert G == 3, "GroupAttention mask buffer assumes exactly 3 groups"
    assert dim % heads == 0
    assert num_sparse <= N <= num_patches + num_sparse
    H, K = heads, num_sparse
    d = dim // H
    Nk = G * K + (N - K)
    scale = (d ** -0.5) if scale_with_head else (dim ** -0.5)

    x_flat = x.reshape(B, G * N, dim)
    wqkv, wout, bout = params["wqkv"], params["wout"], params["bout"]

    kernel = functools.partial(
        group_attention_kernel,
        heads=H, groups=G, n_tok=N, k_sparse=K, scale=scale,
        use_bf16_matmul=use_bf16_matmul)

    flops = B * (2 * (G * N) * dim * (3 * dim)        # qkv projection
                 + 2 * (H * G) * N * Nk * d           # scores
                 + 2 * (H * G) * N * Nk * d           # attn @ v
                 + 2 * (G * N) * dim * dim)           # output projection
    bytes_accessed = 4 * (x_flat.size + wqkv.size + wout.size + bout.size
                          + B * G * N * dim + B * H * G * N * Nk)
    cost = pl.CostEstimate(flops=int(flops),
                           transcendentals=int(B * H * G * N * Nk),
                           bytes_accessed=int(bytes_accessed))

    y_flat, logits_flat = pl.pallas_call(
        kernel,
        out_shape=(
            jax.ShapeDtypeStruct((B, G * N, dim), jnp.float32),
            jax.ShapeDtypeStruct((B, H * G, N, Nk), jnp.float32),
        ),
        grid=(B,),
        in_specs=[
            pl.BlockSpec((1, G * N, dim), lambda b: (b, 0, 0)),
            pl.BlockSpec((dim, 3 * dim), lambda b: (0, 0)),
            pl.BlockSpec((dim, dim), lambda b: (0, 0)),
            pl.BlockSpec((1, dim), lambda b: (0, 0)),
        ],
        out_specs=(
            pl.BlockSpec((1, G * N, dim), lambda b: (b, 0, 0)),
            pl.BlockSpec((1, H * G, N, Nk), lambda b: (b, 0, 0, 0)),
        ),
        compiler_params=pltpu.CompilerParams(
            dimension_semantics=("parallel",),
            vmem_limit_bytes=32 * 1024 * 1024),
        cost_estimate=cost,
    )(x_flat, wqkv, wout, bout)

    return {
        "x": y_flat.reshape(B, G, N, dim),
        "attn_logit": logits_flat.reshape(B, H, G, N, Nk),
    }


# ----------------------------------------------------------------------------
# Pure-JAX reference (mirrors the PyTorch module) for correctness checking.
# ----------------------------------------------------------------------------
def group_attention_ref(x, wqkv, wout, bout, *, heads, num_sparse, scale):
    B, G, N, dim = x.shape
    H, K = heads, num_sparse
    d = dim // H
    qkv = jnp.einsum('bgnc,cf->bgnf', x, wqkv)
    q, k, v = jnp.split(qkv, 3, axis=-1)

    def to_heads(t):  # (B,G,N,H*d) -> (B,H,G,N,d)
        return jnp.transpose(t.reshape(B, G, N, H, d), (0, 3, 1, 2, 4))

    q, k, v = to_heads(q), to_heads(k), to_heads(v)
    k_kp = jnp.broadcast_to(k[:, :, :, :K].reshape(B, H, 1, G * K, d),
                            (B, H, G, G * K, d))
    v_kp = jnp.broadcast_to(v[:, :, :, :K].reshape(B, H, 1, G * K, d),
                            (B, H, G, G * K, d))
    kf = jnp.concatenate([k_kp, k[:, :, :, K:]], axis=3)
    vf = jnp.concatenate([v_kp, v[:, :, :, K:]], axis=3)

    dots = jnp.einsum('bhgid,bhgjd->bhgij', q, kf) * scale
    Nk = kf.shape[3]
    gi = jnp.arange(G)[:, None, None]
    ii = jnp.arange(N)[None, :, None]
    ji = jnp.arange(Nk)[None, None, :]
    masked = (ji == 0) | ((gi == 0) & (ii == 0))
    dots = jnp.where(masked[None, None], -jnp.finfo(jnp.float32).max, dots)

    attn = jax.nn.softmax(dots, axis=-1)
    out = jnp.einsum('bhgij,bhgjd->bhgid', attn, vf)
    out = jnp.transpose(out, (0, 2, 3, 1, 4)).reshape(B, G, N, dim)
    y = jnp.einsum('bgnc,cf->bgnf', out, wout) + bout.reshape(dim)
    return y, dots


# ----------------------------------------------------------------------------
# Deterministic synthetic parameters
# ----------------------------------------------------------------------------
def init_params(key, dim):
    k1, k2, k3 = jax.random.split(key, 3)
    return {
        "wqkv": (jax.random.normal(k1, (dim, 3 * dim)) / math.sqrt(dim)).astype(jnp.float32),
        "wout": (jax.random.normal(k2, (dim, dim)) / math.sqrt(dim)).astype(jnp.float32),
        "bout": (0.02 * jax.random.normal(k3, (1, dim))).astype(jnp.float32),
    }


if __name__ == "__main__":
    key = jax.random.PRNGKey(0)
    kx, kp = jax.random.split(key)

    # Small shapes consistent with the module: (B, groups=3, tokens, dim),
    # heads=8, num_sparse=6 keypoint tokens per group.
    B, G, N, dim, heads, num_sparse = 2, 3, 8, 64, 8, 6
    x = jax.random.normal(kx, (B, G, N, dim), jnp.float32)
    params = init_params(kp, dim)

    fwd = jax.jit(functools.partial(group_attention_forward,
                                    heads=heads, num_sparse=num_sparse))
    out = fwd(x, params)
    out = jax.block_until_ready(out)

    Nk = G * num_sparse + (N - num_sparse)
    assert out["x"].shape == (B, G, N, dim), out["x"].shape
    assert out["attn_logit"].shape == (B, heads, G, N, Nk), out["attn_logit"].shape
    assert bool(jnp.all(jnp.isfinite(out["x"])))

    ref_x, ref_logit = group_attention_ref(
        x, params["wqkv"], params["wout"], params["bout"],
        heads=heads, num_sparse=num_sparse, scale=dim ** -0.5)
    assert bool(jnp.allclose(out["x"], ref_x, rtol=2e-2, atol=2e-2)), (
        float(jnp.max(jnp.abs(out["x"] - ref_x))))
    assert bool(jnp.allclose(out["attn_logit"], ref_logit, rtol=2e-2, atol=2e-2))

    print("KERNEL_OK")
</pallas_src>

<mosaic_0001>
module attributes {stable_mosaic.version = 11 : i64} {
  func.func @group_attention_kernel(%arg0: i32, %arg1: memref<1x24x64xf32, #tpu.memory_space<vmem>>, %arg2: memref<64x192xf32, #tpu.memory_space<vmem>>, %arg3: memref<64x64xf32, #tpu.memory_space<vmem>>, %arg4: memref<1x64xf32, #tpu.memory_space<vmem>>, %arg5: memref<1x24x64xf32, #tpu.memory_space<vmem>>, %arg6: memref<1x24x8x20xf32, #tpu.memory_space<vmem>>) attributes {dimension_semantics = [#tpu.dimension_semantics<parallel>], iteration_bounds = array<i64: 2>, scalar_prefetch = 0 : i64, scratch_operands = 0 : i64, tpu.core_type = #tpu.core_type<tc>, window_params = [{transform_indices = @transform_0, window_bounds = array<i64: 1, 24, 64>}, {pipeline_mode = #tpu.pipeline_mode<synchronous>, transform_indices = @transform_1, window_bounds = array<i64: 64, 192>}, {pipeline_mode = #tpu.pipeline_mode<synchronous>, transform_indices = @transform_2, window_bounds = array<i64: 64, 64>}, {pipeline_mode = #tpu.pipeline_mode<synchronous>, transform_indices = @transform_3, window_bounds = array<i64: 1, 64>}, {transform_indices = @transform_4, window_bounds = array<i64: 1, 24, 64>}, {transform_indices = @transform_5, window_bounds = array<i64: 1, 24, 8, 20>}]} {
    %c0 = arith.constant 0 : index
    %c0_0 = arith.constant 0 : index
    %c0_1 = arith.constant 0 : index
    %0 = vector.load %arg1[%c0, %c0_0, %c0_1] : memref<1x24x64xf32, #tpu.memory_space<vmem>>, vector<1x24x64xf32>
    %1 = vector.shape_cast %0 : vector<1x24x64xf32> to vector<24x64xf32>
    %c0_2 = arith.constant 0 : index
    %c0_3 = arith.constant 0 : index
    %2 = vector.load %arg2[%c0_2, %c0_3] : memref<64x192xf32, #tpu.memory_space<vmem>>, vector<64x192xf32>
    %cst = arith.constant dense<0.000000e+00> : vector<24x192xf32>
    %3 = tpu.matmul %1, %2, %cst {dimension_numbers = #tpu.dot_dimension_numbers<[1], [0], [0], [1], [0, 0, 1, 1], [], []>} : vector<24x64xf32>, vector<64x192xf32>, vector<24x192xf32> -> vector<24x192xf32>
    %4 = vector.extract_strided_slice %3 {offsets = [0, 0], sizes = [24, 64], strides = [1, 1]} : vector<24x192xf32> to vector<24x64xf32>
    %5 = vector.extract_strided_slice %3 {offsets = [0, 64], sizes = [24, 64], strides = [1, 1]} : vector<24x192xf32> to vector<24x64xf32>
    %6 = vector.extract_strided_slice %3 {offsets = [0, 128], sizes = [24, 64], strides = [1, 1]} : vector<24x192xf32> to vector<24x64xf32>
    %7 = vector.extract_strided_slice %5 {offsets = [0, 0], sizes = [6, 64], strides = [1, 1]} : vector<24x64xf32> to vector<6x64xf32>
    %8 = vector.extract_strided_slice %5 {offsets = [8, 0], sizes = [6, 64], strides = [1, 1]} : vector<24x64xf32> to vector<6x64xf32>
    %9 = vector.extract_strided_slice %5 {offsets = [16, 0], sizes = [6, 64], strides = [1, 1]} : vector<24x64xf32> to vector<6x64xf32>
    %10 = tpu.concatenate %7, %8, %9 in 0 : vector<6x64xf32>, vector<6x64xf32>, vector<6x64xf32> -> vector<18x64xf32>
    %11 = vector.extract_strided_slice %6 {offsets = [0, 0], sizes = [6, 64], strides = [1, 1]} : vector<24x64xf32> to vector<6x64xf32>
    %12 = vector.extract_strided_slice %6 {offsets = [8, 0], sizes = [6, 64], strides = [1, 1]} : vector<24x64xf32> to vector<6x64xf32>
    %13 = vector.extract_strided_slice %6 {offsets = [16, 0], sizes = [6, 64], strides = [1, 1]} : vector<24x64xf32> to vector<6x64xf32>
    %14 = tpu.concatenate %11, %12, %13 in 0 : vector<6x64xf32>, vector<6x64xf32>, vector<6x64xf32> -> vector<18x64xf32>
    %15 = vector.extract_strided_slice %5 {offsets = [6, 0], sizes = [2, 64], strides = [1, 1]} : vector<24x64xf32> to vector<2x64xf32>
    %16 = tpu.concatenate %10, %15 in 0 : vector<18x64xf32>, vector<2x64xf32> -> vector<20x64xf32>
    %17 = vector.extract_strided_slice %5 {offsets = [14, 0], sizes = [2, 64], strides = [1, 1]} : vector<24x64xf32> to vector<2x64xf32>
    %18 = tpu.concatenate %10, %17 in 0 : vector<18x64xf32>, vector<2x64xf32> -> vector<20x64xf32>
    %19 = vector.extract_strided_slice %5 {offsets = [22, 0], sizes = [2, 64], strides = [1, 1]} : vector<24x64xf32> to vector<2x64xf32>
    %20 = tpu.concatenate %10, %19 in 0 : vector<18x64xf32>, vector<2x64xf32> -> vector<20x64xf32>
    %21 = tpu.concatenate %16, %18, %20 in 0 : vector<20x64xf32>, vector<20x64xf32>, vector<20x64xf32> -> vector<60x64xf32>
    %22 = vector.extract_strided_slice %6 {offsets = [6, 0], sizes = [2, 64], strides = [1, 1]} : vector<24x64xf32> to vector<2x64xf32>
    %23 = tpu.concatenate %14, %22 in 0 : vector<18x64xf32>, vector<2x64xf32> -> vector<20x64xf32>
    %24 = vector.extract_strided_slice %6 {offsets = [14, 0], sizes = [2, 64], strides = [1, 1]} : vector<24x64xf32> to vector<2x64xf32>
    %25 = tpu.concatenate %14, %24 in 0 : vector<18x64xf32>, vector<2x64xf32> -> vector<20x64xf32>
    %26 = vector.extract_strided_slice %6 {offsets = [22, 0], sizes = [2, 64], strides = [1, 1]} : vector<24x64xf32> to vector<2x64xf32>
    %27 = tpu.concatenate %14, %26 in 0 : vector<18x64xf32>, vector<2x64xf32> -> vector<20x64xf32>
    %28 = tpu.concatenate %23, %25, %27 in 0 : vector<20x64xf32>, vector<20x64xf32>, vector<20x64xf32> -> vector<60x64xf32>
    %29 = vector.extract_strided_slice %4 {offsets = [0, 0], sizes = [8, 8], strides = [1, 1]} : vector<24x64xf32> to vector<8x8xf32>
    %30 = vector.extract_strided_slice %4 {offsets = [8, 0], sizes = [8, 8], strides = [1, 1]} : vector<24x64xf32> to vector<8x8xf32>
    %31 = vector.extract_strided_slice %4 {offsets = [16, 0], sizes = [8, 8], strides = [1, 1]} : vector<24x64xf32> to vector<8x8xf32>
    %32 = vector.extract_strided_slice %4 {offsets = [0, 8], sizes = [8, 8], strides = [1, 1]} : vector<24x64xf32> to vector<8x8xf32>
    %33 = vector.extract_strided_slice %4 {offsets = [8, 8], sizes = [8, 8], strides = [1, 1]} : vector<24x64xf32> to vector<8x8xf32>
    %34 = vector.extract_strided_slice %4 {offsets = [16, 8], sizes = [8, 8], strides = [1, 1]} : vector<24x64xf32> to vector<8x8xf32>
    %35 = vector.extract_strided_slice %4 {offsets = [0, 16], sizes = [8, 8], strides = [1, 1]} : vector<24x64xf32> to vector<8x8xf32>
    %36 = vector.extract_strided_slice %4 {offsets = [8, 16], sizes = [8, 8], strides = [1, 1]} : vector<24x64xf32> to vector<8x8xf32>
    %37 = vector.extract_strided_slice %4 {offsets = [16, 16], sizes = [8, 8], strides = [1, 1]} : vector<24x64xf32> to vector<8x8xf32>
    %38 = vector.extract_strided_slice %4 {offsets = [0, 24], sizes = [8, 8], strides = [1, 1]} : vector<24x64xf32> to vector<8x8xf32>
    %39 = vector.extract_strided_slice %4 {offsets = [8, 24], sizes = [8, 8], strides = [1, 1]} : vector<24x64xf32> to vector<8x8xf32>
    %40 = vector.extract_strided_slice %4 {offsets = [16, 24], sizes = [8, 8], strides = [1, 1]} : vector<24x64xf32> to vector<8x8xf32>
    %41 = vector.extract_strided_slice %4 {offsets = [0, 32], sizes = [8, 8], strides = [1, 1]} : vector<24x64xf32> to vector<8x8xf32>
    %42 = vector.extract_strided_slice %4 {offsets = [8, 32], sizes = [8, 8], strides = [1, 1]} : vector<24x64xf32> to vector<8x8xf32>
    %43 = vector.extract_strided_slice %4 {offsets = [16, 32], sizes = [8, 8], strides = [1, 1]} : vector<24x64xf32> to vector<8x8xf32>
    %44 = vector.extract_strided_slice %4 {offsets = [0, 40], sizes = [8, 8], strides = [1, 1]} : vector<24x64xf32> to vector<8x8xf32>
    %45 = vector.extract_strided_slice %4 {offsets = [8, 40], sizes = [8, 8], strides = [1, 1]} : vector<24x64xf32> to vector<8x8xf32>
    %46 = vector.extract_strided_slice %4 {offsets = [16, 40], sizes = [8, 8], strides = [1, 1]} : vector<24x64xf32> to vector<8x8xf32>
    %47 = vector.extract_strided_slice %4 {offsets = [0, 48], sizes = [8, 8], strides = [1, 1]} : vector<24x64xf32> to vector<8x8xf32>
    %48 = vector.extract_strided_slice %4 {offsets = [8, 48], sizes = [8, 8], strides = [1, 1]} : vector<24x64xf32> to vector<8x8xf32>
    %49 = vector.extract_strided_slice %4 {offsets = [16, 48], sizes = [8, 8], strides = [1, 1]} : vector<24x64xf32> to vector<8x8xf32>
    %50 = vector.extract_strided_slice %4 {offsets = [0, 56], sizes = [8, 8], strides = [1, 1]} : vector<24x64xf32> to vector<8x8xf32>
    %51 = vector.extract_strided_slice %4 {offsets = [8, 56], sizes = [8, 8], strides = [1, 1]} : vector<24x64xf32> to vector<8x8xf32>
    %52 = vector.extract_strided_slice %4 {offsets = [16, 56], sizes = [8, 8], strides = [1, 1]} : vector<24x64xf32> to vector<8x8xf32>
    %53 = vector.shape_cast %29 : vector<8x8xf32> to vector<1x8x8xf32>
    %54 = vector.shape_cast %30 : vector<8x8xf32> to vector<1x8x8xf32>
    %55 = vector.shape_cast %31 : vector<8x8xf32> to vector<1x8x8xf32>
    %56 = vector.shape_cast %32 : vector<8x8xf32> to vector<1x8x8xf32>
    %57 = vector.shape_cast %33 : vector<8x8xf32> to vector<1x8x8xf32>
    %58 = vector.shape_cast %34 : vector<8x8xf32> to vector<1x8x8xf32>
    %59 = vector.shape_cast %35 : vector<8x8xf32> to vector<1x8x8xf32>
    %60 = vector.shape_cast %36 : vector<8x8xf32> to vector<1x8x8xf32>
    %61 = vector.shape_cast %37 : vector<8x8xf32> to vector<1x8x8xf32>
    %62 = vector.shape_cast %38 : vector<8x8xf32> to vector<1x8x8xf32>
    %63 = vector.shape_cast %39 : vector<8x8xf32> to vector<1x8x8xf32>
    %64 = vector.shape_cast %40 : vector<8x8xf32> to vector<1x8x8xf32>
    %65 = vector.shape_cast %41 : vector<8x8xf32> to vector<1x8x8xf32>
    %66 = vector.shape_cast %42 : vector<8x8xf32> to vector<1x8x8xf32>
    %67 = vector.shape_cast %43 : vector<8x8xf32> to vector<1x8x8xf32>
    %68 = vector.shape_cast %44 : vector<8x8xf32> to vector<1x8x8xf32>
    %69 = vector.shape_cast %45 : vector<8x8xf32> to vector<1x8x8xf32>
    %70 = vector.shape_cast %46 : vector<8x8xf32> to vector<1x8x8xf32>
    %71 = vector.shape_cast %47 : vector<8x8xf32> to vector<1x8x8xf32>
    %72 = vector.shape_cast %48 : vector<8x8xf32> to vector<1x8x8xf32>
    %73 = vector.shape_cast %49 : vector<8x8xf32> to vector<1x8x8xf32>
    %74 = vector.shape_cast %50 : vector<8x8xf32> to vector<1x8x8xf32>
    %75 = vector.shape_cast %51 : vector<8x8xf32> to vector<1x8x8xf32>
    %76 = vector.shape_cast %52 : vector<8x8xf32> to vector<1x8x8xf32>
    %77 = tpu.concatenate %53, %54, %55, %56, %57, %58, %59, %60, %61, %62, %63, %64, %65, %66, %67, %68 in 0 : vector<1x8x8xf32>, vector<1x8x8xf32>, vector<1x8x8xf32>, vector<1x8x8xf32>, vector<1x8x8xf32>, vector<1x8x8xf32>, vector<1x8x8xf32>, vector<1x8x8xf32>, vector<1x8x8xf32>, vector<1x8x8xf32>, vector<1x8x8xf32>, vector<1x8x8xf32>, vector<1x8x8xf32>, vector<1x8x8xf32>, vector<1x8x8xf32>, vector<1x8x8xf32> -> vector<16x8x8xf32>
    %78 = tpu.concatenate %69, %70, %71, %72, %73, %74, %75, %76 in 0 : vector<1x8x8xf32>, vector<1x8x8xf32>, vector<1x8x8xf32>, vector<1x8x8xf32>, vector<1x8x8xf32>, vector<1x8x8xf32>, vector<1x8x8xf32>, vector<1x8x8xf32> -> vector<8x8x8xf32>
    %79 = tpu.concatenate %77, %78 in 0 : vector<16x8x8xf32>, vector<8x8x8xf32> -> vector<24x8x8xf32>
    %80 = vector.extract_strided_slice %21 {offsets = [0, 0], sizes = [20, 8], strides = [1, 1]} : vector<60x64xf32> to vector<20x8xf32>
    %81 = vector.extract_strided_slice %21 {offsets = [20, 0], sizes = [20, 8], strides = [1, 1]} : vector<60x64xf32> to vector<20x8xf32>
    %82 = vector.extract_strided_slice %21 {offsets = [40, 0], sizes = [20, 8], strides = [1, 1]} : vector<60x64xf32> to vector<20x8xf32>
    %83 = vector.extract_strided_slice %21 {offsets = [0, 8], sizes = [20, 8], strides = [1, 1]} : vector<60x64xf32> to vector<20x8xf32>
    %84 = vector.extract_strided_slice %21 {offsets = [20, 8], sizes = [20, 8], strides = [1, 1]} : vector<60x64xf32> to vector<20x8xf32>
    %85 = vector.extract_strided_slice %21 {offsets = [40, 8], sizes = [20, 8], strides = [1, 1]} : vector<60x64xf32> to vector<20x8xf32>
    %86 = vector.extract_strided_slice %21 {offsets = [0, 16], sizes = [20, 8], strides = [1, 1]} : vector<60x64xf32> to vector<20x8xf32>
    %87 = vector.extract_strided_slice %21 {offsets = [20, 16], sizes = [20, 8], strides = [1, 1]} : vector<60x64xf32> to vector<20x8xf32>
    %88 = vector.extract_strided_slice %21 {offsets = [40, 16], sizes = [20, 8], strides = [1, 1]} : vector<60x64xf32> to vector<20x8xf32>
    %89 = vector.extract_strided_slice %21 {offsets = [0, 24], sizes = [20, 8], strides = [1, 1]} : vector<60x64xf32> to vector<20x8xf32>
    %90 = vector.extract_strided_slice %21 {offsets = [20, 24], sizes = [20, 8], strides = [1, 1]} : vector<60x64xf32> to vector<20x8xf32>
    %91 = vector.extract_strided_slice %21 {offsets = [40, 24], sizes = [20, 8], strides = [1, 1]} : vector<60x64xf32> to vector<20x8xf32>
    %92 = vector.extract_strided_slice %21 {offsets = [0, 32], sizes = [20, 8], strides = [1, 1]} : vector<60x64xf32> to vector<20x8xf32>
    %93 = vector.extract_strided_slice %21 {offsets = [20, 32], sizes = [20, 8], strides = [1, 1]} : vector<60x64xf32> to vector<20x8xf32>
    %94 = vector.extract_strided_slice %21 {offsets = [40, 32], sizes = [20, 8], strides = [1, 1]} : vector<60x64xf32> to vector<20x8xf32>
    %95 = vector.extract_strided_slice %21 {offsets = [0, 40], sizes = [20, 8], strides = [1, 1]} : vector<60x64xf32> to vector<20x8xf32>
    %96 = vector.extract_strided_slice %21 {offsets = [20, 40], sizes = [20, 8], strides = [1, 1]} : vector<60x64xf32> to vector<20x8xf32>
    %97 = vector.extract_strided_slice %21 {offsets = [40, 40], sizes = [20, 8], strides = [1, 1]} : vector<60x64xf32> to vector<20x8xf32>
    %98 = vector.extract_strided_slice %21 {offsets = [0, 48], sizes = [20, 8], strides = [1, 1]} : vector<60x64xf32> to vector<20x8xf32>
    %99 = vector.extract_strided_slice %21 {offsets = [20, 48], sizes = [20, 8], strides = [1, 1]} : vector<60x64xf32> to vector<20x8xf32>
    %100 = vector.extract_strided_slice %21 {offsets = [40, 48], sizes = [20, 8], strides = [1, 1]} : vector<60x64xf32> to vector<20x8xf32>
    %101 = vector.extract_strided_slice %21 {offsets = [0, 56], sizes = [20, 8], strides = [1, 1]} : vector<60x64xf32> to vector<20x8xf32>
    %102 = vector.extract_strided_slice %21 {offsets = [20, 56], sizes = [20, 8], strides = [1, 1]} : vector<60x64xf32> to vector<20x8xf32>
    %103 = vector.extract_strided_slice %21 {offsets = [40, 56], sizes = [20, 8], strides = [1, 1]} : vector<60x64xf32> to vector<20x8xf32>
    %104 = vector.shape_cast %80 : vector<20x8xf32> to vector<1x20x8xf32>
    %105 = vector.shape_cast %81 : vector<20x8xf32> to vector<1x20x8xf32>
    %106 = vector.shape_cast %82 : vector<20x8xf32> to vector<1x20x8xf32>
    %107 = vector.shape_cast %83 : vector<20x8xf32> to vector<1x20x8xf32>
    %108 = vector.shape_cast %84 : vector<20x8xf32> to vector<1x20x8xf32>
    %109 = vector.shape_cast %85 : vector<20x8xf32> to vector<1x20x8xf32>
    %110 = vector.shape_cast %86 : vector<20x8xf32> to vector<1x20x8xf32>
    %111 = vector.shape_cast %87 : vector<20x8xf32> to vector<1x20x8xf32>
    %112 = vector.shape_cast %88 : vector<20x8xf32> to vector<1x20x8xf32>
    %113 = vector.shape_cast %89 : vector<20x8xf32> to vector<1x20x8xf32>
    %114 = vector.shape_cast %90 : vector<20x8xf32> to vector<1x20x8xf32>
    %115 = vector.shape_cast %91 : vector<20x8xf32> to vector<1x20x8xf32>
    %116 = vector.shape_cast %92 : vector<20x8xf32> to vector<1x20x8xf32>
    %117 = vector.shape_cast %93 : vector<20x8xf32> to vector<1x20x8xf32>
    %118 = vector.shape_cast %94 : vector<20x8xf32> to vector<1x20x8xf32>
    %119 = vector.shape_cast %95 : vector<20x8xf32> to vector<1x20x8xf32>
    %120 = vector.shape_cast %96 : vector<20x8xf32> to vector<1x20x8xf32>
    %121 = vector.shape_cast %97 : vector<20x8xf32> to vector<1x20x8xf32>
    %122 = vector.shape_cast %98 : vector<20x8xf32> to vector<1x20x8xf32>
    %123 = vector.shape_cast %99 : vector<20x8xf32> to vector<1x20x8xf32>
    %124 = vector.shape_cast %100 : vector<20x8xf32> to vector<1x20x8xf32>
    %125 = vector.shape_cast %101 : vector<20x8xf32> to vector<1x20x8xf32>
    %126 = vector.shape_cast %102 : vector<20x8xf32> to vector<1x20x8xf32>
    %127 = vector.shape_cast %103 : vector<20x8xf32> to vector<1x20x8xf32>
    %128 = tpu.concatenate %104, %105, %106, %107, %108, %109, %110, %111, %112, %113, %114, %115, %116, %117, %118, %119 in 0 : vector<1x20x8xf32>, vector<1x20x8xf32>, vector<1x20x8xf32>, vector<1x20x8xf32>, vector<1x20x8xf32>, vector<1x20x8xf32>, vector<1x20x8xf32>, vector<1x20x8xf32>, vector<1x20x8xf32>, vector<1x20x8xf32>, vector<1x20x8xf32>, vector<1x20x8xf32>, vector<1x20x8xf32>, vector<1x20x8xf32>, vector<1x20x8xf32>, vector<1x20x8xf32> -> vector<16x20x8xf32>
    %129 = tpu.concatenate %120, %121, %122, %123, %124, %125, %126, %127 in 0 : vector<1x20x8xf32>, vector<1x20x8xf32>, vector<1x20x8xf32>, vector<1x20x8xf32>, vector<1x20x8xf32>, vector<1x20x8xf32>, vector<1x20x8xf32>, vector<1x20x8xf32> -> vector<8x20x8xf32>
    %130 = tpu.concatenate %128, %129 in 0 : vector<16x20x8xf32>, vector<8x20x8xf32> -> vector<24x20x8xf32>
    %131 = vector.extract_strided_slice %28 {offsets = [0, 0], sizes = [20, 8], strides = [1, 1]} : vector<60x64xf32> to vector<20x8xf32>
    %132 = vector.extract_strided_slice %28 {offsets = [20, 0], sizes = [20, 8], strides = [1, 1]} : vector<60x64xf32> to vector<20x8xf32>
    %133 = vector.extract_strided_slice %28 {offsets = [40, 0], sizes = [20, 8], strides = [1, 1]} : vector<60x64xf32> to vector<20x8xf32>
    %134 = vector.extract_strided_slice %28 {offsets = [0, 8], sizes = [20, 8], strides = [1, 1]} : vector<60x64xf32> to vector<20x8xf32>
    %135 = vector.extract_strided_slice %28 {offsets = [20, 8], sizes = [20, 8], strides = [1, 1]} : vector<60x64xf32> to vector<20x8xf32>
    %136 = vector.extract_strided_slice %28 {offsets = [40, 8], sizes = [20, 8], strides = [1, 1]} : vector<60x64xf32> to vector<20x8xf32>
    %137 = vector.extract_strided_slice %28 {offsets = [0, 16], sizes = [20, 8], strides = [1, 1]} : vector<60x64xf32> to vector<20x8xf32>
    %138 = vector.extract_strided_slice %28 {offsets = [20, 16], sizes = [20, 8], strides = [1, 1]} : vector<60x64xf32> to vector<20x8xf32>
    %139 = vector.extract_strided_slice %28 {offsets = [40, 16], sizes = [20, 8], strides = [1, 1]} : vector<60x64xf32> to vector<20x8xf32>
    %140 = vector.extract_strided_slice %28 {offsets = [0, 24], sizes = [20, 8], strides = [1, 1]} : vector<60x64xf32> to vector<20x8xf32>
    %141 = vector.extract_strided_slice %28 {offsets = [20, 24], sizes = [20, 8], strides = [1, 1]} : vector<60x64xf32> to vector<20x8xf32>
    %142 = vector.extract_strided_slice %28 {offsets = [40, 24], sizes = [20, 8], strides = [1, 1]} : vector<60x64xf32> to vector<20x8xf32>
    %143 = vector.extract_strided_slice %28 {offsets = [0, 32], sizes = [20, 8], strides = [1, 1]} : vector<60x64xf32> to vector<20x8xf32>
    %144 = vector.extract_strided_slice %28 {offsets = [20, 32], sizes = [20, 8], strides = [1, 1]} : vector<60x64xf32> to vector<20x8xf32>
    %145 = vector.extract_strided_slice %28 {offsets = [40, 32], sizes = [20, 8], strides = [1, 1]} : vector<60x64xf32> to vector<20x8xf32>
    %146 = vector.extract_strided_slice %28 {offsets = [0, 40], sizes = [20, 8], strides = [1, 1]} : vector<60x64xf32> to vector<20x8xf32>
    %147 = vector.extract_strided_slice %28 {offsets = [20, 40], sizes = [20, 8], strides = [1, 1]} : vector<60x64xf32> to vector<20x8xf32>
    %148 = vector.extract_strided_slice %28 {offsets = [40, 40], sizes = [20, 8], strides = [1, 1]} : vector<60x64xf32> to vector<20x8xf32>
    %149 = vector.extract_strided_slice %28 {offsets = [0, 48], sizes = [20, 8], strides = [1, 1]} : vector<60x64xf32> to vector<20x8xf32>
    %150 = vector.extract_strided_slice %28 {offsets = [20, 48], sizes = [20, 8], strides = [1, 1]} : vector<60x64xf32> to vector<20x8xf32>
    %151 = vector.extract_strided_slice %28 {offsets = [40, 48], sizes = [20, 8], strides = [1, 1]} : vector<60x64xf32> to vector<20x8xf32>
    %152 = vector.extract_strided_slice %28 {offsets = [0, 56], sizes = [20, 8], strides = [1, 1]} : vector<60x64xf32> to vector<20x8xf32>
    %153 = vector.extract_strided_slice %28 {offsets = [20, 56], sizes = [20, 8], strides = [1, 1]} : vector<60x64xf32> to vector<20x8xf32>
    %154 = vector.extract_strided_slice %28 {offsets = [40, 56], sizes = [20, 8], strides = [1, 1]} : vector<60x64xf32> to vector<20x8xf32>
    %155 = vector.shape_cast %131 : vector<20x8xf32> to vector<1x20x8xf32>
    %156 = vector.shape_cast %132 : vector<20x8xf32> to vector<1x20x8xf32>
    %157 = vector.shape_cast %133 : vector<20x8xf32> to vector<1x20x8xf32>
    %158 = vector.shape_cast %134 : vector<20x8xf32> to vector<1x20x8xf32>
    %159 = vector.shape_cast %135 : vector<20x8xf32> to vector<1x20x8xf32>
    %160 = vector.shape_cast %136 : vector<20x8xf32> to vector<1x20x8xf32>
    %161 = vector.shape_cast %137 : vector<20x8xf32> to vector<1x20x8xf32>
    %162 = vector.shape_cast %138 : vector<20x8xf32> to vector<1x20x8xf32>
    %163 = vector.shape_cast %139 : vector<20x8xf32> to vector<1x20x8xf32>
    %164 = vector.shape_cast %140 : vector<20x8xf32> to vector<1x20x8xf32>
    %165 = vector.shape_cast %141 : vector<20x8xf32> to vector<1x20x8xf32>
    %166 = vector.shape_cast %142 : vector<20x8xf32> to vector<1x20x8xf32>
    %167 = vector.shape_cast %143 : vector<20x8xf32> to vector<1x20x8xf32>
    %168 = vector.shape_cast %144 : vector<20x8xf32> to vector<1x20x8xf32>
    %169 = vector.shape_cast %145 : vector<20x8xf32> to vector<1x20x8xf32>
    %170 = vector.shape_cast %146 : vector<20x8xf32> to vector<1x20x8xf32>
    %171 = vector.shape_cast %147 : vector<20x8xf32> to vector<1x20x8xf32>
    %172 = vector.shape_cast %148 : vector<20x8xf32> to vector<1x20x8xf32>
    %173 = vector.shape_cast %149 : vector<20x8xf32> to vector<1x20x8xf32>
    %174 = vector.shape_cast %150 : vector<20x8xf32> to vector<1x20x8xf32>
    %175 = vector.shape_cast %151 : vector<20x8xf32> to vector<1x20x8xf32>
    %176 = vector.shape_cast %152 : vector<20x8xf32> to vector<1x20x8xf32>
    %177 = vector.shape_cast %153 : vector<20x8xf32> to vector<1x20x8xf32>
    %178 = vector.shape_cast %154 : vector<20x8xf32> to vector<1x20x8xf32>
    %179 = tpu.concatenate %155, %156, %157, %158, %159, %160, %161, %162, %163, %164, %165, %166, %167, %168, %169, %170 in 0 : vector<1x20x8xf32>, vector<1x20x8xf32>, vector<1x20x8xf32>, vector<1x20x8xf32>, vector<1x20x8xf32>, vector<1x20x8xf32>, vector<1x20x8xf32>, vector<1x20x8xf32>, vector<1x20x8xf32>, vector<1x20x8xf32>, vector<1x20x8xf32>, vector<1x20x8xf32>, vector<1x20x8xf32>, vector<1x20x8xf32>, vector<1x20x8xf32>, vector<1x20x8xf32> -> vector<16x20x8xf32>
    %180 = tpu.concatenate %171, %172, %173, %174, %175, %176, %177, %178 in 0 : vector<1x20x8xf32>, vector<1x20x8xf32>, vector<1x20x8xf32>, vector<1x20x8xf32>, vector<1x20x8xf32>, vector<1x20x8xf32>, vector<1x20x8xf32>, vector<1x20x8xf32> -> vector<8x20x8xf32>
    %181 = tpu.concatenate %179, %180 in 0 : vector<16x20x8xf32>, vector<8x20x8xf32> -> vector<24x20x8xf32>
    "tpu.trace_start"() <{level = 10 : i32, message = "bid,bjd->bij"}> : () -> ()
    %cst_4 = arith.constant dense<0.000000e+00> : vector<24x8x20xf32>
    %182 = tpu.matmul %79, %130, %cst_4 {dimension_numbers = #tpu.dot_dimension_numbers<[2], [2], [1], [1], [0, 0, 0, 1, 1, 1], [0], [0]>} : vector<24x8x8xf32>, vector<24x20x8xf32>, vector<24x8x20xf32> -> vector<24x8x20xf32>
    "tpu.trace_stop"() : () -> ()
    %cst_5 = arith.constant 1.250000e-01 : f32
    %183 = vector.broadcast %cst_5 : f32 to vector<24x8x20xf32>
    %184 = arith.mulf %182, %183 : vector<24x8x20xf32>
    %185 = tpu.iota {dimensions = array<i32: 0>} : vector<24x8x20xi32>
    %186 = tpu.iota {dimensions = array<i32: 1>} : vector<24x8x20xi32>
    %187 = tpu.iota {dimensions = array<i32: 2>} : vector<24x8x20xi32>
    %c3_i32 = arith.constant 3 : i32
    %c0_i32 = arith.constant 0 : i32
    %188 = arith.cmpi eq, %c3_i32, %c0_i32 : i32
    %c1_i32 = arith.constant 1 : i32
    %189 = arith.select %188, %c1_i32, %c3_i32 : i32
    %190 = vector.broadcast %189 : i32 to vector<24x8x20xi32>
    %191 = arith.remsi %185, %190 : vector<24x8x20xi32>
    %c0_i32_6 = arith.constant 0 : i32
    %192 = vector.broadcast %c0_i32_6 : i32 to vector<24x8x20xi32>
    %193 = arith.cmpi ne, %191, %192 : vector<24x8x20xi32>
    %c0_i32_7 = arith.constant 0 : i32
    %194 = vector.broadcast %c0_i32_7 : i32 to vector<24x8x20xi32>
    %195 = arith.cmpi slt, %191, %194 : vector<24x8x20xi32>
    %c0_i32_8 = arith.constant 0 : i32
    %196 = arith.cmpi slt, %189, %c0_i32_8 : i32
    %197 = vector.broadcast %196 : i1 to vector<24x8x20xi1>
    %198 = vector.broadcast %197 : vector<24x8x20xi1> to vector<24x8x20xi1>
    %199 = arith.xori %195, %198 : vector<24x8x20xi1>
    %200 = arith.andi %199, %193 : vector<24x8x20xi1>
    %201 = vector.broadcast %189 : i32 to vector<24x8x20xi32>
    %202 = arith.addi %191, %201 : vector<24x8x20xi32>
    %203 = arith.select %200, %202, %191 : vector<24x8x20xi1>, vector<24x8x20xi32>
    %c0_i32_9 = arith.constant 0 : i32
    %204 = vector.broadcast %c0_i32_9 : i32 to vector<24x8x20xi32>
    %205 = arith.cmpi eq, %187, %204 : vector<24x8x20xi32>
    %c0_i32_10 = arith.constant 0 : i32
    %206 = vector.broadcast %c0_i32_10 : i32 to vector<24x8x20xi32>
    %207 = arith.cmpi eq, %203, %206 : vector<24x8x20xi32>
    %c0_i32_11 = arith.constant 0 : i32
    %208 = vector.broadcast %c0_i32_11 : i32 to vector<24x8x20xi32>
    %209 = arith.cmpi eq, %186, %208 : vector<24x8x20xi32>
    %210 = arith.andi %207, %209 : vector<24x8x20xi1>
    %211 = arith.ori %205, %210 : vector<24x8x20xi1>
    %cst_12 = arith.constant -3.40282347E+38 : f32
    %212 = vector.broadcast %cst_12 : f32 to vector<24x8x20xf32>
    %213 = arith.select %211, %212, %184 : vector<24x8x20xi1>, vector<24x8x20xf32>
    %c0_13 = arith.constant 0 : index
    %c0_14 = arith.constant 0 : index
    %c0_15 = arith.constant 0 : index
    %c0_16 = arith.constant 0 : index
    %214 = vector.load %arg6[%c0_13, %c0_14, %c0_15, %c0_16] : memref<1x24x8x20xf32, #tpu.memory_space<vmem>>, vector<1x24x8x20xf32>
    %215 = vector.shape_cast %214 : vector<1x24x8x20xf32> to vector<24x8x20xf32>
    %216 = vector.shape_cast %213 : vector<24x8x20xf32> to vector<1x24x8x20xf32>
    tpu.vector_store %arg6[%c0_13, %c0_14, %c0_15, %c0_16], %216 {strides = array<i32>} : memref<1x24x8x20xf32, #tpu.memory_space<vmem>>, vector<1x24x8x20xf32>,
    %cst_17 = arith.constant dense<0xFF800000> : vector<24x8xf32>
    %217 = vector.multi_reduction <maximumf>, %213, %cst_17 [2] : vector<24x8x20xf32> to vector<24x8xf32>
    %218 = vector.shape_cast %217 : vector<24x8xf32> to vector<24x8x1xf32>
    %219 = vector.broadcast %218 : vector<24x8x1xf32> to vector<24x8x20xf32>
    %220 = arith.subf %213, %219 : vector<24x8x20xf32>
    %221 = math.exp %220 : vector<24x8x20xf32>
    %cst_18 = arith.constant dense<0.000000e+00> : vector<24x8xf32>
    %222 = vector.multi_reduction <add>, %221, %cst_18 [2] : vector<24x8x20xf32> to vector<24x8xf32>
    %223 = vector.shape_cast %222 : vector<24x8xf32> to vector<24x8x1xf32>
    %224 = vector.broadcast %223 : vector<24x8x1xf32> to vector<24x8x20xf32>
    %225 = arith.divf %221, %224 : vector<24x8x20xf32>
    "tpu.trace_start"() <{level = 10 : i32, message = "bij,bjd->bid"}> : () -> ()
    %cst_19 = arith.constant dense<0.000000e+00> : vector<24x8x8xf32>
    %226 = tpu.matmul %225, %181, %cst_19 {dimension_numbers = #tpu.dot_dimension_numbers<[2], [1], [1], [2], [0, 0, 0, 1, 1, 2], [0], [0]>} : vector<24x8x20xf32>, vector<24x20x8xf32>, vector<24x8x8xf32> -> vector<24x8x8xf32>
    "tpu.trace_stop"() : () -> ()
    %227 = vector.extract_strided_slice %226 {offsets = [0, 0, 0], sizes = [1, 8, 8], strides = [1, 1, 1]} : vector<24x8x8xf32> to vector<1x8x8xf32>
    %228 = vector.shape_cast %227 : vector<1x8x8xf32> to vector<8x8xf32>
    %229 = vector.extract_strided_slice %226 {offsets = [1, 0, 0], sizes = [1, 8, 8], strides = [1, 1, 1]} : vector<24x8x8xf32> to vector<1x8x8xf32>
    %230 = vector.shape_cast %229 : vector<1x8x8xf32> to vector<8x8xf32>
    %231 = vector.extract_strided_slice %226 {offsets = [2, 0, 0], sizes = [1, 8, 8], strides = [1, 1, 1]} : vector<24x8x8xf32> to vector<1x8x8xf32>
    %232 = vector.shape_cast %231 : vector<1x8x8xf32> to vector<8x8xf32>
    %233 = tpu.concatenate %228, %230, %232 in 0 : vector<8x8xf32>, vector<8x8xf32>, vector<8x8xf32> -> vector<24x8xf32>
    %234 = vector.extract_strided_slice %226 {offsets = [3, 0, 0], sizes = [1, 8, 8], strides = [1, 1, 1]} : vector<24x8x8xf32> to vector<1x8x8xf32>
    %235 = vector.shape_cast %234 : vector<1x8x8xf32> to vector<8x8xf32>
    %236 = vector.extract_strided_slice %226 {offsets = [4, 0, 0], sizes = [1, 8, 8], strides = [1, 1, 1]} : vector<24x8x8xf32> to vector<1x8x8xf32>
    %237 = vector.shape_cast %236 : vector<1x8x8xf32> to vector<8x8xf32>
    %238 = vector.extract_strided_slice %226 {offsets = [5, 0, 0], sizes = [1, 8, 8], strides = [1, 1, 1]} : vector<24x8x8xf32> to vector<1x8x8xf32>
    %239 = vector.shape_cast %238 : vector<1x8x8xf32> to vector<8x8xf32>
    %240 = tpu.concatenate %235, %237, %239 in 0 : vector<8x8xf32>, vector<8x8xf32>, vector<8x8xf32> -> vector<24x8xf32>
    %241 = vector.extract_strided_slice %226 {offsets = [6, 0, 0], sizes = [1, 8, 8], strides = [1, 1, 1]} : vector<24x8x8xf32> to vector<1x8x8xf32>
    %242 = vector.shape_cast %241 : vector<1x8x8xf32> to vector<8x8xf32>
    %243 = vector.extract_strided_slice %226 {offsets = [7, 0, 0], sizes = [1, 8, 8], strides = [1, 1, 1]} : vector<24x8x8xf32> to vector<1x8x8xf32>
    %244 = vector.shape_cast %243 : vector<1x8x8xf32> to vector<8x8xf32>
    %245 = vector.extract_strided_slice %226 {offsets = [8, 0, 0], sizes = [1, 8, 8], strides = [1, 1, 1]} : vector<24x8x8xf32> to vector<1x8x8xf32>
    %246 = vector.shape_cast %245 : vector<1x8x8xf32> to vector<8x8xf32>
    %247 = tpu.concatenate %242, %244, %246 in 0 : vector<8x8xf32>, vector<8x8xf32>, vector<8x8xf32> -> vector<24x8xf32>
    %248 = vector.extract_strided_slice %226 {offsets = [9, 0, 0], sizes = [1, 8, 8], strides = [1, 1, 1]} : vector<24x8x8xf32> to vector<1x8x8xf32>
    %249 = vector.shape_cast %248 : vector<1x8x8xf32> to vector<8x8xf32>
    %250 = vector.extract_strided_slice %226 {offsets = [10, 0, 0], sizes = [1, 8, 8], strides = [1, 1, 1]} : vector<24x8x8xf32> to vector<1x8x8xf32>
    %251 = vector.shape_cast %250 : vector<1x8x8xf32> to vector<8x8xf32>
    %252 = vector.extract_strided_slice %226 {offsets = [11, 0, 0], sizes = [1, 8, 8], strides = [1, 1, 1]} : vector<24x8x8xf32> to vector<1x8x8xf32>
    %253 = vector.shape_cast %252 : vector<1x8x8xf32> to vector<8x8xf32>
    %254 = tpu.concatenate %249, %251, %253 in 0 : vector<8x8xf32>, vector<8x8xf32>, vector<8x8xf32> -> vector<24x8xf32>
    %255 = vector.extract_strided_slice %226 {offsets = [12, 0, 0], sizes = [1, 8, 8], strides = [1, 1, 1]} : vector<24x8x8xf32> to vector<1x8x8xf32>
    %256 = vector.shape_cast %255 : vector<1x8x8xf32> to vector<8x8xf32>
    %257 = vector.extract_strided_slice %226 {offsets = [13, 0, 0], sizes = [1, 8, 8], strides = [1, 1, 1]} : vector<24x8x8xf32> to vector<1x8x8xf32>
    %258 = vector.shape_cast %257 : vector<1x8x8xf32> to vector<8x8xf32>
    %259 = vector.extract_strided_slice %226 {offsets = [14, 0, 0], sizes = [1, 8, 8], strides = [1, 1, 1]} : vector<24x8x8xf32> to vector<1x8x8xf32>
    %260 = vector.shape_cast %259 : vector<1x8x8xf32> to vector<8x8xf32>
    %261 = tpu.concatenate %256, %258, %260 in 0 : vector<8x8xf32>, vector<8x8xf32>, vector<8x8xf32> -> vector<24x8xf32>
    %262 = vector.extract_strided_slice %226 {offsets = [15, 0, 0], sizes = [1, 8, 8], strides = [1, 1, 1]} : vector<24x8x8xf32> to vector<1x8x8xf32>
    %263 = vector.shape_cast %262 : vector<1x8x8xf32> to vector<8x8xf32>
    %264 = vector.extract_strided_slice %226 {offsets = [16, 0, 0], sizes = [1, 8, 8], strides = [1, 1, 1]} : vector<24x8x8xf32> to vector<1x8x8xf32>
    %265 = vector.shape_cast %264 : vector<1x8x8xf32> to vector<8x8xf32>
    %266 = vector.extract_strided_slice %226 {offsets = [17, 0, 0], sizes = [1, 8, 8], strides = [1, 1, 1]} : vector<24x8x8xf32> to vector<1x8x8xf32>
    %267 = vector.shape_cast %266 : vector<1x8x8xf32> to vector<8x8xf32>
    %268 = tpu.concatenate %263, %265, %267 in 0 : vector<8x8xf32>, vector<8x8xf32>, vector<8x8xf32> -> vector<24x8xf32>
    %269 = vector.extract_strided_slice %226 {offsets = [18, 0, 0], sizes = [1, 8, 8], strides = [1, 1, 1]} : vector<24x8x8xf32> to vector<1x8x8xf32>
    %270 = vector.shape_cast %269 : vector<1x8x8xf32> to vector<8x8xf32>
    %271 = vector.extract_strided_slice %226 {offsets = [19, 0, 0], sizes = [1, 8, 8], strides = [1, 1, 1]} : vector<24x8x8xf32> to vector<1x8x8xf32>
    %272 = vector.shape_cast %271 : vector<1x8x8xf32> to vector<8x8xf32>
    %273 = vector.extract_strided_slice %226 {offsets = [20, 0, 0], sizes = [1, 8, 8], strides = [1, 1, 1]} : vector<24x8x8xf32> to vector<1x8x8xf32>
    %274 = vector.shape_cast %273 : vector<1x8x8xf32> to vector<8x8xf32>
    %275 = tpu.concatenate %270, %272, %274 in 0 : vector<8x8xf32>, vector<8x8xf32>, vector<8x8xf32> -> vector<24x8xf32>
    %276 = vector.extract_strided_slice %226 {offsets = [21, 0, 0], sizes = [1, 8, 8], strides = [1, 1, 1]} : vector<24x8x8xf32> to vector<1x8x8xf32>
    %277 = vector.shape_cast %276 : vector<1x8x8xf32> to vector<8x8xf32>
    %278 = vector.extract_strided_slice %226 {offsets = [22, 0, 0], sizes = [1, 8, 8], strides = [1, 1, 1]} : vector<24x8x8xf32> to vector<1x8x8xf32>
    %279 = vector.shape_cast %278 : vector<1x8x8xf32> to vector<8x8xf32>
    %280 = vector.extract_strided_slice %226 {offsets = [23, 0, 0], sizes = [1, 8, 8], strides = [1, 1, 1]} : vector<24x8x8xf32> to vector<1x8x8xf32>
    %281 = vector.shape_cast %280 : vector<1x8x8xf32> to vector<8x8xf32>
    %282 = tpu.concatenate %277, %279, %281 in 0 : vector<8x8xf32>, vector<8x8xf32>, vector<8x8xf32> -> vector<24x8xf32>
    %283 = tpu.concatenate %233, %240, %247, %254, %261, %268, %275, %282 in 1 : vector<24x8xf32>, vector<24x8xf32>, vector<24x8xf32>, vector<24x8xf32>, vector<24x8xf32>, vector<24x8xf32>, vector<24x8xf32>, vector<24x8xf32> -> vector<24x64xf32>
    %c0_20 = arith.constant 0 : index
    %c0_21 = arith.constant 0 : index
    %284 = vector.load %arg3[%c0_20, %c0_21] : memref<64x64xf32, #tpu.memory_space<vmem>>, vector<64x64xf32>
    %cst_22 = arith.constant dense<0.000000e+00> : vector<24x64xf32>
    %285 = tpu.matmul %283, %284, %cst_22 {dimension_numbers = #tpu.dot_dimension_numbers<[1], [0], [0], [1], [0, 0, 1, 1], [], []>} : vector<24x64xf32>, vector<64x64xf32>, vector<24x64xf32> -> vector<24x64xf32>
    %c0_23 = arith.constant 0 : index
    %c0_24 = arith.constant 0 : index
    %286 = vector.load %arg4[%c0_23, %c0_24] : memref<1x64xf32, #tpu.memory_space<vmem>>, vector<1x64xf32>
    %287 = vector.broadcast %286 : vector<1x64xf32> to vector<24x64xf32>
    %288 = arith.addf %285, %287 : vector<24x64xf32>
    %c0_25 = arith.constant 0 : index
    %c0_26 = arith.constant 0 : index
    %c0_27 = arith.constant 0 : index
    %289 = vector.load %arg5[%c0_25, %c0_26, %c0_27] : memref<1x24x64xf32, #tpu.memory_space<vmem>>, vector<1x24x64xf32>
    %290 = vector.shape_cast %289 : vector<1x24x64xf32> to vector<24x64xf32>
    %291 = vector.shape_cast %288 : vector<24x64xf32> to vector<1x24x64xf32>
    tpu.vector_store %arg5[%c0_25, %c0_26, %c0_27], %291 {strides = array<i32>} : memref<1x24x64xf32, #tpu.memory_space<vmem>>, vector<1x24x64xf32>,
    return
  }
  func.func @transform_0(%arg0: i32) -> (i32, i32, i32) {
    %c0_i32 = arith.constant 0 : i32
    %c0_i32_0 = arith.constant 0 : i32
    %c0_i32_1 = arith.constant 0 : i32
    return %arg0, %c0_i32, %c0_i32_0 : i32, i32, i32
  }
  func.func @transform_1(%arg0: i32) -> (i32, i32) {
    %c0_i32 = arith.constant 0 : i32
    %c0_i32_0 = arith.constant 0 : i32
    %c0_i32_1 = arith.constant 0 : i32
    return %c0_i32, %c0_i32_0 : i32, i32
  }
  func.func @transform_2(%arg0: i32) -> (i32, i32) {
    %c0_i32 = arith.constant 0 : i32
    %c0_i32_0 = arith.constant 0 : i32
    %c0_i32_1 = arith.constant 0 : i32
    return %c0_i32, %c0_i32_0 : i32, i32
  }
  func.func @transform_3(%arg0: i32) -> (i32, i32) {
    %c0_i32 = arith.constant 0 : i32
    %c0_i32_0 = arith.constant 0 : i32
    %c0_i32_1 = arith.constant 0 : i32
    return %c0_i32, %c0_i32_0 : i32, i32
  }
  func.func @transform_4(%arg0: i32) -> (i32, i32, i32) {
    %c0_i32 = arith.constant 0 : i32
    %c0_i32_0 = arith.constant 0 : i32
    %c0_i32_1 = arith.constant 0 : i32
    return %arg0, %c0_i32, %c0_i32_0 : i32, i32, i32
  }
  func.func @transform_5(%arg0: i32) -> (i32, i32, i32, i32) {
    %c0_i32 = arith.constant 0 : i32
    %c0_i32_0 = arith.constant 0 : i32
    %c0_i32_1 = arith.constant 0 : i32
    %c0_i32_2 = arith.constant 0 : i32
    return %arg0, %c0_i32, %c0_i32_0, %c0_i32_1 : i32, i32, i32, i32
  }
}

</mosaic_0001>

<bundles_post_ra>
// kernel: group_attention_forward.1
= control target key start
LH: loop header
LB: loop body
LE: loop exit
PB: predicated region body
PF: predicated region fallthrough
CT: control target
= control target key end

     0   :  { %11 = vsyncpa [#allocation3], 0  ;;  %s8744_s0 = inlined_call_operand.hbm [shape: f32[2,24,64], index: 0, kind: input, shape index: {}]   ;;  %s8745_s1 = inlined_call_operand.hbm [shape: f32[64,192], index: 1, kind: input, shape index: {}]   ;;  %s8746_s2 = inlined_call_operand.hbm [shape: f32[64,64], index: 2, kind: input, shape index: {}]   ;;  %s8747_s3 = inlined_call_operand.vmem [shape: f32[1,64], index: 3, kind: input, shape index: {}]   ;;  %s8748_s4 = inlined_call_operand.hbm [shape: f32[2,24,64], index: 4, kind: output, shape index: {0}]   ;;  %s8749_s5 = inlined_call_operand.hbm [shape: f32[2,24,8,20], index: 5, kind: output, shape index: {1}]  }
   0x1   :  { %13 = vsyncpa [#allocation3 + $0x1], 0 }
   0x2   :  { %14 = vsyncpa [#allocation6], 0 }
   0x3   :  { %15 = vsyncpa [#allocation4], 0 }
   0x4   :  { %17 = vsyncpa [#allocation4 + $0x1], 0 }
   0x5   :  { %18 = vsyncpa [#allocation10], 0 }
   0x6   :  { %20 = vsyncpa [#allocation10 + $0x1], 0  ;;  %s7067_s18 = smov 0   ;;  %s7069_s19 = smov 0  }
   0x7   :  { %s7071_s20 = smov 0   ;;  %s7073_s21 = smov 0  }
   0x8 LB: > { %s7088_s22 = sadd.s32 4294967295, %s7009_s21   ;;  %s5341_s23 = sadd.s32 4294967294, %s7009_s21   ;;  %s7009_s21 = sphi %s7073_s21, %s8819_s21   ;;  %s7005_s20 = sphi %s7071_s20, %s8818_s20   ;;  %s7001_s19 = sphi %s7069_s19, %s8817_s19   ;;  %s6997_s18 = sphi %s7067_s18, %s8816_s18  }
   0x9   : > { %p46_p0 = scmp.ne.s32.totalorder %s7001_s19, %s6997_s18  ;;  %p8750_p1 = scmp.eq.s32.totalorder %s7088_s22, 0 }
   0xa   : > { %p139_p3 = scmp.eq.s32.totalorder %s5341_s23, 1  ;;  %p5342_p5 = scmp.ge.s32.totalorder %s7009_s21, 1 }
   0xb   : > { %p7097_p4 = por %p8750_p1, %p46_p0  ;;  %p172_p7 = scmp.lt.s32.totalorder %s7009_s21, 3 }
   0xc   : > { %p7102_p6 = por %p139_p3, %p46_p0  ;;  %s7011_s27 = smov [#allocation5]  }
   0xd   : > { %s8767_s24 = scalar_select %p7097_p4, 1, 0 }
   0xe   : > { %s8768_s25 = scalar_select %p7102_p6, 1, 0 }
   0xf   : > { %p7107_p8 = pnand %p5342_p5, %p172_p7  ;;  %s184_s28 = sshll.u32 %s7011_s27, 4  ;;  %s7111_s28 = int_to_ptr.vmem [resolvable:$true] %s184_s28 }
  0x10   : > { %s7012_s30 = smov [#allocation7]   ;;  %s6821_s9 = scalar_lea.hbm %s8745_s1, 2048 }
  0x11   : > { %p6381_p9 = pneg %p7107_p8  ;;  %s197_s6 = sshll.u32 %s7012_s30, 4  ;;  %s7122_s6 = int_to_ptr.vmem [resolvable:$true] %s197_s6 }
  0x12   : > { %p6822_p12 = scmp.ne.s32.totalorder %s8745_s1, %s6821_s9  ;;  %p6828_p5 = scmp.lt.u32.totalorder %s6821_s9, %s8745_s1 }
  0x13   : > { %p7118_p11 = pnand %p6381_p9, %p8750_p1 }
  0x15   : > { %p6823_p13 = pneg %p7118_p11 }
  0x17   : > { %p6824_p0 = pnand %p6823_p13, %p6822_p12 }
  0x19   : > { %p6825_p3 = pneg %p6824_p0 }
  0x1b   : > { %p6830_p7 = pnand %p6828_p5, %p6825_p3 }
  0x1d   : > { %6833 = shalt.err (!%p6830_p7)
}
  0x1e   : > { %s6834_s14 = scalar_lea.vmem %s7111_s28, 2048  ;;  %p6842_p2 = scmp.lt.s32.totalorder %s7111_s28, %s7111_s28 }
  0x1f   : > { %p6835_p9 = scmp.ne.s32.totalorder %s7111_s28, %s6834_s14  ;;  %p6843_p12 = scmp.lt.s32.totalorder %s6834_s14, %s6834_s14 }
  0x21   : > { %p6837_p10 = pnand %p6835_p9, %p6823_p13  ;;  %p6844_p0 = por %p6843_p12, %p6842_p2 }
  0x23   : > { %p6838_p1 = pneg %p6837_p10 }
  0x25   : > { %p6845_p6 = pnand %p6844_p0, %p6838_p1 }
  0x27   : > { %6848 = shalt.err (!%p6845_p6)
}
  0x28   : > { %s7013_s15 = smov 256   ;;  %s7014_s16 = smov 16  }
  0x29   : > { %6384 = dma.hbm_to_vmem [thread:$0]  (!%p7118_p11), %s8745_s1, 2048, %s7111_s28, [#allocation6], %s7013_s15, %s7013_s15, %s7014_s16  }
  0x2a   : > { %s6849_s7 = scalar_lea.hbm %s8746_s2, 1024 }
  0x2b   : > { %p6850_p2 = scmp.ne.s32.totalorder %s8746_s2, %s6849_s7  ;;  %p6856_p10 = scmp.lt.u32.totalorder %s6849_s7, %s8746_s2 }
  0x2d   : > { %p6852_p1 = pnand %p6850_p2, %p6823_p13 }
  0x2f   : > { %p6853_p6 = pneg %p6852_p1 }
  0x31   : > { %p6858_p3 = pnand %p6856_p10, %p6853_p6 }
  0x33   : > { %6861 = shalt.err (!%p6858_p3)
}
  0x34   : > { %s6862_s28 = scalar_lea.vmem %s7122_s6, 1024  ;;  %p6870_p12 = scmp.lt.s32.totalorder %s7122_s6, %s7122_s6 }
  0x35   : > { %p6863_p5 = scmp.ne.s32.totalorder %s7122_s6, %s6862_s28  ;;  %p6871_p0 = scmp.lt.s32.totalorder %s6862_s28, %s6862_s28 }
  0x37   : > { %p6865_p7 = pnand %p6863_p5, %p6823_p13  ;;  %p6872_p2 = por %p6871_p0, %p6870_p12 }
  0x39   : > { %p6866_p9 = pneg %p6865_p7 }
  0x3b   : > { %p6873_p1 = pnand %p6872_p2, %p6866_p9 }
  0x3d   : > { %6876 = shalt.err (!%p6873_p1)
}
  0x3e   : > { %s8751_s12 = smov 128   ;;  %s7016_s13 = smov 8  }
  0x3f   : > { %6387 = dma.hbm_to_vmem [thread:$0]  (!%p7118_p11), %s8746_s2, 1024, %s7122_s6, [#allocation6], %s8751_s12, %s8751_s12, %s7016_s13  }
  0x40   : > { %s7180_s16 = sadd.s32 1, %s7009_s21   ;;  %s33_s23 = sadd.s32 1, %s7005_s20 }
  0x41   : > { %s30_s17 = ssub.s32 %s7009_s21, %s7180_s16  ;;  %p40_p6 = scmp.ne.s32.totalorder %s7005_s20, %s7001_s19 }
  0x42   : > { %p31_p13 = scmp.eq.s32.totalorder %s30_s17, 0  ;;  %p41_p10 = scmp.eq.s32.totalorder %s7009_s21, 0 }
  0x43   : > { %p8771_p5 = scmp.eq.s32.totalorder %s7088_s22, 1  ;;  %p6401_p9 = scmp.lt.s32.totalorder %s7009_s21, 2 }
  0x44   : > { %s7189_s27 = scalar_select %p31_p13, %s7005_s20, %s33_s23  }
  0x45   : > { %p42_p3 = por %p41_p10, %p40_p6  ;;  %p7193_p7 = por %p8771_p5, %p40_p6 }
  0x46   : > { %s214_s30 = sand.u32 1, %s7005_s20   ;;  %s6362_s6 = smul.u32 384, %s7009_s21 }
  0x47   : > { %s8772_s29 = scalar_select %p7193_p7, 1, 0 }
  0x48   : > { %s6361_s7 = smul.u32 24, %s214_s30  ;;  %p7200_p11 = pnand %p6401_p9, %p42_p3 }
  0x49   : > { %s7207_s11 = scalar_lea.hbm %s8744_s0, %s6362_s6  ;;  %s7211_s15 = scalar_lea.sflag [#allocation3], %s214_s30 }
  0x4a   : > { %s218_s28 = scalar_lea.vmem [#allocation2], %s6361_s7  ;;  %s6877_s17 = scalar_lea.hbm %s7207_s11, 384 }
  0x4b   : > { %s225_s14 = sshll.u32 %s218_s28, 4  ;;  %p6878_p12 = scmp.ne.s32.totalorder %s7207_s11, %s6877_s17  ;;  %s7209_s14 = int_to_ptr.vmem [resolvable:$true] %s225_s14 }
  0x4c   : > { %p6879_p0 = pneg %p7200_p11  ;;  %s6882_s9 = scalar_lea.hbm %s8744_s0, 768 }
  0x4d   : > { %p6883_p13 = scmp.lt.u32.totalorder %s7207_s11, %s8744_s0  ;;  %p6884_p6 = scmp.lt.u32.totalorder %s6882_s9, %s6877_s17 }
  0x4e   : > { %p6880_p2 = pnand %p6879_p0, %p6878_p12  ;;  %p6886_p3 = scmp.lt.u32.totalorder %s6877_s17, %s7207_s11 }
  0x4f   : > { %p6885_p10 = por %p6884_p6, %p6883_p13 }
  0x50   : > { %p6881_p1 = pneg %p6880_p2 }
  0x51   : > { %p6887_p5 = por %p6886_p3, %p6885_p10 }
  0x53   : > { %p6888_p9 = pnand %p6887_p5, %p6881_p1 }
  0x55   : > { %6891 = shalt.err (!%p6888_p9)
}
  0x56   : > { %s6892_s30 = scalar_lea.vmem %s7209_s14, 384  ;;  %s7017_s7 = smov [#allocation2]  }
  0x57   : > { %p6893_p12 = scmp.ne.s32.totalorder %s7209_s14, %s6892_s30  ;;  %s6897_s28 = sshll.u32 %s7017_s7, 4  ;;  %s6898_s28 = int_to_ptr.vmem [resolvable:$false] %s6897_s28 }
  0x58   : > { %s6899_s12 = scalar_lea.vmem %s6898_s28, 768  ;;  %p6900_p4 = scmp.lt.s32.totalorder %s7209_s14, %s6898_s28 }
  0x59   : > { %p6895_p2 = pnand %p6893_p12, %p6879_p0  ;;  %p6901_p13 = scmp.lt.s32.totalorder %s6899_s12, %s6892_s30 }
  0x5b   : > { %p6896_p7 = pneg %p6895_p2  ;;  %p6902_p6 = por %p6901_p13, %p6900_p4 }
  0x5d   : > { %p6903_p10 = pnand %p6902_p6, %p6896_p7 }
  0x5f   : > { %6906 = shalt.err (!%p6903_p10)
}
  0x60   : > { %s8774_s17 = smov 128   ;;  %237 = sbr.rel (%p7107_p8) target bundleno = 1983 (0x7bf), region = 36 }
  0x61   : > { %6391 = dma.hbm_to_vmem [thread:$0]  (!%p7200_p11), %s7207_s11, 384, %s7209_s14, %s7211_s15, %s8774_s17, %s8774_s17, %s7016_s13  }
  0x67   : > { %s7245_s23 = sand.u32 1, %s7001_s19   ;;  %p8775_p4 = scmp.ne.s32.totalorder %s8767_s24, 0 }
  0x68   : > { %s6363_s6 = smul.u32 24, %s7245_s23  ;;  %s240_s9 = scalar_lea.sflag [#allocation3], %s7245_s23 }
  0x6a   : > { %s7251_s8 = scalar_lea.vmem [#allocation2], %s6363_s6 }
  0x6b   : > { %6980 = dma.done.wait (%p8775_p4), %s240_s9, 384  }
  0x6c   : > { %6982 = vsyncadd (%p8775_p4), %s240_s9, 4294966912  ;;  %p8776_p7 = scmp.eq.s32.totalorder %s7088_s22, 0 }
  0x6e   : > { %6984 = dma.done.wait (%p8776_p7), [#allocation6], 3072   ;;  %p8777_p8 = pmov %p8776_p7 }
  0x6f   : > { %v8756_v0 = vmov 0.0   ;;  %v287_v1 = vld [vmem:[#allocation5 + $0x8] sm:$0xff]  ;;  %v289_v2 = vld [vmem:[#allocation5 + $0x18] sm:$0xff]  ;;  %v286_v3 = vld [vmem:[#allocation5] sm:$0xff]  ;;  %vm302_vm0 = vcmask 523264   ;;  %vm401_vm1 = vcmask 1045504  }
  0x70   : > { %6986 = vsyncadd (%p8777_p8), [#allocation6], 4294964224  ;;  %376 = vmatprep.mubr.f32.mxu0 %v8756_v0  ;;  %v6165_v4 = vpack.c.bf16 %v289_v2, %v287_v1  ;;  %v288_v5 = vld [vmem:[#allocation5 + $0x10] sm:$0xff]  ;;  %v291_v6 = vld [vmem:[#allocation5 + $0x28] sm:$0xff]  ;;  %vm403_vm2 = vcmask 1043456   ;;  %vm416_vm3 = vcmask 1041408  }
  0x71   : > { %v293_v7 = vld [vmem:[#allocation5 + $0x38] sm:$0xff]  ;;  %v6167_v8 = vpack.c.bf16 %v288_v5, %v286_v3  ;;  %v290_v10 = vld [vmem:[#allocation5 + $0x20] sm:$0xff]  ;;  %v292_v11 = vld [vmem:[#allocation5 + $0x30] sm:$0xff]  ;;  %s7019_s24 = smov 120   ;;  %s7020_s26 = smov 112   ;;  %v8754_v1 = vmov 0.0|0.0  }
  0x72   : > { %v6169_v9 = vpack.c.bf16 %v293_v7, %v291_v6  ;;  %v295_v12 = vld [vmem:[#allocation5 + $0x48] sm:$0xff]  ;;  %6166 = vmatprep.subr.bf16.mxu0 %v6165_v4  ;;  %v297_v13 = vld [vmem:[#allocation5 + $0x58] sm:$0xff]  ;;  %v6171_v14 = vpack.c.bf16 %v292_v11, %v290_v10  ;;  %v294_v16 = vld [vmem:[#allocation5 + $0x40] sm:$0xff]  ;;  %6185 = vmatprep.subr.bf16.mxu1 %v8754_v1  ;;  %s7022_s13 = smov 104   ;;  %s7023_s11 = smov 64   ;;  %vm7024_vm4 = vmmov 0  }
  0x73   : > { %6168 = vmatpush1.bf16.msra.mxu0 %v6167_v8  ;;  %v6173_v15 = vpack.c.bf16 %v297_v13, %v295_v12  ;;  %v296_v17 = vld [vmem:[#allocation5 + $0x50] sm:$0xff]  ;;  %v299_v18 = vld [vmem:[#allocation5 + $0x68] sm:$0xff]  ;;  %v301_v19 = vld [vmem:[#allocation5 + $0x78] sm:$0xff]  ;;  %5723 = vmatprep.mubr.msk.f32.mxu1 %vm7024_vm4, %v8756_v0  ;;  %s7025_s14 = smov 96   ;;  %s7026_s15 = smov 88   ;;  %vm854_vm5 = vcmask 64512  }
  0x74   : > { %6170 = vmatprep.subr.bf16.mxu0 %v6169_v9  ;;  %v6175_v20 = vpack.c.bf16 %v296_v17, %v294_v16  ;;  %v6177_v21 = vpack.c.bf16 %v301_v19, %v299_v18  ;;  %v298_v22 = vld [vmem:[#allocation5 + $0x60] sm:$0xff]  ;;  %v300_v23 = vld [vmem:[#allocation5 + $0x70] sm:$0xff]  ;;  %vm7474_vm6 = vmpackc.low %vm854_vm5, %vm854_vm5  ;;  %s6364_s10 = smul.u32 192, %s7245_s23  ;;  %vm2875_vm10 = vcmask 162816   ;;  %s7027_s7 = smov 8   ;;  %vm5051_vm11 = vcmask 130048  }
  0x75   : > { %v6179_v24 = vpack.c.bf16 %v300_v23, %v298_v22  ;;  %v283_v25 = vld [vmem:[%s7251_s8] sm:$0xff]  ;;  %v284_v26 = vld [vmem:[%s7251_s8 + $0x8] sm:$0xff]  ;;  %v285_v27 = vld [vmem:[%s7251_s8 + $0x10] sm:$0xff]  ;;  %s7028_s28 = smov 16   ;;  %s7029_s12 = smov 24   ;;  %vm5055_vm12 = vcmask 195584  }
  0x76   : > { %s7770_s30 = scalar_lea.vmem [#allocation9], %s6364_s10  ;;  %s7030_s17 = smov 32   ;;  %vm5059_vm13 = vcmask 261120   ;;  %vm5063_vm14 = vcmask 326656   ;;  %vm5071_vm15 = vcmask 457728  }
  0x77   : > { %6172 = vmatpush1.bf16.msra.mxu0 %v6171_v14  ;;  %s7031_s9 = smov 40   ;;  %s7032_s8 = smov 48  }
  0x78   : > { %6174 = vmatprep.subr.bf16.mxu0 %v6173_v15  ;;  %s5188_s10 = scalar_lea.sflag [#allocation10], %s7245_s23  ;;  %p8813_p0 = scmp.ne.s32.totalorder %s8772_s29, 0 }
  0x7b   : > { %6176 = vmatpush1.bf16.msra.mxu0 %v6175_v20 }
  0x7c   : > { %6178 = vmatprep.subr.bf16.mxu0 %v6177_v21 }
  0x7f   : > { %6180 = vmatpush1.bf16.msra.mxu0 %v6179_v24 }
  0x80   : > { %6181 = vmatprep.subr.bf16.mxu0 %v8754_v1 }
  0x82   : > { %5350 = vmatmul.mubr.msk.f32.vlgmr.msra.gmra.mrb[0].mxu0 %vm302_vm0, %v283_v25 }
  0x83   : > { %382 = vmatprep.mubr.f32.mxu0 %v8756_v0 }
  0x86   : > { %5351 = vmatmul.mubr.msk.f32.gmra.mrb[2].mxu0 %vm302_vm0, %v284_v26 }
  0x87   : > { %388 = vmatprep.mubr.f32.mxu0 %v8756_v0 }
  0x8a   : > { %5352 = vmatmul.mubr.msk.f32.gmra.mrb[4].mxu0 %vm302_vm0, %v285_v27 }
  0x8b   : > { %5714 = vmatprep.mubr.msk.f32.mxu0 %vm7024_vm4, %v8756_v0 }
 0x155   : > { %v7270_v28 = vpop.f32.mrb[0].mxu0 }
 0x156   : > { %v380_v29 = vpop.f32.mrb[1].mxu0  ;;  %v414_v40 = vrot.slane %v7270_v28, 4 }
 0x157   : > { %v432_v42 = vrot.slane %v380_v29, 4 }
 0x159   : > { %v7272_v30 = vpop.f32.mrb[2].mxu0 }
 0x15a   : > { %v7274_v31 = vpop.f32.mrb[3].mxu0  ;;  %v396_v32 = vrot.slane %v7272_v30, 2  ;;  %v418_v41 = vrot.slane %v7272_v30, 4 }
 0x15b   : > { %v406_v33 = vrot.slane %v7274_v31, 2  ;;  %v435_v8 = vrot.slane %v7274_v31, 4 }
 0x15c   : > { %v402_v34 = vsel %vm401_vm1, %v7270_v28, %v396_v32 }
 0x15d   : > { %v7279_v35 = vsel %vm401_vm1, %v380_v29, %v406_v33  ;;  %v424_v36 = vrot.slane %v402_v34, 4  ;;  %v7281_v37 = vpop.f32.mrb[4].mxu0  ;;  %vm5067_vm1 = vcmask 392192  }
 0x15e   : > { %v7284_v38 = vrot.slane %v7281_v37, 4  ;;  %v392_v39 = vpop.f32.mrb[5].mxu0  ;;  %v7289_v43 = vrot.slane %v7279_v35, 4 }
 0x15f   : > { %v7291_v44 = vrot.slane %v392_v39, 4  ;;  %v582_v45 = vrot.slane %v424_v36, 4 }
 0x160   : > { %509 = vrot.lane.b32.xlu1 %v7284_v38, %s7019_s24  ;;  %v404_v46 = vsel %vm403_vm2, %v396_v32, %v7284_v38  ;;  %v417_v47 = vsel %vm416_vm3, %v7284_v38, %v414_v40  ;;  %v420_v48 = vsel %vm416_vm3, %v7284_v38, %v418_v41  ;;  %v559_v49 = vrot.slane %v7284_v38, 4 }
 0x161   : > { %v7302_v50 = vpack.i.bf16 %v404_v46, %v402_v34  ;;  %v7305_v51 = vsel %vm403_vm2, %v417_v47, %v424_v36  ;;  %v434_v52 = vsel %vm416_vm3, %v7291_v44, %v432_v42  ;;  %v425_v53 = vrot.slane %v404_v46, 4 }
 0x162   : > { %v427_v54 = vrot.slane %v420_v48, 4  ;;  %v491_v55 = vrot.slane %v7305_v51, 4  ;;  %v412_v56 = vsel %vm403_vm2, %v406_v33, %v7291_v44  ;;  %v7337_v6 = vsel %vm403_vm2, %v434_v52, %v7289_v43 }
 0x163   : > { %6461 = vrot.lane.b32.xlu0 %v7302_v50, %s7019_s24  ;;  %v426_v57 = vsel %vm403_vm2, %v424_v36, %v425_v53  ;;  %v7318_v58 = vsel %vm403_vm2, %v425_v53, %v559_v49  ;;  %v7320_v59 = vrot.slane %v412_v56, 4  ;;  %v741_v15 = vrot.slane %v7291_v44, 4 }
 0x164   : > { %523 = vrot.lane.b32.xlu1 %v7284_v38, %s7020_s26  ;;  %v6485_v60 = vpack.i.bf16 %v426_v57, %v424_v36  ;;  %v492_v61 = vrot.slane %v426_v57, 4  ;;  %v428_v62 = vsel %vm403_vm2, %v425_v53, %v427_v54  ;;  %v561_v63 = vsel %vm403_vm2, %v425_v53, %v491_v55 }
 0x165   : > { %v7326_v2 = vrot.slane %v428_v62, 4  ;;  %v584_v3 = vrot.slane %v7318_v58, 4  ;;  %v443_v7 = vsel %vm403_vm2, %v7289_v43, %v7320_v59  ;;  %v437_v16 = vsel %vm416_vm3, %v7291_v44, %v435_v8 }
 0x166   : > { %v493_v4 = vsel %vm403_vm2, %v491_v55, %v492_v61  ;;  %v7333_v5 = vsel %vm403_vm2, %v582_v45, %v492_v61  ;;  %v7353_v11 = vpack.i.bf16 %v443_v7, %v7289_v43  ;;  %v654_v14 = vrot.slane %v443_v7, 4 }
 0x167   : > { %6466 = vrot.lane.b32.xlu0 %v7302_v50, %s7020_s26  ;;  %v495_v9 = vsel %vm403_vm2, %v492_v61, %v7326_v2  ;;  %v7350_v10 = vsel %vm403_vm2, %v492_v61, %v584_v3  ;;  %v444_v17 = vrot.slane %v437_v16, 4  ;;  %v7365_v18 = vpack.i.bf16 %v412_v56, %v7279_v35 }
 0x168   : > { %500 = vrot.lane.b32.xlu1 %v7305_v51, %s7019_s24  ;;  %v6495_v12 = vpack.i.bf16 %v495_v9, %v493_v4  ;;  %v6530_v13 = vpack.i.bf16 %v7350_v10, %v7333_v5  ;;  %v653_v19 = vrot.slane %v7337_v6, 4  ;;  %v7370_v20 = vsel %vm403_vm2, %v7320_v59, %v741_v15 }
 0x169   : > { %v766_v21 = vrot.slane %v7370_v20, 4  ;;  %v7375_v22 = vsel %vm403_vm2, %v7320_v59, %v444_v17  ;;  %v764_v23 = vrot.slane %v7289_v43, 4  ;;  %v7379_v24 = vpack.c.bf16 %v412_v56, %v7279_v35 }
 0x16a   : > { %v7384_v25 = vrot.slane %v7375_v22, 4  ;;  %v7393_v26 = vsel %vm403_vm2, %v653_v19, %v654_v14 }
 0x16b   : > { %6471 = vrot.lane.b32.xlu0 %v7302_v50, %s7022_s13  ;;  %v7396_v27 = vsel %vm403_vm2, %v764_v23, %v654_v14  ;;  %v7401_v29 = vsel %vm403_vm2, %v654_v14, %v766_v21 }
 0x16c   : > { %515 = vrot.lane.b32.xlu1 %v7305_v51, %s7020_s26  ;;  %v7407_v31 = vsel %vm403_vm2, %v654_v14, %v7384_v25  ;;  %v6700_v32 = vpack.i.bf16 %v7401_v29, %v7396_v27 }
 0x16f   : > { %6476 = vrot.lane.b32.xlu0 %v7302_v50, %s7023_s11 }
 0x170   : > { %529 = vrot.lane.b32.xlu1 %v7305_v51, %s7022_s13 }
 0x173   : > { %6481 = vrot.lane.b32.xlu0 %v7302_v50, %s7025_s14 }
 0x174   : > { %852 = vrot.lane.b32.xlu1 %v7305_v51, %s7023_s11 }
 0x177   : > { %6486 = vrot.lane.b32.xlu0 %v6485_v60, %s7019_s24 }
 0x178   : > { %568 = vrot.lane.b32.xlu1 %v428_v62, %s7019_s24 }
 0x17b   : > { %576 = vrot.lane.b32.xlu0 %v561_v63, %s7020_s26 }
 0x17c   : > { %570 = vrot.lane.b32.xlu1 %v7318_v58, %s7019_s24 }
 0x17f   : > { %521 = vrot.lane.b32.xlu0 %v7326_v2, %s7020_s26 }
 0x180   : > { %6491 = vrot.lane.b32.xlu1 %v6485_v60, %s7020_s26 }
 0x183   : > { %535 = vrot.lane.b32.xlu0 %v7326_v2, %s7022_s13 }
 0x184   : > { %578 = vrot.lane.b32.xlu1 %v428_v62, %s7020_s26 }
 0x187   : > { %6496 = vrot.lane.b32.xlu0 %v6495_v12, %s7019_s24 }
 0x188   : > { %566 = vrot.lane.b32.xlu1 %v561_v63, %s7019_s24 }
 0x18b   : > { %537 = vrot.lane.b32.xlu0 %v7284_v38, %s7022_s13 }
 0x18c   : > { %506 = vrot.lane.b32.xlu1 %v7326_v2, %s7019_s24 }
 0x18f   : > { %580 = vrot.lane.b32.xlu0 %v7318_v58, %s7020_s26 }
 0x190   : > { %937 = vrot.lane.b32.xlu1 %v7326_v2, %s7023_s11 }
 0x193   : > { %1017 = vrot.lane.b32.xlu0 %v7284_v38, %s7023_s11 }
 0x194   : > { %543 = vrot.lane.b32.xlu1 %v7305_v51, %s7025_s14 }
 0x197   : > { %6501 = vrot.lane.b32.xlu0 %v6495_v12, %s7020_s26 }
 0x198   : > { %448 = vrot.lane.b32.xlu1 %v7270_v28, %s7019_s24 }
 0x19b   : > { %549 = vrot.lane.b32.xlu0 %v7326_v2, %s7025_s14 }
 0x19c   : > { %557 = vrot.lane.b32.xlu1 %v7305_v51, %s7026_s15 }
 0x19f   : > { %6506 = vrot.lane.b32.xlu0 %v7302_v50, %s7026_s15 }
 0x1a0   : > { %452 = vrot.lane.b32.xlu1 %v7281_v37, %s7019_s24 }
 0x1a3   : > { %551 = vrot.lane.b32.xlu0 %v7284_v38, %s7025_s14 }
 0x1a4   : > { %454 = vrot.lane.b32.xlu1 %v7270_v28, %s7020_s26 }
 0x1a7   : > { %6511 = vrot.lane.b32.xlu0 %v6495_v12, %s7022_s13 }
 0x1a8   : > { %6521 = vrot.lane.b32.xlu1 %v6495_v12, %s7025_s14 }
 0x1ab   : > { %6516 = vrot.lane.b32.xlu0 %v6495_v12, %s7023_s11 }
 0x1ac   : > { %6526 = vrot.lane.b32.xlu1 %v6495_v12, %s7026_s15 }
 0x1af   : > { %450 = vrot.lane.b32.xlu0 %v7272_v30, %s7019_s24 }
 0x1b3   : > { %612 = vrot.lane.b32.xlu0 %v7326_v2, %s7026_s15 }
 0x1b7   : > { %6531 = vrot.lane.b32.xlu0 %v6530_v13, %s7026_s15 }
 0x1d2   : > { %v510_v34 = vpop.permute.xlu1 %509 }
 0x1d3   : > { %1261 = vrot.lane.b32.xlu0 %v510_v34, %s7023_s11 }
 0x1d5   : > { %v6462_v35 = vpop.permute.xlu0 %6461 }
 0x1d6   : > { %v524_v36 = vpop.permute.xlu1 %523  ;;  %6536 = vrot.lane.b32.xlu1 %v6462_v35, %s7023_s11 }
 0x1d9   : > { %v6467_v38 = vpop.permute.xlu0 %6466 }
 0x1da   : > { %v501_v39 = vpop.permute.xlu1 %500  ;;  %6541 = vrot.lane.b32.xlu1 %v6467_v38, %s7023_s11 }
 0x1db   : > { %v591_v9 = vrot.slane %v501_v39, 4 }
 0x1dd   : > { %v6472_v40 = vpop.permute.xlu0 %6471 }
 0x1de   : > { %v7468_v41 = vpop.permute.xlu1 %515  ;;  %1097 = vrot.lane.b32.xlu1 %v501_v39, %s7023_s11 }
 0x1e1   : > { %v6477_v42 = vpop.permute.xlu0 %6476 }
 0x1e2   : > { %v6479_v43 = vunpack.i.h.bf16 %v6477_v42  ;;  %v6478_v45 = vunpack.i.l.bf16 %v6477_v42  ;;  %v530_v46 = vpop.permute.xlu1 %529  ;;  %1341 = vrot.lane.b32.xlu1 %v7468_v41, %s7023_s11 }
 0x1e4   : > { %v6182_v48 = vpack.c.bf16 %v6479_v43, %v6478_v45 }
 0x1e5   : > { %v7478_v49 = vpop.permute.xlu0 %6481 }
 0x1e6   : > { %v853_v50 = vpop.permute.xlu1 %852  ;;  %6184 = vmatpush3.bf16.xpose.msk.msra.mxu0 %vm7474_vm6, %v6182_v48 }
 0x1e7   : > { %5712 = vmatprep.subr.mxu0 %v8756_v0 }
 0x1e9   : > { %v7485_v51 = vpop.permute.xlu0 %6486 }
 0x1ea   : > { %v7487_v52 = vpop.permute.xlu1 %568  ;;  %v6489_v7 = vunpack.i.h.bf16 %v7485_v51  ;;  %v6488_v42 = vunpack.i.l.bf16 %v7485_v51 }
 0x1ec   : > { %v587_v58 = vrot.slane %v6489_v7, 4 }
 0x1ed   : > { %v7489_v53 = vpop.permute.xlu0 %576 }
 0x1ee   : > { %5713 = vmatpush3.xpose.msk.msra.mxu0 %vm854_vm5, %v853_v50  ;;  %v7492_v54 = vpop.permute.xlu1 %570  ;;  %v592_v12 = vsel %vm403_vm2, %v591_v9, %v587_v58  ;;  %v600_v9 = vrot.slane %v7489_v53, 4 }
 0x1ef   : > { %6189 = vmatprep.subr.bf16.mxu0 %v8754_v1  ;;  %v595_v43 = vrot.slane %v7492_v54, 4 }
 0x1f1   : > { %5715 = vmatmul.mubr.msk.f32.vlgmr.msra.gmra.mrb[6].mxu0 %vm854_vm5, %v7270_v28  ;;  %v522_v55 = vpop.permute.xlu0 %521  ;;  %v596_v51 = vsel %vm403_vm2, %v587_v58, %v595_v43 }
 0x1f2   : > { %6192 = vmatpush3.bf16.xpose.msk.msra.mxu0 %vm7474_vm6, %v6182_v48  ;;  %v6492_v56 = vpop.permute.xlu1 %6491  ;;  %5732 = vmatprep.mubr.msk.f32.mxu0 %vm7024_vm4, %v8756_v0 }
 0x1f3   : > { %5730 = vmatprep.subr.mxu0 %v8756_v0  ;;  %v6494_v17 = vunpack.i.h.bf16 %v6492_v56  ;;  %v6493_v23 = vunpack.i.l.bf16 %v6492_v56  ;;  %v586_v56 = vrot.slane %v6488_v42, 4 }
 0x1f5   : > { %v536_v57 = vpop.permute.xlu0 %535  ;;  %v598_v38 = vrot.slane %v6494_v17, 4  ;;  %v597_v39 = vrot.slane %v6493_v23, 4 }
 0x1f6   : > { %v7502_v60 = vpop.permute.xlu1 %578 }
 0x1f7   : > { %v599_v48 = vsel %vm403_vm2, %v597_v39, %v598_v38  ;;  %v604_v54 = vrot.slane %v7502_v60, 4 }
 0x1f9   : > { %v6497_v61 = vpop.permute.xlu0 %6496  ;;  %v605_v7 = vsel %vm403_vm2, %v598_v38, %v604_v54 }
 0x1fa   : > { %v567_v62 = vpop.permute.xlu1 %566  ;;  %6546 = vrot.lane.b32.xlu0 %v6497_v61, %s7023_s11 }
 0x1fb   : > { %v589_v34 = vrot.slane %v567_v62, 4  ;;  %v6570_v62 = vpack.i.bf16 %v599_v48, %v596_v51 }
 0x1fd   : > { %v7504_v63 = vpop.permute.xlu0 %537 }
 0x1fe   : > { %v507_v2 = vpop.permute.xlu1 %506  ;;  %618 = vrot.lane.b32.xlu0 %v584_v3, %s7026_s15  ;;  %v593_v3 = vrot.slane %v7487_v52, 4 }
 0x1ff   : > { %1181 = vrot.lane.b32.xlu1 %v507_v2, %s7023_s11  ;;  %v590_v2 = vsel %vm403_vm2, %v587_v58, %v589_v34 }
 0x200   : > { %v594_v13 = vsel %vm403_vm2, %v587_v58, %v593_v3 }
 0x201   : > { %v7508_v4 = vpop.permute.xlu0 %580  ;;  %v6560_v16 = vpack.i.bf16 %v594_v13, %v592_v12 }
 0x202   : > { %456 = vrot.lane.b32.xlu0 %v7272_v30, %s7020_s26  ;;  %v938_v14 = vpop.permute.xlu1 %937  ;;  %v606_v50 = vrot.slane %v7508_v4, 4 }
 0x203   : > { %1425 = vrot.lane.b32.xlu1 %v522_v55, %s7023_s11 }
 0x204   : > { %v607_v4 = vsel %vm403_vm2, %v598_v38, %v606_v50 }
 0x205   : > { %v1018_v5 = vpop.permute.xlu0 %1017 }
 0x206   : > { %5731 = vmatpush3.xpose.msk.msra.mxu0 %vm854_vm5, %v1018_v5  ;;  %1505 = vrot.lane.b32.xlu0 %v524_v36, %s7023_s11  ;;  %v544_v36 = vpop.permute.xlu1 %543 }
 0x207   : > { %6551 = vrot.lane.b32.xlu1 %v6472_v40, %s7023_s11  ;;  %6197 = vmatprep.subr.bf16.mxu0 %v8754_v1 }
 0x209   : > { %5733 = vmatmul.mubr.msk.f32.vlgmr.msra.gmra.mrb[8].mxu0 %vm854_vm5, %v7281_v37  ;;  %v6502_v8 = vpop.permute.xlu0 %6501 }
 0x20a   : > { %5750 = vmatprep.mubr.msk.f32.mxu0 %vm7024_vm4, %v8756_v0  ;;  %6556 = vrot.lane.b32.xlu0 %v6502_v8, %s7023_s11  ;;  %v7542_v45 = vpop.permute.xlu1 %448  ;;  %v6585_v8 = vpack.i.bf16 %v607_v4, %v605_v7 }
 0x20b   : > { %458 = vrot.lane.b32.xlu1 %v7281_v37, %s7020_s26 }
 0x20d   : > { %v7528_v10 = vpop.permute.xlu0 %549 }
 0x20e   : > { %v558_v5 = vpop.permute.xlu1 %557 }
 0x20f   : > { %1585 = vrot.lane.b32.xlu1 %v530_v46, %s7023_s11 }
 0x211   : > { %v7534_v15 = vpop.permute.xlu0 %6506 }
 0x212   : > { %v7563_v12 = vpop.permute.xlu1 %452 }
 0x213   : > { %6561 = vrot.lane.b32.xlu1 %v6560_v16, %s7026_s15 }
 0x215   : > { %v552_v35 = vpop.permute.xlu0 %551 }
 0x216   : > { %v7575_v53 = vpop.permute.xlu1 %454 }
 0x217   : > { %624 = vrot.lane.b32.xlu1 %v589_v34, %s7026_s15 }
 0x219   : > { %v6512_v40 = vpop.permute.xlu0 %6511 }
 0x21a   : > { %6566 = vrot.lane.b32.xlu0 %v6512_v40, %s7023_s11  ;;  %v6522_v16 = vpop.permute.xlu1 %6521 }
 0x21b   : > { %460 = vrot.lane.b32.xlu1 %v7270_v28, %s7022_s13 }
 0x21d   : > { %v6517_v46 = vpop.permute.xlu0 %6516 }
 0x21e   : > { %v6519_v52 = vunpack.i.h.bf16 %v6517_v46  ;;  %v6518_v55 = vunpack.i.l.bf16 %v6517_v46  ;;  %6571 = vrot.lane.b32.xlu0 %v6570_v62, %s7026_s15 }
 0x21f   : > { %1669 = vrot.lane.b32.xlu1 %v536_v57, %s7023_s11  ;;  %v588_v57 = vsel %vm403_vm2, %v586_v56, %v587_v58  ;;  %v601_v58 = vsel %vm403_vm2, %v598_v38, %v600_v9 }
 0x220   : > { %v6186_v61 = vpack.c.bf16 %v6519_v52, %v6518_v55  ;;  %v6575_v60 = vpack.i.bf16 %v590_v2, %v588_v57 }
 0x221   : > { %v7581_v13 = vpop.permute.xlu0 %450 }
 0x222   : > { %6188 = vmatpush3.bf16.xpose.msk.msra.mxu1 %vm7474_vm6, %v6186_v61  ;;  %6576 = vrot.lane.b32.xlu0 %v6575_v60, %s7026_s15 }
 0x223   : > { %6581 = vrot.lane.b32.xlu1 %v7478_v49, %s7023_s11  ;;  %5721 = vmatprep.subr.mxu1 %v8756_v0  ;;  %v602_v49 = vrot.slane %v7468_v41, 4 }
 0x225   : > { %v613_v41 = vpop.permute.xlu0 %612 }
 0x226   : > { %630 = vrot.lane.b32.xlu0 %v593_v3, %s7026_s15  ;;  %v603_v3 = vsel %vm403_vm2, %v602_v49, %v598_v38 }
 0x227   : > { %6586 = vrot.lane.b32.xlu1 %v6585_v8, %s7026_s15 }
 0x229   : > { %v6532_v17 = vpop.permute.xlu0 %6531 }
 0x22a   : > { %5722 = vmatpush3.xpose.msk.msra.mxu1 %vm854_vm5, %v938_v14  ;;  %634 = vrot.lane.b32.xlu0 %v595_v43, %s7026_s15  ;;  %v6590_v14 = vpack.i.bf16 %v603_v3, %v601_v58 }
 0x22b   : > { %640 = vrot.lane.b32.xlu1 %v600_v9, %s7026_s15  ;;  %6193 = vmatprep.subr.bf16.mxu1 %v8754_v1 }
 0x22d   : > { %5724 = vmatmul.mubr.msk.f32.vlgmr.msra.gmra.mrb[0].mxu1 %vm854_vm5, %v7272_v30 }
 0x22e   : > { %5741 = vmatprep.mubr.msk.f32.mxu1 %vm7024_vm4, %v8756_v0  ;;  %462 = vrot.lane.b32.xlu0 %v7272_v30, %s7022_s13 }
 0x22f   : > { %464 = vrot.lane.b32.xlu1 %v7281_v37, %s7022_s13 }
 0x232   : > { %6591 = vrot.lane.b32.xlu0 %v6590_v14, %s7026_s15 }
 0x233   : > { %646 = vrot.lane.b32.xlu1 %v604_v54, %s7026_s15 }
 0x236   : > { %1749 = vrot.lane.b32.xlu0 %v7504_v63, %s7023_s11 }
 0x237   : > { %1913 = vrot.lane.b32.xlu1 %v7528_v10, %s7023_s11  ;;  %v6527_v10 = vpop.permute.xlu1 %6526 }
 0x23a   : > { %6596 = vrot.lane.b32.xlu0 %v6522_v16, %s7023_s11 }
 0x23b   : > { %6601 = vrot.lane.b32.xlu1 %v7534_v15, %s7023_s11 }
 0x23e   : > { %1829 = vrot.lane.b32.xlu0 %v544_v36, %s7023_s11 }
 0x23f   : > { %1993 = vrot.lane.b32.xlu1 %v552_v35, %s7023_s11 }
 0x242   : > { %466 = vrot.lane.b32.xlu0 %v7270_v28, %s7025_s14 }
 0x243   : > { %470 = vrot.lane.b32.xlu1 %v7281_v37, %s7025_s14 }
 0x246   : > { %650 = vrot.lane.b32.xlu0 %v606_v50, %s7026_s15 }
 0x247   : > { %6611 = vrot.lane.b32.xlu1 %v6532_v17, %s7023_s11 }
 0x248   : > { %v6537_v63 = vpop.permute.xlu1 %6536 }
 0x249   : > { %v6539_v15 = vunpack.i.h.bf16 %v6537_v63  ;;  %v6538_v23 = vunpack.i.l.bf16 %v6537_v63 }
 0x24a   : > { %468 = vrot.lane.b32.xlu0 %v7272_v30, %s7025_s14 }
 0x24b   : > { %2157 = vrot.lane.b32.xlu1 %v613_v41, %s7023_s11  ;;  %v6194_v34 = vpack.c.bf16 %v6539_v15, %v6538_v23 }
 0x24c   : > { %v6542_v35 = vpop.permute.xlu1 %6541 }
 0x24d   : > { %6196 = vmatpush3.bf16.xpose.msk.msra.mxu1 %vm7474_vm6, %v6194_v34  ;;  %v6544_v55 = vunpack.i.h.bf16 %v6542_v35  ;;  %v6543_v56 = vunpack.i.l.bf16 %v6542_v35 }
 0x24e   : > { %6606 = vrot.lane.b32.xlu0 %v6527_v10, %s7023_s11  ;;  %5739 = vmatprep.subr.mxu1 %v8756_v0 }
 0x24f   : > { %474 = vrot.lane.b32.xlu1 %v7272_v30, %s7026_s15  ;;  %v1262_v30 = vpop.permute.xlu0 %1261  ;;  %v6206_v61 = vpack.c.bf16 %v6544_v55, %v6543_v56 }
 0x250   : > { %v1098_v36 = vpop.permute.xlu1 %1097 }
 0x252   : > { %2073 = vrot.lane.b32.xlu0 %v558_v5, %s7023_s11 }
 0x255   : > { %5740 = vmatpush3.xpose.msk.msra.mxu1 %vm854_vm5, %v1098_v36 }
 0x256   : > { %472 = vrot.lane.b32.xlu0 %v7270_v28, %s7026_s15  ;;  %6201 = vmatprep.subr.bf16.mxu1 %v8754_v1  ;;  %v1342_v28 = vpop.permute.xlu1 %1341 }
 0x258   : > { %5742 = vmatmul.mubr.msk.f32.vlgmr.msra.gmra.mrb[2].mxu1 %vm854_vm5, %v7542_v45 }
 0x259   : > { %6204 = vmatpush3.bf16.xpose.msk.msra.mxu1 %vm7474_vm6, %v6194_v34  ;;  %5759 = vmatprep.mubr.msk.f32.mxu1 %vm7024_vm4, %v8756_v0 }
 0x25a   : > { %5757 = vmatprep.subr.mxu1 %v8756_v0 }
 0x261   : > { %5758 = vmatpush3.xpose.msk.msra.mxu1 %vm854_vm5, %v1262_v30 }
 0x262   : > { %6209 = vmatprep.subr.bf16.mxu1 %v8754_v1 }
 0x264   : > { %5760 = vmatmul.mubr.msk.f32.vlgmr.msra.gmra.mrb[4].mxu1 %vm854_vm5, %v7563_v12 }
 0x265   : > { %5777 = vmatprep.mubr.msk.f32.mxu1 %vm7024_vm4, %v8756_v0 }
 0x26c   : > { %v6547_v38 = vpop.permute.xlu0 %6546 }
 0x26d   : > { %v6549_v39 = vunpack.i.h.bf16 %v6547_v38  ;;  %v6548_v40 = vunpack.i.l.bf16 %v6547_v38 }
 0x26f   : > { %v6198_v43 = vpack.c.bf16 %v6549_v39, %v6548_v40 }
 0x270   : > { %v7629_v46 = vpop.permute.xlu0 %618 }
 0x271   : > { %v1182_v42 = vpop.permute.xlu1 %1181  ;;  %6200 = vmatpush3.bf16.xpose.msk.msra.mxu0 %vm7474_vm6, %v6198_v43 }
 0x272   : > { %5748 = vmatprep.subr.mxu0 %v8756_v0 }
 0x274   : > { %v7634_v50 = vpop.permute.xlu0 %456 }
 0x275   : > { %v1426_v48 = vpop.permute.xlu1 %1425 }
 0x278   : > { %v1506_v51 = vpop.permute.xlu0 %1505 }
 0x279   : > { %v6552_v52 = vpop.permute.xlu1 %6551  ;;  %5749 = vmatpush3.xpose.msk.msra.mxu0 %vm854_vm5, %v1182_v42 }
 0x27a   : > { %6205 = vmatprep.subr.bf16.mxu0 %v8754_v1  ;;  %v6554_v8 = vunpack.i.h.bf16 %v6552_v52  ;;  %v6553_v9 = vunpack.i.l.bf16 %v6552_v52 }
 0x27c   : > { %v6557_v62 = vpop.permute.xlu0 %6556  ;;  %5751 = vmatmul.mubr.msk.f32.vlgmr.msra.gmra.mrb[10].mxu0 %vm854_vm5, %v7581_v13  ;;  %v6218_v58 = vpack.c.bf16 %v6554_v8, %v6553_v9  ;;  %v743_v9 = vsel %vm403_vm2, %v7320_v59, %v653_v19 }
 0x27d   : > { %v7636_v54 = vpop.permute.xlu1 %458  ;;  %v6559_v2 = vunpack.i.h.bf16 %v6557_v62  ;;  %v6558_v4 = vunpack.i.l.bf16 %v6557_v62  ;;  %6208 = vmatpush3.bf16.xpose.msk.msra.mxu0 %vm7474_vm6, %v6206_v61  ;;  %5768 = vmatprep.mubr.msk.f32.mxu0 %vm7024_vm4, %v8756_v0 }
 0x27e   : > { %5766 = vmatprep.subr.mxu0 %v8756_v0 }
 0x27f   : > { %v6210_v57 = vpack.c.bf16 %v6559_v2, %v6558_v4 }
 0x281   : > { %v1586_v5 = vpop.permute.xlu1 %1585  ;;  %6212 = vmatpush3.bf16.xpose.msk.msra.mxu1 %vm7474_vm6, %v6210_v57 }
 0x282   : > { %5775 = vmatprep.subr.mxu1 %v8756_v0 }
 0x285   : > { %v6562_v60 = vpop.permute.xlu1 %6561  ;;  %5767 = vmatpush3.xpose.msk.msra.mxu0 %vm854_vm5, %v1342_v28 }
 0x286   : > { %6621 = vrot.lane.b32.xlu1 %v6562_v60, %s7023_s11  ;;  %6213 = vmatprep.subr.bf16.mxu0 %v8754_v1 }
 0x288   : > { %5769 = vmatmul.mubr.msk.f32.vlgmr.msra.gmra.mrb[12].mxu0 %vm854_vm5, %v7575_v53 }
 0x289   : > { %v625_v7 = vpop.permute.xlu1 %624  ;;  %5776 = vmatpush3.xpose.msk.msra.mxu1 %vm854_vm5, %v1426_v48  ;;  %6216 = vmatpush3.bf16.xpose.msk.msra.mxu0 %vm7474_vm6, %v6206_v61  ;;  %v2841_v61 = vlaneseq }
 0x28a   : > { %2325 = vrot.lane.b32.xlu1 %v625_v7, %s7023_s11  ;;  %6217 = vmatprep.subr.bf16.mxu1 %v8754_v1 }
 0x28b   : > { %5784 = vmatprep.subr.mxu0 %v8756_v0  ;;  %5786 = vmatprep.mubr.msk.f32.mxu0 %vm7024_vm4, %v8756_v0 }
 0x28c   : > { %v6567_v3 = vpop.permute.xlu0 %6566  ;;  %5778 = vmatmul.mubr.msk.f32.vlgmr.msra.gmra.mrb[6].mxu1 %vm854_vm5, %v7634_v50 }
 0x28d   : > { %v461_v49 = vpop.permute.xlu1 %460  ;;  %6220 = vmatpush3.bf16.xpose.msk.msra.mxu1 %vm7474_vm6, %v6218_v58  ;;  %5795 = vmatprep.mubr.msk.f32.mxu1 %vm7024_vm4, %v8756_v0  ;;  %v6569_v16 = vunpack.i.h.bf16 %v6567_v3  ;;  %v6568_v41 = vunpack.i.l.bf16 %v6567_v3 }
 0x28e   : > { %478 = vrot.lane.b32.xlu1 %v7542_v45, %s7026_s15  ;;  %5793 = vmatprep.subr.mxu1 %v8756_v0 }
 0x28f   : > { %v6222_v63 = vpack.c.bf16 %v6569_v16, %v6568_v41 }
 0x290   : > { %v6572_v17 = vpop.permute.xlu0 %6571 }
 0x291   : > { %v1670_v14 = vpop.permute.xlu1 %1669  ;;  %5785 = vmatpush3.xpose.msk.msra.mxu0 %vm854_vm5, %v1506_v51 }
 0x292   : > { %6221 = vmatprep.subr.bf16.mxu0 %v8754_v1 }
 0x294   : > { %v6577_v15 = vpop.permute.xlu0 %6576  ;;  %5787 = vmatmul.mubr.msk.f32.vlgmr.msra.gmra.mrb[14].mxu0 %vm854_vm5, %v7636_v54 }
 0x295   : > { %v6582_v10 = vpop.permute.xlu1 %6581  ;;  %5794 = vmatpush3.xpose.msk.msra.mxu1 %vm854_vm5, %v1586_v5  ;;  %6224 = vmatpush3.bf16.xpose.msk.msra.mxu0 %vm7474_vm6, %v6222_v63  ;;  %v7732_v5 = vand.u32 127, %v2841_v61 }
 0x296   : > { %6225 = vmatprep.subr.bf16.mxu1 %v8754_v1  ;;  %5802 = vmatprep.subr.mxu0 %v8756_v0  ;;  %v6584_v35 = vunpack.i.h.bf16 %v6582_v10  ;;  %v6583_v36 = vunpack.i.l.bf16 %v6582_v10 }
 0x297   : > { %5804 = vmatprep.mubr.msk.f32.mxu0 %vm7024_vm4, %v8756_v0  ;;  %6616 = vrot.lane.b32.xlu0 %v6577_v15, %s7023_s11  ;;  %vm2845_vm7 = vcmp.eq.s32.totalorder %v7732_v5, 0 }
 0x298   : > { %v631_v45 = vpop.permute.xlu0 %630  ;;  %5796 = vmatmul.mubr.msk.f32.vlgmr.msra.gmra.mrb[8].mxu1 %vm854_vm5, %v461_v49  ;;  %v6230_v38 = vpack.c.bf16 %v6584_v35, %v6583_v36 }
 0x299   : > { %v6587_v23 = vpop.permute.xlu1 %6586  ;;  %6228 = vmatpush3.bf16.xpose.msk.msra.mxu1 %vm7474_vm6, %v6218_v58  ;;  %5813 = vmatprep.mubr.msk.f32.mxu1 %vm7024_vm4, %v8756_v0 }
 0x29a   : > { %5811 = vmatprep.subr.mxu1 %v8756_v0 }
 0x29b   : > { %2241 = vrot.lane.b32.xlu0 %v7629_v46, %s7023_s11 }
 0x29c   : > { %v635_v30 = vpop.permute.xlu0 %634 }
 0x29d   : > { %v641_v34 = vpop.permute.xlu1 %640  ;;  %5803 = vmatpush3.xpose.msk.msra.mxu0 %vm854_vm5, %v1670_v14 }
 0x29e   : > { %6229 = vmatprep.subr.bf16.mxu0 %v8754_v1 }
 0x29f   : > { %476 = vrot.lane.b32.xlu0 %v7281_v37, %s7026_s15 }
 0x2a0   : > { %v463_v39 = vpop.permute.xlu0 %462 }
 0x2a1   : > { %v465_v28 = vpop.permute.xlu1 %464  ;;  %5805 = vmatmul.mubr.msk.f32.vlgmr.msra.gmra.mrb[16].mxu0 %vm854_vm5, %v463_v39 }
 0x2a2   : > { %6232 = vmatpush3.bf16.xpose.msk.msra.mxu0 %vm7474_vm6, %v6230_v38  ;;  %5822 = vmatprep.mubr.msk.f32.mxu0 %vm7024_vm4, %v8756_v0 }
 0x2a3   : > { %5820 = vmatprep.subr.mxu0 %v8756_v0  ;;  %6626 = vrot.lane.b32.xlu0 %v6572_v17, %s7023_s11 }
 0x2a4   : > { %v6592_v42 = vpop.permute.xlu0 %6591 }
 0x2a5   : > { %v647_v40 = vpop.permute.xlu1 %646  ;;  %6631 = vrot.lane.b32.xlu1 %v6592_v42, %s7023_s11 }
 0x2a7   : > { %2409 = vrot.lane.b32.xlu0 %v631_v45, %s7023_s11 }
 0x2a8   : > { %v1750_v43 = vpop.permute.xlu0 %1749 }
 0x2a9   : > { %v1914_v37 = vpop.permute.xlu1 %1913  ;;  %5812 = vmatpush3.xpose.msk.msra.mxu1 %vm854_vm5, %v1750_v43  ;;  %2491 = vrot.lane.b32.xlu1 %v635_v30, %s7023_s11  ;;  %v6655_v30 = vpack.i.bf16 %v7407_v31, %v7393_v26 }
 0x2aa   : > { %6233 = vmatprep.subr.bf16.mxu1 %v8754_v1 }
 0x2ab   : > { %480 = vrot.lane.b32.xlu0 %v7581_v13, %s7026_s15 }
 0x2ac   : > { %v6597_v46 = vpop.permute.xlu0 %6596  ;;  %5814 = vmatmul.mubr.msk.f32.vlgmr.msra.gmra.mrb[10].mxu1 %vm854_vm5, %v465_v28 }
 0x2ad   : > { %v6599_v48 = vunpack.i.h.bf16 %v6597_v46  ;;  %v6598_v52 = vunpack.i.l.bf16 %v6597_v46  ;;  %5831 = vmatprep.mubr.msk.f32.mxu1 %vm7024_vm4, %v8756_v0  ;;  %v6602_v56 = vpop.permute.xlu1 %6601  ;;  %482 = vrot.lane.b32.xlu1 %v7563_v12, %s7026_s15 }
 0x2ae   : > { %v6604_v2 = vunpack.i.h.bf16 %v6602_v56  ;;  %v6603_v4 = vunpack.i.l.bf16 %v6602_v56 }
 0x2af   : > { %v6234_v55 = vpack.c.bf16 %v6599_v48, %v6598_v52  ;;  %6636 = vrot.lane.b32.xlu0 %v6587_v23, %s7023_s11 }
 0x2b0   : > { %v1830_v51 = vpop.permute.xlu0 %1829  ;;  %v6242_v7 = vpack.c.bf16 %v6604_v2, %v6603_v4 }
 0x2b1   : > { %5821 = vmatpush3.xpose.msk.msra.mxu0 %vm854_vm5, %v1830_v51  ;;  %6236 = vmatpush3.bf16.xpose.msk.msra.mxu1 %vm7474_vm6, %v6234_v55  ;;  %v1994_v62 = vpop.permute.xlu1 %1993 }
 0x2b2   : > { %6237 = vmatprep.subr.bf16.mxu0 %v8754_v1  ;;  %5829 = vmatprep.subr.mxu1 %v8756_v0 }
 0x2b3   : > { %484 = vrot.lane.b32.xlu1 %v7575_v53, %s7026_s15  ;;  %2573 = vrot.lane.b32.xlu0 %v641_v34, %s7023_s11  ;;  %v2842_v53 = vshrl.u32 %v2841_v61, 7 }
 0x2b4   : > { %v467_v13 = vpop.permute.xlu0 %466 }
 0x2b5   : > { %5823 = vmatmul.mubr.msk.f32.vlgmr.msra.gmra.mrb[18].mxu0 %vm854_vm5, %v467_v13  ;;  %v471_v57 = vpop.permute.xlu1 %470  ;;  %vm2846_vm8 = vcmp.eq.s32.totalorder %v2842_v53, 0 }
 0x2b6   : > { %6240 = vmatpush3.bf16.xpose.msk.msra.mxu0 %vm7474_vm6, %v6230_v38  ;;  %5840 = vmatprep.mubr.msk.f32.mxu0 %vm7024_vm4, %v8756_v0  ;;  %vm7749_vm9 = vmor %vm2845_vm7, %vm2846_vm8 }
 0x2b7   : > { %5838 = vmatprep.subr.mxu0 %v8756_v0  ;;  %486 = vrot.lane.b32.xlu1 %v7634_v50, %s7026_s15 }
 0x2b8   : > { %v651_v12 = vpop.permute.xlu0 %650  ;;  %2657 = vrot.lane.b32.xlu0 %v647_v40, %s7023_s11 }
 0x2b9   : > { %5830 = vmatpush3.xpose.msk.msra.mxu1 %vm854_vm5, %v1914_v37  ;;  %v6612_v16 = vpop.permute.xlu1 %6611 }
 0x2ba   : > { %6241 = vmatprep.subr.bf16.mxu1 %v8754_v1  ;;  %v6614_v17 = vunpack.i.h.bf16 %v6612_v16  ;;  %v6613_v10 = vunpack.i.l.bf16 %v6612_v16 }
 0x2bb   : > { %488 = vrot.lane.b32.xlu1 %v7636_v54, %s7026_s15 }
 0x2bc   : > { %v469_v60 = vpop.permute.xlu0 %468  ;;  %2739 = vrot.lane.b32.xlu0 %v651_v12, %s7023_s11  ;;  %v6250_v15 = vpack.c.bf16 %v6614_v17, %v6613_v10 }
 0x2bd   : > { %5832 = vmatmul.mubr.msk.f32.vlgmr.msra.gmra.mrb[12].mxu1 %vm854_vm5, %v469_v60  ;;  %v2158_v23 = vpop.permute.xlu1 %2157 }
 0x2be   : > { %5839 = vmatpush3.xpose.msk.msra.mxu0 %vm854_vm5, %v1994_v62  ;;  %6244 = vmatpush3.bf16.xpose.msk.msra.mxu1 %vm7474_vm6, %v6242_v7 }
 0x2bf   : > { %6245 = vmatprep.subr.bf16.mxu0 %v8754_v1  ;;  %5847 = vmatprep.subr.mxu1 %v8756_v0 }
 0x2c0   : > { %v6607_v50 = vpop.permute.xlu0 %6606  ;;  %5849 = vmatprep.mubr.msk.f32.mxu1 %vm7024_vm4, %v8756_v0  ;;  %6641 = vrot.lane.b32.xlu1 %v7353_v11, %s7019_s24 }
 0x2c1   : > { %v6609_v49 = vunpack.i.h.bf16 %v6607_v50  ;;  %v6608_v58 = vunpack.i.l.bf16 %v6607_v50  ;;  %5841 = vmatmul.mubr.msk.f32.vlgmr.msra.gmra.mrb[20].mxu0 %vm854_vm5, %v471_v57  ;;  %748 = vrot.lane.b32.xlu0 %v743_v9, %s7019_s24  ;;  %v475_v45 = vpop.permute.xlu1 %474 }
 0x2c2   : > { %5858 = vmatprep.mubr.msk.f32.mxu0 %vm7024_vm4, %v8756_v0 }
 0x2c3   : > { %v6246_v59 = vpack.c.bf16 %v6609_v49, %v6608_v58 }
 0x2c4   : > { %v929_v8 = vpop.f32.mrb[6].mxu0  ;;  %v2074_v41 = vpop.permute.xlu0 %2073  ;;  %752 = vrot.lane.b32.xlu1 %v7370_v20, %s7019_s24 }
 0x2c5   : > { %v2817_v3 = vmul.f32 0.125, %v929_v8  ;;  %v5716_v14 = vpop.f32.mrb[7].mxu0  ;;  %6248 = vmatpush3.bf16.xpose.msk.msra.mxu0 %vm7474_vm6, %v6246_v59  ;;  %664 = vrot.lane.b32.xlu0 %v7337_v6, %s7019_s24 }
 0x2c6   : > { %5856 = vmatprep.subr.mxu0 %v8756_v0  ;;  %5848 = vmatpush3.xpose.msk.msra.mxu1 %vm854_vm5, %v2074_v41 }
 0x2c7   : > { %v7768_v19 = vsel %vm7749_vm9, -3.4028235e+38, %v2817_v3  ;;  %6249 = vmatprep.subr.bf16.mxu1 %v8754_v1 }
 0x2c8   : > { %2876 = vst.msk [vmem:[%s7770_s30] sm:$0xff] %vm2875_vm10, %v7768_v19  ;;  %v473_v63 = vpop.permute.xlu0 %472  ;;  %758 = vrot.lane.b32.xlu1 %v743_v9, %s7020_s26  ;;  %v2900_v60 = vsel %vm2875_vm10, %v7768_v19, -inf }
 0x2c9   : > { %5850 = vmatmul.mubr.msk.f32.vlgmr.msra.gmra.mrb[14].mxu1 %vm854_vm5, %v473_v63  ;;  %750 = vrot.lane.b32.xlu0 %v7375_v22, %s7019_s24 }
 0x2ca   : > { %6252 = vmatpush3.bf16.xpose.msk.msra.mxu1 %vm7474_vm6, %v6250_v15  ;;  %5867 = vmatprep.mubr.msk.f32.mxu1 %vm7024_vm4, %v8756_v0 }
 0x2cb   : > { %5865 = vmatprep.subr.mxu1 %v8756_v0 }
 0x2cc   : > { %6651 = vrot.lane.b32.xlu1 %v7365_v18, %s7019_s24 }
 0x2cd   : > { %5857 = vmatpush3.xpose.msk.msra.mxu0 %vm854_vm5, %v2158_v23  ;;  %6646 = vrot.lane.b32.xlu0 %v7353_v11, %s7020_s26 }
 0x2ce   : > { %6253 = vmatprep.subr.bf16.mxu0 %v8754_v1 }
 0x2d0   : > { %5859 = vmatmul.mubr.msk.f32.vlgmr.msra.gmra.mrb[22].mxu0 %vm854_vm5, %v475_v45  ;;  %672 = vrot.lane.b32.xlu1 %v7384_v25, %s7019_s24 }
 0x2d1   : > { %5876 = vmatprep.mubr.msk.f32.mxu0 %vm7024_vm4, %v8756_v0  ;;  %683 = vrot.lane.b32.xlu0 %v7337_v6, %s7020_s26 }
 0x2d4   : > { %691 = vrot.lane.b32.xlu1 %v7384_v25, %s7020_s26 }
 0x2d5   : > { %760 = vrot.lane.b32.xlu0 %v7375_v22, %s7020_s26 }
 0x2d8   : > { %6671 = vrot.lane.b32.xlu1 %v7365_v18, %s7022_s13 }
 0x2d9   : > { %762 = vrot.lane.b32.xlu0 %v7370_v20, %s7020_s26 }
 0x2dc   : > { %v1089_v11 = vpop.f32.mrb[8].mxu0  ;;  %695 = vrot.lane.b32.xlu1 %v7291_v44, %s7020_s26 }
 0x2dd   : > { %v2819_v34 = vmul.f32 0.125, %v1089_v11  ;;  %v5734_v35 = vpop.f32.mrb[9].mxu0  ;;  %6656 = vrot.lane.b32.xlu0 %v6655_v30, %s7019_s24 }
 0x2df   : > { %v7816_v36 = vsel %vm2845_vm7, -3.4028235e+38, %v2819_v34 }
 0x2e0   : > { %2878 = vst.msk [vmem:[%s7770_s30 + $0x10] sm:$0xff] %vm2875_vm10, %v7816_v36  ;;  %709 = vrot.lane.b32.xlu1 %v7384_v25, %s7022_s13 }
 0x2e1   : > { %6661 = vrot.lane.b32.xlu0 %v7365_v18, %s7020_s26 }
 0x2e4   : > { %6681 = vrot.lane.b32.xlu1 %v7365_v18, %s7025_s14 }
 0x2e5   : > { %677 = vrot.lane.b32.xlu0 %v7291_v44, %s7019_s24  ;;  %s7033_s24 = smov 56  }
 0x2e8   : > { %713 = vrot.lane.b32.xlu1 %v7291_v44, %s7022_s13 }
 0x2e9   : > { %6666 = vrot.lane.b32.xlu0 %v6655_v30, %s7020_s26  ;;  %s6366_s26 = smul.u32 3072, %s7088_s22 }
 0x2ec   : > { %727 = vrot.lane.b32.xlu1 %v7384_v25, %s7025_s14 }
 0x2ed   : > { %6676 = vrot.lane.b32.xlu0 %v6655_v30, %s7022_s13 }
 0x2f0   : > { %6691 = vrot.lane.b32.xlu1 %v7365_v18, %s7026_s15 }
 0x2f1   : > { %701 = vrot.lane.b32.xlu0 %v7337_v6, %s7022_s13  ;;  %s5217_s13 = sshll.u32 %s7770_s30, 4  ;;  %s8654_s13 = int_to_ptr.vmem [resolvable:$true] %s5217_s13 }
 0x2f4   : > { %731 = vrot.lane.b32.xlu1 %v7291_v44, %s7025_s14 }
 0x2f5   : > { %6686 = vrot.lane.b32.xlu0 %v6655_v30, %s7025_s14 }
 0x2f8   : > { %737 = vrot.lane.b32.xlu1 %v7337_v6, %s7026_s15  ;;  %v6622_v39 = vpop.permute.xlu1 %6621 }
 0x2f9   : > { %719 = vrot.lane.b32.xlu0 %v7337_v6, %s7025_s14  ;;  %v6624_v46 = vunpack.i.h.bf16 %v6622_v39  ;;  %v6623_v48 = vunpack.i.l.bf16 %v6622_v39 }
 0x2fb   : > { %v6258_v56 = vpack.c.bf16 %v6624_v46, %v6623_v48 }
 0x2fc   : > { %v2326_v55 = vpop.permute.xlu1 %2325 }
 0x2fd   : > { %6696 = vrot.lane.b32.xlu0 %v6655_v30, %s7026_s15 }
 0x300   : > { %v1013_v22 = vpop.f32.mrb[0].mxu1  ;;  %v479_v13 = vpop.permute.xlu1 %478 }
 0x301   : > { %v2818_v28 = vmul.f32 0.125, %v1013_v22  ;;  %v5725_v38 = vpop.f32.mrb[1].mxu1 }
 0x303   : > { %v7854_v18 = vsel %vm2845_vm7, -3.4028235e+38, %v2818_v28 }
 0x304   : > { %2877 = vst.msk [vmem:[%s7770_s30 + $0x8] sm:$0xff] %vm2875_vm10, %v7854_v18  ;;  %v2903_v7 = vsel %vm2875_vm10, %v7854_v18, -inf }
 0x309   : > { %v6617_v40 = vpop.permute.xlu0 %6616 }
 0x30a   : > { %v6619_v42 = vunpack.i.h.bf16 %v6617_v40  ;;  %v6618_v43 = vunpack.i.l.bf16 %v6617_v40 }
 0x30c   : > { %v6254_v37 = vpack.c.bf16 %v6619_v42, %v6618_v43 }
 0x30d   : > { %v2242_v52 = vpop.permute.xlu0 %2241 }
 0x30e   : > { %5866 = vmatpush3.xpose.msk.msra.mxu1 %vm854_vm5, %v2242_v52  ;;  %6256 = vmatpush3.bf16.xpose.msk.msra.mxu0 %vm7474_vm6, %v6254_v37 }
 0x30f   : > { %6257 = vmatprep.subr.bf16.mxu1 %v8754_v1  ;;  %5874 = vmatprep.subr.mxu0 %v8756_v0 }
 0x311   : > { %v477_v51 = vpop.permute.xlu0 %476 }
 0x312   : > { %5868 = vmatmul.mubr.msk.f32.vlgmr.msra.gmra.mrb[16].mxu1 %vm854_vm5, %v477_v51 }
 0x313   : > { %6260 = vmatpush3.bf16.xpose.msk.msra.mxu1 %vm7474_vm6, %v6258_v56  ;;  %5885 = vmatprep.mubr.msk.f32.mxu1 %vm7024_vm4, %v8756_v0 }
 0x314   : > { %5883 = vmatprep.subr.mxu1 %v8756_v0 }
 0x315   : > { %v6627_v61 = vpop.permute.xlu0 %6626 }
 0x316   : > { %v6628_v62 = vunpack.i.l.bf16 %v6627_v61  ;;  %5875 = vmatpush3.xpose.msk.msra.mxu0 %vm854_vm5, %v2326_v55  ;;  %v6629_v53 = vunpack.i.h.bf16 %v6627_v61 }
 0x317   : > { %6261 = vmatprep.subr.bf16.mxu0 %v8754_v1  ;;  %v6632_v2 = vpop.permute.xlu1 %6631 }
 0x318   : > { %v6262_v12 = vpack.c.bf16 %v6628_v62, %v6618_v43  ;;  %v6633_v57 = vunpack.i.l.bf16 %v6632_v2  ;;  %v6634_v3 = vunpack.i.h.bf16 %v6632_v2 }
 0x319   : > { %v2410_v4 = vpop.permute.xlu0 %2409  ;;  %5877 = vmatmul.mubr.msk.f32.vlgmr.msra.gmra.mrb[24].mxu0 %vm854_vm5, %v479_v13 }
 0x31a   : > { %6264 = vmatpush3.bf16.xpose.msk.msra.mxu0 %vm7474_vm6, %v6262_v12  ;;  %5894 = vmatprep.mubr.msk.f32.mxu0 %vm7024_vm4, %v8756_v0  ;;  %v6266_v50 = vpack.c.bf16 %v6633_v57, %v6629_v53 }
 0x31b   : > { %5884 = vmatpush3.xpose.msk.msra.mxu1 %vm854_vm5, %v2410_v4  ;;  %v2492_v8 = vpop.permute.xlu1 %2491  ;;  %5892 = vmatprep.subr.mxu0 %v8756_v0 }
 0x31c   : > { %2901 = vmax.xlane.f32.xlu0 %v2900_v60  ;;  %2904 = vmax.xlane.f32.xlu1 %v2903_v7 }
 0x31d   : > { %6265 = vmatprep.subr.bf16.mxu1 %v8754_v1  ;;  %v481_v9 = vpop.permute.xlu0 %480 }
 0x31e   : > { %5886 = vmatmul.mubr.msk.f32.vlgmr.msra.gmra.mrb[18].mxu1 %vm854_vm5, %v481_v9 }
 0x31f   : > { %6268 = vmatpush3.bf16.xpose.msk.msra.mxu1 %vm7474_vm6, %v6266_v50  ;;  %5903 = vmatprep.mubr.msk.f32.mxu1 %vm7024_vm4, %v8756_v0  ;;  %v483_v49 = vpop.permute.xlu1 %482 }
 0x320   : > { %5901 = vmatprep.subr.mxu1 %v8756_v0 }
 0x321   : > { %v6637_v58 = vpop.permute.xlu0 %6636 }
 0x322   : > { %5893 = vmatpush3.xpose.msk.msra.mxu0 %vm854_vm5, %v2492_v8  ;;  %v6638_v14 = vunpack.i.l.bf16 %v6637_v58  ;;  %v6639_v41 = vunpack.i.h.bf16 %v6637_v58 }
 0x323   : > { %6269 = vmatprep.subr.bf16.mxu0 %v8754_v1 }
 0x324   : > { %v6270_v16 = vpack.c.bf16 %v6638_v14, %v6634_v3  ;;  %v6274_v15 = vpack.c.bf16 %v6639_v41, %v6629_v53 }
 0x325   : > { %v485_v59 = vpop.permute.xlu1 %484  ;;  %5895 = vmatmul.mubr.msk.f32.vlgmr.msra.gmra.mrb[26].mxu0 %vm854_vm5, %v483_v49  ;;  %v2574_v17 = vpop.permute.xlu0 %2573 }
 0x326   : > { %5912 = vmatprep.mubr.msk.f32.mxu0 %vm7024_vm4, %v8756_v0  ;;  %6272 = vmatpush3.bf16.xpose.msk.msra.mxu0 %vm7474_vm6, %v6270_v16 }
 0x327   : > { %5902 = vmatpush3.xpose.msk.msra.mxu1 %vm854_vm5, %v2574_v17  ;;  %5910 = vmatprep.subr.mxu0 %v8756_v0 }
 0x328   : > { %6273 = vmatprep.subr.bf16.mxu1 %v8754_v1 }
 0x329   : > { %v487_v63 = vpop.permute.xlu1 %486 }
 0x32a   : > { %v2658_v45 = vpop.permute.xlu0 %2657  ;;  %5904 = vmatmul.mubr.msk.f32.vlgmr.msra.gmra.mrb[20].mxu1 %vm854_vm5, %v485_v59 }
 0x32b   : > { %v1173_v10 = vpop.f32.mrb[2].mxu1  ;;  %6276 = vmatpush3.bf16.xpose.msk.msra.mxu1 %vm7474_vm6, %v6274_v15  ;;  %5921 = vmatprep.mubr.msk.f32.mxu1 %vm7024_vm4, %v8756_v0 }
 0x32c   : > { %v2820_v23 = vmul.f32 0.125, %v1173_v10  ;;  %v5743_v11 = vpop.f32.mrb[3].mxu1  ;;  %5919 = vmatprep.subr.mxu1 %v8756_v0 }
 0x32d   : > { %6701 = vrot.lane.b32.xlu1 %v6700_v32, %s7026_s15  ;;  %v489_v35 = vpop.permute.xlu1 %488 }
 0x32e   : > { %v7903_v34 = vsel %vm7749_vm9, -3.4028235e+38, %v2820_v23  ;;  %v2740_v30 = vpop.permute.xlu0 %2739  ;;  %5911 = vmatpush3.xpose.msk.msra.mxu0 %vm854_vm5, %v2658_v45 }
 0x32f   : > { %2879 = vst.msk [vmem:[%s7770_s30 + $0x18] sm:$0xff] %vm2875_vm10, %v7903_v34  ;;  %6277 = vmatprep.subr.bf16.mxu0 %v8754_v1 }
 0x331   : > { %5913 = vmatmul.mubr.msk.f32.vlgmr.msra.gmra.mrb[28].mxu0 %vm854_vm5, %v487_v63 }
 0x332   : > { %794 = vrot.lane.b32.xlu0 %v7384_v25, %s7026_s15  ;;  %v6642_v47 = vpop.permute.xlu1 %6641  ;;  %6279 = vmatpush3.bf16.msra.mxu0 %v7379_v24 }
 0x333   : > { %v749_v22 = vpop.permute.xlu0 %748  ;;  %v6644_v28 = vunpack.i.h.bf16 %v6642_v47  ;;  %v6643_v38 = vunpack.i.l.bf16 %v6642_v47  ;;  %5930 = vmatprep.mubr.msk.f32.mxu0 %vm7024_vm4, %v8756_v0  ;;  %5920 = vmatpush3.xpose.msk.msra.mxu1 %vm854_vm5, %v2740_v30 }
 0x334   : > { %v771_v27 = vrot.slane %v749_v22, 4  ;;  %5928 = vmatprep.subr.mxu0 %v8756_v0  ;;  %6283 = vmatprep.subr.bf16.mxu1 %v8754_v1 }
 0x335   : > { %v769_v29 = vrot.slane %v6644_v28, 4  ;;  %v768_v32 = vrot.slane %v6643_v38, 4 }
 0x336   : > { %5922 = vmatmul.mubr.msk.f32.vlgmr.msra.gmra.mrb[22].mxu1 %vm854_vm5, %v489_v35  ;;  %5929 = vmatpush3.msk.msra.mxu0 %vm403_vm2, %v7337_v6  ;;  %v7957_v61 = vpop.permute.xlu1 %752 }
 0x337   : > { %v1333_v39 = vpop.f32.mrb[4].mxu1  ;;  %v7928_v42 = vpop.permute.xlu0 %664  ;;  %v770_v37 = vsel %vm403_vm2, %v768_v32, %v769_v29  ;;  %v772_v46 = vsel %vm403_vm2, %v769_v29, %v771_v27  ;;  %6285 = vmatpush3.bf16.msra.mxu1 %v7379_v24  ;;  %6280 = vmatprep.subr.bf16.mxu0 %v8754_v1  ;;  %v8758_v53 = vrot.slane %v7957_v61, 4  ;;  %v2906_v32 = vsel %vm2875_vm10, %v7816_v36, -inf }
 0x338   : > { %v2822_v40 = vmul.f32 0.125, %v1333_v39  ;;  %v5761_v43 = vpop.f32.mrb[5].mxu1  ;;  %v6705_v48 = vpack.i.bf16 %v772_v46, %v770_v37  ;;  %5946 = vmatprep.subr.mxu1 %v8756_v0  ;;  %v773_v55 = vrot.slane %v7928_v42, 4  ;;  %5948 = vmatprep.mubr.msk.f32.mxu1 %vm7024_vm4, %v8756_v0  ;;  %v2909_v37 = vsel %vm2875_vm10, %v7903_v34, -inf }
 0x33a   : > { %v7937_v52 = vsel %vm2845_vm7, -3.4028235e+38, %v2822_v40  ;;  %6706 = vrot.lane.b32.xlu0 %v6705_v48, %s7026_s15  ;;  %v774_v51 = vsel %vm403_vm2, %v773_v55, %v769_v29  ;;  %v7984_v16 = vpop.permute.xlu1 %758 }
 0x33b   : > { %2881 = vst.msk [vmem:[%s7770_s30 + $0x28] sm:$0xff] %vm2875_vm10, %v7937_v52  ;;  %v751_v56 = vpop.permute.xlu0 %750  ;;  %5947 = vmatpush3.msk.msra.mxu1 %vm403_vm2, %v7291_v44 }
 0x33c   : > { %v775_v6 = vrot.slane %v751_v56, 4  ;;  %6289 = vmatprep.subr.bf16.mxu1 %v8754_v1  ;;  %v2915_v56 = vsel %vm2875_vm10, %v7937_v52, -inf }
 0x33e   : > { %v776_v24 = vsel %vm403_vm2, %v769_v29, %v775_v6  ;;  %800 = vrot.lane.b32.xlu0 %v766_v21, %s7026_s15  ;;  %v778_v21 = vsel %vm403_vm2, %v769_v29, %v8758_v53  ;;  %v8000_v23 = vpop.permute.xlu1 %6651 }
 0x33f   : > { %v6647_v13 = vpop.permute.xlu0 %6646  ;;  %v6710_v62 = vpack.i.bf16 %v776_v24, %v774_v51 }
 0x340   : > { %v6649_v12 = vunpack.i.h.bf16 %v6647_v13  ;;  %v6648_v2 = vunpack.i.l.bf16 %v6647_v13 }
 0x342   : > { %v7959_v4 = vrot.slane %v6649_v12, 4  ;;  %v779_v44 = vrot.slane %v6648_v2, 4  ;;  %6711 = vrot.lane.b32.xlu0 %v6710_v62, %s7026_s15  ;;  %v8008_v22 = vpop.permute.xlu1 %672 }
 0x343   : > { %v7998_v15 = vpop.permute.xlu0 %683 }
 0x344   : > { %v781_v20 = vsel %vm403_vm2, %v779_v44, %v7959_v4 }
 0x345   : > { %v6715_v57 = vpack.i.bf16 %v781_v20, %v778_v21 }
 0x346   : > { %806 = vrot.lane.b32.xlu0 %v771_v27, %s7026_s15  ;;  %v8026_v43 = vpop.permute.xlu1 %691 }
 0x347   : > { %v8002_v30 = vpop.permute.xlu0 %760 }
 0x34a   : > { %6716 = vrot.lane.b32.xlu0 %v6715_v57, %s7026_s15  ;;  %v8034_v24 = vpop.permute.xlu1 %6671 }
 0x34b   : > { %v8024_v40 = vpop.permute.xlu0 %762 }
 0x34e   : > { %812 = vrot.lane.b32.xlu0 %v775_v6, %s7026_s15  ;;  %v8049_v2 = vpop.permute.xlu1 %695 }
 0x34f   : > { %v1257_v60 = vpop.f32.mrb[10].mxu0  ;;  %v8032_v6 = vpop.permute.xlu0 %6656 }
 0x350   : > { %v2821_v7 = vmul.f32 0.125, %v1257_v60  ;;  %v5752_v50 = vpop.f32.mrb[11].mxu0 }
 0x352   : > { %v7973_v8 = vsel %vm2845_vm7, -3.4028235e+38, %v2821_v7  ;;  %v8055_v7 = vpop.permute.xlu1 %709 }
 0x353   : > { %2880 = vst.msk [vmem:[%s7770_s30 + $0x20] sm:$0xff] %vm2875_vm10, %v7973_v8  ;;  %v2912_v9 = vsel %vm2875_vm10, %v7973_v8, -inf  ;;  %v8047_v12 = vpop.permute.xlu0 %6661 }
 0x354   : > { %2913 = vmax.xlane.f32.xlu1 %v2912_v9 }
 0x357   : > { %v8053_v60 = vpop.permute.xlu0 %677 }
 0x35b   : > { %v1417_v49 = vpop.f32.mrb[12].mxu0 }
 0x35c   : > { %v2823_v58 = vmul.f32 0.125, %v1417_v49  ;;  %v5770_v3 = vpop.f32.mrb[13].mxu0  ;;  %v8066_v49 = vpop.permute.xlu0 %6666 }
 0x35d   : > { %v8068_v3 = vpop.permute.xlu1 %6681 }
 0x35e   : > { %v7982_v14 = vsel %vm7749_vm9, -3.4028235e+38, %v2823_v58 }
 0x35f   : > { %2882 = vst.msk [vmem:[%s7770_s30 + $0x30] sm:$0xff] %vm2875_vm10, %v7982_v14  ;;  %v1501_v59 = vpop.f32.mrb[6].mxu1  ;;  %v2918_v41 = vsel %vm2875_vm10, %v7982_v14, -inf }
 0x360   : > { %v2824_v17 = vmul.f32 0.125, %v1501_v59  ;;  %v5779_v10 = vpop.f32.mrb[7].mxu1  ;;  %2919 = vmax.xlane.f32.xlu1 %v2918_v41 }
 0x361   : > { %v8077_v10 = vpop.permute.xlu0 %6676 }
 0x362   : > { %v7993_v63 = vsel %vm2845_vm7, -3.4028235e+38, %v2824_v17 }
 0x363   : > { %2883 = vst.msk [vmem:[%s7770_s30 + $0x38] sm:$0xff] %vm2875_vm10, %v7993_v63  ;;  %v2921_v62 = vsel %vm2875_vm10, %v7993_v63, -inf }
 0x367   : > { %v1577_v45 = vpop.f32.mrb[14].mxu0 }
 0x368   : > { %v2825_v11 = vmul.f32 0.125, %v1577_v45  ;;  %v5788_v35 = vpop.f32.mrb[15].mxu0  ;;  %v8079_v45 = vpop.permute.xlu1 %713 }
 0x36a   : > { %v8006_v47 = vsel %vm2845_vm7, -3.4028235e+38, %v2825_v11 }
 0x36b   : > { %2884 = vst.msk [vmem:[%s7770_s30 + $0x40] sm:$0xff] %vm2875_vm10, %v8006_v47  ;;  %v1661_v28 = vpop.f32.mrb[8].mxu1  ;;  %v2924_v38 = vsel %vm2875_vm10, %v8006_v47, -inf }
 0x36c   : > { %v2826_v27 = vmul.f32 0.125, %v1661_v28  ;;  %v5797_v29 = vpop.f32.mrb[9].mxu1  ;;  %2925 = vmax.xlane.f32.xlu1 %v2924_v38 }
 0x36d   : > { %2907 = vmax.xlane.f32.xlu0 %v2906_v32  ;;  %v8090_v32 = vpop.permute.xlu1 %727 }
 0x36e   : > { %v8019_v39 = vsel %vm7749_vm9, -3.4028235e+38, %v2826_v27  ;;  %v8085_v27 = vpop.permute.xlu0 %701 }
 0x36f   : > { %2885 = vst.msk [vmem:[%s7770_s30 + $0x48] sm:$0xff] %vm2875_vm10, %v8019_v39  ;;  %v2927_v44 = vsel %vm2875_vm10, %v8019_v39, -inf }
 0x371   : > { %2910 = vmax.xlane.f32.xlu0 %v2909_v37 }
 0x374   : > { %v1745_v46 = vpop.f32.mrb[16].mxu0 }
 0x375   : > { %v2827_v48 = vmul.f32 0.125, %v1745_v46  ;;  %v5806_v55 = vpop.f32.mrb[17].mxu0  ;;  %2916 = vmax.xlane.f32.xlu0 %v2915_v56  ;;  %v8101_v56 = vpop.permute.xlu1 %6691 }
 0x376   : > { %v8099_v55 = vpop.permute.xlu0 %6686  ;;  %8782 = vst [vmem:[#allocation15_spill] sm:$0xff] %v8101_v56 }
 0x377   : > { %v8038_v51 = vsel %vm2845_vm7, -3.4028235e+38, %v2827_v48 }
 0x378   : > { %2886 = vst.msk [vmem:[%s7770_s30 + $0x50] sm:$0xff] %vm2875_vm10, %v8038_v51  ;;  %v2930_v13 = vsel %vm2875_vm10, %v8038_v51, -inf }
 0x379   : > { %2931 = vmax.xlane.f32.xlu1 %v2930_v13  ;;  %2922 = vmax.xlane.f32.xlu0 %v2921_v62 }
 0x37d   : > { %2928 = vmax.xlane.f32.xlu0 %v2927_v44 }
 0x37f   : > { %v1821_v20 = vpop.f32.mrb[10].mxu1 }
 0x380   : > { %v2828_v21 = vmul.f32 0.125, %v1821_v20  ;;  %v5815_v57 = vpop.f32.mrb[11].mxu1  ;;  %v8103_v20 = vpop.permute.xlu0 %719 }
 0x381   : > { %v8109_v57 = vpop.permute.xlu1 %731 }
 0x382   : > { %v8059_v50 = vsel %vm2845_vm7, -3.4028235e+38, %v2828_v21  ;;  %8783 = vst [vmem:[#allocation16_spill] sm:$0xff] %v8109_v57 }
 0x383   : > { %2887 = vst.msk [vmem:[%s7770_s30 + $0x58] sm:$0xff] %vm2875_vm10, %v8059_v50  ;;  %v2933_v9 = vsel %vm2875_vm10, %v8059_v50, -inf }
 0x384   : > { %2934 = vmax.xlane.f32.xlu0 %v2933_v9 }
 0x388   : > { %v1905_v58 = vpop.f32.mrb[18].mxu0 }
 0x389   : > { %v2829_v59 = vmul.f32 0.125, %v1905_v58  ;;  %v5824_v41 = vpop.f32.mrb[19].mxu0 }
 0x38a   : > { %v8114_v41 = vpop.permute.xlu0 %6696 }
 0x38b   : > { %v8072_v17 = vsel %vm7749_vm9, -3.4028235e+38, %v2829_v59  ;;  %8784 = vst [vmem:[#allocation17_spill] sm:$0xff] %v8114_v41 }
 0x38c   : > { %2888 = vst.msk [vmem:[%s7770_s30 + $0x60] sm:$0xff] %vm2875_vm10, %v8072_v17 }
 0x390   : > { %v1989_v11 = vpop.f32.mrb[12].mxu1 }
 0x391   : > { %v2830_v35 = vmul.f32 0.125, %v1989_v11  ;;  %v5833_v28 = vpop.f32.mrb[13].mxu1 }
 0x393   : > { %v8083_v38 = vsel %vm2845_vm7, -3.4028235e+38, %v2830_v35  ;;  %v8120_v35 = vpop.permute.xlu1 %737 }
 0x394   : > { %2889 = vst.msk [vmem:[%s7770_s30 + $0x68] sm:$0xff] %vm2875_vm10, %v8083_v38  ;;  %v2065_v29 = vpop.f32.mrb[20].mxu0  ;;  %8785 = vst [vmem:[#allocation18_spill] sm:$0xff] %v8120_v35 }
 0x395   : > { %v2831_v37 = vmul.f32 0.125, %v2065_v29  ;;  %v5842_v46 = vpop.f32.mrb[21].mxu0 }
 0x397   : > { %v8094_v48 = vsel %vm2845_vm7, -3.4028235e+38, %v2831_v37 }
 0x398   : > { %2890 = vst.msk [vmem:[%s7770_s30 + $0x70] sm:$0xff] %vm2875_vm10, %v8094_v48 }
 0x39c   : > { %v2149_v13 = vpop.f32.mrb[14].mxu1 }
 0x39d   : > { %v2832_v62 = vmul.f32 0.125, %v2149_v13  ;;  %v5851_v44 = vpop.f32.mrb[15].mxu1 }
 0x39f   : > { %v8107_v21 = vsel %vm7749_vm9, -3.4028235e+38, %v2832_v62 }
 0x3a0   : > { %2891 = vst.msk [vmem:[%s7770_s30 + $0x78] sm:$0xff] %vm2875_vm10, %v8107_v21 }
 0x3a3   : > { %v2233_v9 = vpop.f32.mrb[22].mxu0 }
 0x3a4   : > { %v2833_v58 = vmul.f32 0.125, %v2233_v9  ;;  %v5860_v59 = vpop.f32.mrb[23].mxu0 }
 0x3a6   : > { %v8118_v11 = vsel %vm2845_vm7, -3.4028235e+38, %v2833_v58 }
 0x3a7   : > { %2892 = vst.msk [vmem:[%s7770_s30 + $0x80] sm:$0xff] %vm2875_vm10, %v8118_v11 }
 0x3a9   : > { %v2902_v28 = vpop.xlane.xlu0 %2901  ;;  %v2905_v37 = vpop.xlane.xlu1 %2904 }
 0x3aa   : > { %v2972_v29 = vsub.f32 %v7768_v19, %v2902_v28  ;;  %v2973_v46 = vsub.f32 %v7854_v18, %v2905_v37  ;;  %v2939_v37 = vsel %vm2875_vm10, %v8083_v38, -inf }
 0x3ac   : > { %v2996_v13 = vmul.f32 1.442695, %v2972_v29  ;;  %v2998_v62 = vmul.f32 1.442695, %v2973_v46  ;;  %v2936_v29 = vsel %vm2875_vm10, %v8072_v17, -inf }
 0x3ad   : > { %v8127_v44 = vpop.permute.xlu0 %794 }
 0x3ae   : > { %8786 = vst [vmem:[#allocation19_spill] sm:$0xff] %v8127_v44  ;;  %6725 = vpow2.f32 %v2996_v13 }
 0x3af   : > { %6727 = vpow2.f32 %v2998_v62 }
 0x3b1   : > { %v8129_v9 = vpop.permute.xlu0 %6706 }
 0x3b2   : > { %8787 = vst [vmem:[#allocation20_spill] sm:$0xff] %v8129_v9  ;;  %v8760_v13 = vunpack.i.l.bf16 %v8129_v9 }
 0x3b5   : > { %v8131_v58 = vpop.permute.xlu0 %800 }
 0x3b6   : > { %8788 = vst [vmem:[#allocation21_spill] sm:$0xff] %v8131_v58 }
 0x3b8   : > { %v8133_v59 = vpop.eup %6725 }
 0x3b9   : > { %v8135_v1 = vpop.eup %6727  ;;  %v8137_v0 = vpop.permute.xlu0 %6711  ;;  %v3044_v19 = vsel %vm2875_vm10, %v8133_v59, 0.0 }
 0x3ba   : > { %8789 = vst [vmem:[#allocation22_spill] sm:$0xff] %v8137_v0  ;;  %3045 = vadd.xlane.f32.xlu1 %v3044_v19  ;;  %v3047_v18 = vsel %vm2875_vm10, %v8135_v1, 0.0  ;;  %v2945_v19 = vsel %vm2875_vm10, %v8107_v21, -inf }
 0x3bb   : > { %3048 = vadd.xlane.f32.xlu0 %v3047_v18 }
 0x3bd   : > { %v8143_v28 = vpop.permute.xlu0 %806 }
 0x3be   : > { %8790 = vst [vmem:[#allocation23_spill] sm:$0xff] %v8143_v28  ;;  %2937 = vmax.xlane.f32.xlu1 %v2936_v29 }
 0x3bf   : > { %2940 = vmax.xlane.f32.xlu0 %v2939_v37 }
 0x3c1   : > { %v8149_v46 = vpop.permute.xlu0 %6716 }
 0x3c2   : > { %8791 = vst [vmem:[#allocation24_spill] sm:$0xff] %v8149_v46  ;;  %v6718_v62 = vunpack.i.l.bf16 %v8149_v46 }
 0x3c3   : > { %2946 = vmax.xlane.f32.xlu0 %v2945_v19 }
 0x3c4   : > { %v8157_v18 = vpack.c.bf16 %v6718_v62, %v8760_v13 }
 0x3c5   : > { %v8175_v13 = vpop.permute.xlu0 %812 }
 0x3c6   : > { %8792 = vst [vmem:[#allocation25_spill] sm:$0xff] %v8157_v18  ;;  %8793 = vst [vmem:[#allocation26_spill] sm:$0xff] %v8175_v13 }
 0x3e5   : > { %v2317_v29 = vpop.f32.mrb[16].mxu1 }
 0x3e6   : > { %v2834_v33 = vmul.f32 0.125, %v2317_v29  ;;  %v5869_v53 = vpop.f32.mrb[17].mxu1 }
 0x3e8   : > { %v8161_v37 = vsel %vm2845_vm7, -3.4028235e+38, %v2834_v33 }
 0x3e9   : > { %2893 = vst.msk [vmem:[%s7770_s30 + $0x88] sm:$0xff] %vm2875_vm10, %v8161_v37  ;;  %v2951_v28 = vsel %vm2875_vm10, %v8161_v37, -inf }
 0x3ea   : > { %2952 = vmax.xlane.f32.xlu0 %v2951_v28  ;;  %v8186_v28 = vpop.permute.xlu1 %6701 }
 0x3eb   : > { %8794 = vst [vmem:[#allocation27_spill] sm:$0xff] %v8186_v28 }
 0x3ec   : > { %v2401_v19 = vpop.f32.mrb[24].mxu0 }
 0x3ed   : > { %v2835_v44 = vmul.f32 0.125, %v2401_v19  ;;  %v5878_v46 = vpop.f32.mrb[25].mxu0 }
 0x3ee   : > { %v2914_v13 = vpop.xlane.xlu1 %2913 }
 0x3ef   : > { %v8170_v62 = vsel %vm7749_vm9, -3.4028235e+38, %v2835_v44 }
 0x3f0   : > { %2894 = vst.msk [vmem:[%s7770_s30 + $0x90] sm:$0xff] %vm2875_vm10, %v8170_v62 }
 0x3f1   : > { %v2485_v33 = vpop.f32.mrb[18].mxu1 }
 0x3f2   : > { %v2836_v53 = vmul.f32 0.125, %v2485_v33  ;;  %v5887_v29 = vpop.f32.mrb[19].mxu1  ;;  %v2920_v28 = vpop.xlane.xlu1 %2919 }
 0x3f4   : > { %v8179_v18 = vsel %vm2845_vm7, -3.4028235e+38, %v2836_v53 }
 0x3f5   : > { %2895 = vst.msk [vmem:[%s7770_s30 + $0x98] sm:$0xff] %vm2875_vm10, %v8179_v18  ;;  %v2957_v44 = vsel %vm2875_vm10, %v8179_v18, -inf }
 0x3f6   : > { %2958 = vmax.xlane.f32.xlu0 %v2957_v44 }
 0x3f8   : > { %v2565_v46 = vpop.f32.mrb[26].mxu0 }
 0x3f9   : > { %v2837_v19 = vmul.f32 0.125, %v2565_v46  ;;  %v5896_v9 = vpop.f32.mrb[27].mxu0 }
 0x3fa   : > { %v2908_v33 = vpop.xlane.xlu0 %2907 }
 0x3fb   : > { %v2974_v29 = vsub.f32 %v7816_v36, %v2908_v33  ;;  %v8191_v53 = vsel %vm2845_vm7, -3.4028235e+38, %v2837_v19 }
 0x3fc   : > { %2896 = vst.msk [vmem:[%s7770_s30 + $0xa0] sm:$0xff] %vm2875_vm10, %v8191_v53 }
 0x3fd   : > { %v3000_v41 = vmul.f32 1.442695, %v2974_v29  ;;  %v2649_v44 = vpop.f32.mrb[20].mxu1 }
 0x3fe   : > { %v2911_v58 = vpop.xlane.xlu0 %2910  ;;  %v2838_v46 = vmul.f32 0.125, %v2649_v44  ;;  %v5905_v9 = vpop.f32.mrb[21].mxu1 }
 0x3ff   : > { %6729 = vpow2.f32 %v3000_v41  ;;  %v2975_v0 = vsub.f32 %v7903_v34, %v2911_v58  ;;  %v2978_v34 = vsub.f32 %v7982_v14, %v2920_v28  ;;  %v2926_v58 = vpop.xlane.xlu1 %2925 }
 0x400   : > { %v8199_v36 = vsel %vm7749_vm9, -3.4028235e+38, %v2838_v46 }
 0x401   : > { %v3002_v33 = vmul.f32 1.442695, %v2975_v0  ;;  %2897 = vst.msk [vmem:[%s7770_s30 + $0xa8] sm:$0xff] %vm2875_vm10, %v8199_v36  ;;  %v2963_v29 = vsel %vm2875_vm10, %v8199_v36, -inf  ;;  %v3008_v56 = vmul.f32 1.442695, %v2978_v34 }
 0x402   : > { %v2917_v19 = vpop.xlane.xlu0 %2916  ;;  %2964 = vmax.xlane.f32.xlu0 %v2963_v29  ;;  %v2976_v29 = vsub.f32 %v7973_v8, %v2914_v13 }
 0x403   : > { %v2977_v41 = vsub.f32 %v7937_v52, %v2917_v19  ;;  %6731 = vpow2.f32 %v3002_v33  ;;  %v2980_v52 = vsub.f32 %v8006_v47, %v2926_v58  ;;  %v2942_v47 = vsel %vm2875_vm10, %v8094_v48, -inf }
 0x404   : > { %v2733_v54 = vpop.f32.mrb[28].mxu0  ;;  %v3004_v8 = vmul.f32 1.442695, %v2976_v29 }
 0x405   : > { %v3006_v44 = vmul.f32 1.442695, %v2977_v41  ;;  %v2839_v46 = vmul.f32 0.125, %v2733_v54  ;;  %v5914_v9 = vpop.f32.mrb[29].mxu0  ;;  %v3012_v54 = vmul.f32 1.442695, %v2980_v52 }
 0x406   : > { %v2923_v0 = vpop.xlane.xlu0 %2922 }
 0x407   : > { %v8212_v57 = vsel %vm2845_vm7, -3.4028235e+38, %v2839_v46  ;;  %6733 = vpow2.f32 %v3006_v44  ;;  %v2948_v46 = vsel %vm2875_vm10, %v8118_v11, -inf }
 0x408   : > { %2898 = vst.msk [vmem:[%s7770_s30 + $0xb0] sm:$0xff] %vm2875_vm10, %v8212_v57  ;;  %6735 = vpow2.f32 %v3008_v56  ;;  %v2979_v56 = vsub.f32 %v7993_v63, %v2923_v0  ;;  %v2932_v63 = vpop.xlane.xlu1 %2931 }
 0x409   : > { %v8208_v35 = vpop.eup %6729  ;;  %v2813_v28 = vpop.f32.mrb[22].mxu1  ;;  %6737 = vpow2.f32 %v3012_v54  ;;  %v2982_v29 = vsub.f32 %v8038_v51, %v2932_v63 }
 0x40a   : > { %v3050_v14 = vsel %vm2875_vm10, %v8208_v35, 0.0  ;;  %v2840_v33 = vmul.f32 0.125, %v2813_v28  ;;  %v5923_v19 = vpop.f32.mrb[23].mxu1  ;;  %v2929_v41 = vpop.xlane.xlu0 %2928  ;;  %6739 = vpow2.f32 %v3004_v8  ;;  %v3010_v28 = vmul.f32 1.442695, %v2979_v56 }
 0x40b   : > { %3051 = vadd.xlane.f32.xlu1 %v3050_v14  ;;  %v2966_v8 = vsel %vm2875_vm10, %v8212_v57, -inf }
 0x40c   : > { %v8223_v34 = vsel %vm2845_vm7, -3.4028235e+38, %v2840_v33  ;;  %v2981_v33 = vsub.f32 %v8019_v39, %v2929_v41 }
 0x40d   : > { %2899 = vst.msk [vmem:[%s7770_s30 + $0xb8] sm:$0xff] %vm2875_vm10, %v8223_v34  ;;  %v2969_v58 = vsel %vm2875_vm10, %v8223_v34, -inf  ;;  %v8232_v44 = vpop.eup %6731 }
 0x40e   : > { %2970 = vmax.xlane.f32.xlu0 %v2969_v58  ;;  %v3053_v9 = vsel %vm2875_vm10, %v8232_v44, 0.0  ;;  %v3014_v54 = vmul.f32 1.442695, %v2981_v33  ;;  %v3016_v58 = vmul.f32 1.442695, %v2982_v29  ;;  %v784_v29 = vrot.slane %v7998_v15, 4 }
 0x40f   : > { %2943 = vmax.xlane.f32.xlu1 %v2942_v47  ;;  %v2960_v47 = vsel %vm2875_vm10, %v8191_v53, -inf }
 0x411   : > { %v2935_v13 = vpop.xlane.xlu0 %2934  ;;  %v8240_v52 = vpop.eup %6733 }
 0x412   : > { %v2983_v5 = vsub.f32 %v8059_v50, %v2935_v13  ;;  %3054 = vadd.xlane.f32.xlu0 %v3053_v9  ;;  %v2954_v50 = vsel %vm2875_vm10, %v8170_v62, -inf  ;;  %v3059_v0 = vsel %vm2875_vm10, %v8240_v52, 0.0  ;;  %v8247_v19 = vpop.eup %6735 }
 0x413   : > { %2949 = vmax.xlane.f32.xlu1 %v2948_v46  ;;  %v3062_v39 = vsel %vm2875_vm10, %v8247_v19, 0.0  ;;  %v8254_v41 = vpop.eup %6737 }
 0x414   : > { %v3018_v14 = vmul.f32 1.442695, %v2983_v5  ;;  %v8258_v56 = vpop.eup %6739  ;;  %v3068_v51 = vsel %vm2875_vm10, %v8254_v41, 0.0 }
 0x415   : > { %v3056_v46 = vsel %vm2875_vm10, %v8258_v56, 0.0 }
 0x416   : > { %6741 = vpow2.f32 %v3018_v14  ;;  %3060 = vadd.xlane.f32.xlu0 %v3059_v0  ;;  %v786_v0 = vrot.slane %v8002_v30, 4 }
 0x417   : > { %2955 = vmax.xlane.f32.xlu1 %v2954_v50  ;;  %6743 = vpow2.f32 %v3010_v28 }
 0x418   : > { %6745 = vpow2.f32 %v3014_v54  ;;  %v787_v54 = vsel %vm403_vm2, %v7959_v4, %v786_v0 }
 0x419   : > { %6747 = vpow2.f32 %v3016_v58 }
 0x41a   : > { %3063 = vadd.xlane.f32.xlu0 %v3062_v39  ;;  %v785_v39 = vsel %vm403_vm2, %v784_v29, %v7959_v4 }
 0x41b   : > { %2961 = vmax.xlane.f32.xlu1 %v2960_v47  ;;  %v8795_v47 = vrot.slane %v7957_v61, 4  ;;  %v6720_v58 = vpack.i.bf16 %v787_v54, %v785_v39  ;;  %v6654_v39 = vunpack.i.h.bf16 %v8000_v23 }
 0x41e   : > { %3069 = vadd.xlane.f32.xlu0 %v3068_v51 }
 0x41f   : > { %2967 = vmax.xlane.f32.xlu1 %v2966_v8  ;;  %v782_v8 = vrot.slane %v7984_v16, 4 }
 0x420   : > { %v8262_v13 = vpop.eup %6741 }
 0x421   : > { %v3077_v5 = vsel %vm2875_vm10, %v8262_v13, 0.0  ;;  %v8268_v9 = vpop.eup %6743 }
 0x422   : > { %3078 = vadd.xlane.f32.xlu0 %v3077_v5  ;;  %v3065_v14 = vsel %vm2875_vm10, %v8268_v9, 0.0  ;;  %v8272_v28 = vpop.eup %6745 }
 0x423   : > { %3057 = vadd.xlane.f32.xlu1 %v3056_v46  ;;  %v3071_v33 = vsel %vm2875_vm10, %v8272_v28, 0.0  ;;  %v8276_v63 = vpop.eup %6747 }
 0x424   : > { %v3074_v50 = vsel %vm2875_vm10, %v8276_v63, 0.0 }
 0x427   : > { %3066 = vadd.xlane.f32.xlu1 %v3065_v14 }
 0x42b   : > { %3072 = vadd.xlane.f32.xlu1 %v3071_v33 }
 0x42f   : > { %3075 = vadd.xlane.f32.xlu1 %v3074_v50 }
 0x438   : > { %816 = vrot.lane.b32.xlu0 %v8795_v47, %s7026_s15 }
 0x43c   : > { %6721 = vrot.lane.b32.xlu0 %v6720_v58, %s7026_s15  ;;  %v6653_v58 = vunpack.i.l.bf16 %v8000_v23  ;;  %v8798_v23 = vmov 0.0|0.0  }
 0x440   : > { %822 = vrot.lane.b32.xlu0 %v782_v8, %s7026_s15 }
 0x447   : > { %v3046_v51 = vpop.xlane.xlu1 %3045 }
 0x448   : > { %6749 = vrcp.f32 %v3046_v51  ;;  %v3049_v5 = vpop.xlane.xlu0 %3048  ;;  %v8797_v51 = vmov 0.0  }
 0x449   : > { %6751 = vrcp.f32 %v3049_v5 }
 0x44b   : > { %v2938_v46 = vpop.xlane.xlu1 %2937 }
 0x44c   : > { %v2984_v14 = vsub.f32 %v8072_v17, %v2938_v46  ;;  %v2941_v33 = vpop.xlane.xlu0 %2940  ;;  %v8796_v17 = vpack.c.bf16 %v7407_v31, %v7393_v26 }
 0x44d   : > { %v2985_v61 = vsub.f32 %v8083_v38, %v2941_v33 }
 0x44e   : > { %v3020_v50 = vmul.f32 1.442695, %v2984_v14 }
 0x44f   : > { %v3022_v47 = vmul.f32 1.442695, %v2985_v61 }
 0x450   : > { %6753 = vpow2.f32 %v3020_v50  ;;  %v2947_v46 = vpop.xlane.xlu0 %2946 }
 0x451   : > { %6755 = vpow2.f32 %v3022_v47  ;;  %v2987_v14 = vsub.f32 %v8107_v21, %v2947_v46  ;;  %v6658_v46 = vunpack.i.l.bf16 %v8032_v6 }
 0x452   : > { %v6750_v29 = vpop.eup %6749 }
 0x453   : > { %v3117_v54 = vmul.f32 %v6750_v29, %v8133_v59  ;;  %v6752_v16 = vpop.eup %6751  ;;  %v8309_v59 = vpack.c.bf16 %v6654_v39, %v6653_v58  ;;  %v3026_v61 = vmul.f32 1.442695, %v2987_v14 }
 0x454   : > { %v3119_v38 = vmul.f32 %v6752_v16, %v8135_v1 }
 0x455   : > { %5931 = vmatmul.mubr.msk.f32.vlgmr.msra.gmra.mrb[30].mxu0 %vm2875_vm10, %v3117_v54  ;;  %6757 = vpow2.f32 %v3026_v61 }
 0x456   : > { %6282 = vmatpush3.bf16.msra.mxu0 %v8796_v17  ;;  %5939 = vmatprep.mubr.msk.f32.mxu0 %vm7024_vm4, %v8797_v51 }
 0x457   : > { %5937 = vmatprep.subr.mxu0 %v8797_v51 }
 0x45a   : > { %v8307_v5 = vpop.eup %6753  ;;  %5938 = vmatpush3.msk.msra.mxu0 %vm403_vm2, %v7384_v25  ;;  %v783_v25 = vsel %vm403_vm2, %v7959_v4, %v782_v8 }
 0x45b   : > { %5940 = vmatmul.mubr.msk.f32.vlgmr.msra.gmra.mrb[32].mxu0 %vm2875_vm10, %v3119_v38  ;;  %6286 = vmatprep.subr.bf16.mxu0 %v8798_v23  ;;  %v3080_v26 = vsel %vm2875_vm10, %v8307_v5, 0.0  ;;  %v8317_v31 = vpop.eup %6755 }
 0x45c   : > { %6288 = vmatpush3.bf16.msra.mxu0 %v8309_v59  ;;  %3081 = vadd.xlane.f32.xlu1 %v3080_v26  ;;  %v3083_v1 = vsel %vm2875_vm10, %v8317_v31, 0.0 }
 0x45d   : > { %5955 = vmatprep.subr.mxu0 %v8797_v51  ;;  %5957 = vmatprep.mubr.msk.f32.mxu0 %vm7024_vm4, %v8797_v51 }
 0x45f   : > { %v8333_v29 = vpop.eup %6757 }
 0x460   : > { %5956 = vmatpush3.msk.msra.mxu0 %vm403_vm2, %v7928_v42  ;;  %3084 = vadd.xlane.f32.xlu1 %v3083_v1  ;;  %v3089_v42 = vsel %vm2875_vm10, %v8333_v29, 0.0 }
 0x461   : > { %6292 = vmatprep.subr.bf16.mxu0 %v8798_v23 }
 0x471   : > { %820 = vrot.lane.b32.xlu1 %v783_v25, %s7026_s15  ;;  %v6659_v25 = vunpack.i.h.bf16 %v8032_v6 }
 0x477   : > { %v2953_v33 = vpop.xlane.xlu0 %2952 }
 0x478   : > { %v2989_v50 = vsub.f32 %v8161_v37, %v2953_v33 }
 0x47a   : > { %v3030_v47 = vmul.f32 1.442695, %v2989_v50 }
 0x47c   : > { %6759 = vpow2.f32 %v3030_v47 }
 0x483   : > { %v2959_v8 = vpop.xlane.xlu0 %2958 }
 0x484   : > { %v2991_v38 = vsub.f32 %v8179_v18, %v2959_v8 }
 0x486   : > { %v8337_v54 = vpop.eup %6759  ;;  %v3034_v50 = vmul.f32 1.442695, %v2991_v38 }
 0x487   : > { %v3095_v21 = vsel %vm2875_vm10, %v8337_v54, 0.0 }
 0x48f   : > { %v8341_v39 = vpop.xlane.xlu0 %2964 }
 0x495   : > { %3090 = vadd.xlane.f32.xlu1 %v3089_v42 }
 0x498   : > { %v3052_v16 = vpop.xlane.xlu1 %3051 }
 0x499   : > { %6761 = vrcp.f32 %v3052_v16  ;;  %3096 = vadd.xlane.f32.xlu1 %v3095_v21 }
 0x49b   : > { %v2971_v58 = vpop.xlane.xlu0 %2970 }
 0x49c   : > { %v2944_v37 = vpop.xlane.xlu1 %2943  ;;  %v2995_v6 = vsub.f32 %v8223_v34, %v2971_v58 }
 0x49d   : > { %v2986_v17 = vsub.f32 %v8094_v48, %v2944_v37  ;;  %v6290_v48 = vpack.c.bf16 %v6659_v25, %v6658_v46 }
 0x49f   : > { %v3024_v26 = vmul.f32 1.442695, %v2986_v17  ;;  %v3055_v14 = vpop.xlane.xlu0 %3054  ;;  %v3042_v17 = vmul.f32 1.442695, %v2995_v6  ;;  %v6663_v6 = vunpack.i.l.bf16 %v8047_v12 }
 0x4a0   : > { %v2950_v1 = vpop.xlane.xlu1 %2949 }
 0x4a1   : > { %6763 = vpow2.f32 %v3024_v26  ;;  %v2988_v33 = vsub.f32 %v8118_v11, %v2950_v1 }
 0x4a2   : > { %6765 = vrcp.f32 %v3055_v14  ;;  %v6669_v14 = vunpack.i.h.bf16 %v8066_v49 }
 0x4a3   : > { %v6762_v61 = vpop.eup %6761  ;;  %v3028_v47 = vmul.f32 1.442695, %v2988_v33  ;;  %v3061_v18 = vpop.xlane.xlu0 %3060  ;;  %v6668_v33 = vunpack.i.l.bf16 %v8066_v49 }
 0x4a4   : > { %v3121_v42 = vmul.f32 %v6762_v61, %v8208_v35  ;;  %v2956_v16 = vpop.xlane.xlu1 %2955 }
 0x4a5   : > { %6767 = vpow2.f32 %v3028_v47  ;;  %v2990_v8 = vsub.f32 %v8170_v62, %v2956_v16  ;;  %v6299_v16 = vpack.c.bf16 %v6669_v14, %v6668_v33  ;;  %v6679_v14 = vunpack.i.h.bf16 %v8077_v10 }
 0x4a6   : > { %6769 = vrcp.f32 %v3061_v18  ;;  %5949 = vmatmul.mubr.msk.f32.vlgmr.msra.gmra.mrb[24].mxu1 %vm2875_vm10, %v3121_v42  ;;  %v6678_v33 = vunpack.i.l.bf16 %v8077_v10 }
 0x4a7   : > { %6771 = vpow2.f32 %v3034_v50  ;;  %v3032_v21 = vmul.f32 1.442695, %v2990_v8  ;;  %6291 = vmatpush3.bf16.msra.mxu1 %v6290_v48  ;;  %5966 = vmatprep.mubr.msk.f32.mxu1 %vm7024_vm4, %v8797_v51  ;;  %v3064_v61 = vpop.xlane.xlu0 %3063  ;;  %v6664_v8 = vunpack.i.h.bf16 %v8047_v12 }
 0x4a8   : > { %v2962_v11 = vpop.xlane.xlu1 %2961  ;;  %5964 = vmatprep.subr.mxu1 %v8797_v51 }
 0x4a9   : > { %v2992_v35 = vsub.f32 %v8191_v53, %v2962_v11  ;;  %6773 = vpow2.f32 %v3032_v21  ;;  %v6296_v12 = vpack.c.bf16 %v6664_v8, %v6663_v6  ;;  %v8800_v6 = vld [vmem:[#allocation16_spill] sm:$0xff] }
 0x4ab   : > { %v8356_v37 = vpop.eup %6763  ;;  %v3036_v62 = vmul.f32 1.442695, %v2992_v35  ;;  %5965 = vmatpush3.msk.msra.mxu1 %vm403_vm2, %v8008_v22  ;;  %v6674_v35 = vunpack.i.h.bf16 %v8034_v24 }
 0x4ac   : > { %v8360_v38 = vpop.xlane.xlu1 %2967  ;;  %v3086_v34 = vsel %vm2875_vm10, %v8356_v37, 0.0  ;;  %6295 = vmatprep.subr.bf16.mxu1 %v8798_v23  ;;  %v6766_v58 = vpop.eup %6765 }
 0x4ad   : > { %6775 = vpow2.f32 %v3036_v62  ;;  %3087 = vadd.xlane.f32.xlu0 %v3086_v34  ;;  %v3123_v53 = vmul.f32 %v6766_v58, %v8232_v44 }
 0x4ae   : > { %6777 = vpow2.f32 %v3042_v17  ;;  %v6673_v17 = vunpack.i.l.bf16 %v8034_v24 }
 0x4af   : > { %v8366_v26 = vpop.eup %6767  ;;  %5958 = vmatmul.mubr.msk.f32.vlgmr.msra.gmra.mrb[34].mxu0 %vm2875_vm10, %v3123_v53 }
 0x4b0   : > { %v6770_v1 = vpop.eup %6769  ;;  %v3058_v25 = vpop.xlane.xlu1 %3057  ;;  %v3092_v22 = vsel %vm2875_vm10, %v8366_v26, 0.0  ;;  %6294 = vmatpush3.bf16.msra.mxu0 %v8309_v59  ;;  %5975 = vmatprep.mubr.msk.f32.mxu0 %vm7024_vm4, %v8797_v51 }
 0x4b1   : > { %v8371_v46 = vpop.eup %6771  ;;  %3093 = vadd.xlane.f32.xlu0 %v3092_v22  ;;  %v3127_v44 = vmul.f32 %v6770_v1, %v8240_v52  ;;  %5973 = vmatprep.subr.mxu0 %v8797_v51  ;;  %6779 = vrcp.f32 %v3058_v25  ;;  %v3070_v52 = vpop.xlane.xlu0 %3069  ;;  %v6305_v25 = vpack.c.bf16 %v6674_v35, %v6673_v17 }
 0x4b2   : > { %v3101_v47 = vsel %vm2875_vm10, %v8371_v46, 0.0 }
 0x4b3   : > { %v8382_v42 = vpop.eup %6773 }
 0x4b4   : > { %v3067_v50 = vpop.xlane.xlu1 %3066  ;;  %5974 = vmatpush3.msk.msra.mxu0 %vm403_vm2, %v8053_v60  ;;  %v3098_v48 = vsel %vm2875_vm10, %v8382_v42, 0.0 }
 0x4b5   : > { %6781 = vrcp.f32 %v3067_v50  ;;  %3102 = vadd.xlane.f32.xlu0 %v3101_v47  ;;  %5976 = vmatmul.mubr.msk.f32.vlgmr.msra.gmra.mrb[36].mxu0 %vm2875_vm10, %v3127_v44  ;;  %v3079_v62 = vpop.xlane.xlu0 %3078 }
 0x4b6   : > { %6298 = vmatprep.subr.bf16.mxu0 %v8798_v23  ;;  %6783 = vrcp.f32 %v3064_v61  ;;  %5993 = vmatprep.mubr.msk.f32.mxu0 %vm7024_vm4, %v8797_v51  ;;  %v788_v61 = vrot.slane %v8024_v40, 4 }
 0x4b7   : > { %v8388_v49 = vpop.eup %6775  ;;  %6300 = vmatpush3.bf16.msra.mxu0 %v6299_v16 }
 0x4b8   : > { %5991 = vmatprep.subr.mxu0 %v8797_v51  ;;  %v3073_v59 = vpop.xlane.xlu1 %3072  ;;  %v3104_v60 = vsel %vm2875_vm10, %v8388_v49, 0.0  ;;  %v8397_v18 = vpop.eup %6777 }
 0x4b9   : > { %6785 = vrcp.f32 %v3073_v59  ;;  %3105 = vadd.xlane.f32.xlu1 %v3104_v60  ;;  %3099 = vadd.xlane.f32.xlu0 %v3098_v48  ;;  %v3113_v21 = vsel %vm2875_vm10, %v8397_v18, 0.0 }
 0x4ba   : > { %6787 = vrcp.f32 %v3070_v52 }
 0x4bb   : > { %5992 = vmatpush3.msk.msra.mxu0 %vm403_vm2, %v8026_v43  ;;  %v6780_v11 = vpop.eup %6779  ;;  %6789 = vrcp.f32 %v3079_v62  ;;  %v8516_v62 = vpop.permute.xlu0 %816 }
 0x4bc   : > { %6304 = vmatprep.subr.bf16.mxu0 %v8798_v23  ;;  %v3125_v34 = vmul.f32 %v6780_v11, %v8258_v56  ;;  %v3076_v53 = vpop.xlane.xlu1 %3075 }
 0x4bd   : > { %3114 = vadd.xlane.f32.xlu1 %v3113_v21  ;;  %6791 = vrcp.f32 %v3076_v53 }
 0x4be   : > { %5967 = vmatmul.mubr.msk.f32.vlgmr.msra.gmra.mrb[26].mxu1 %vm2875_vm10, %v3125_v34  ;;  %v8802_v34 = vld [vmem:[#allocation27_spill] sm:$0xff] }
 0x4bf   : > { %v6782_v58 = vpop.eup %6781  ;;  %6297 = vmatpush3.bf16.msra.mxu1 %v6296_v12  ;;  %5984 = vmatprep.mubr.msk.f32.mxu1 %vm7024_vm4, %v8797_v51 }
 0x4c0   : > { %v3131_v43 = vmul.f32 %v6782_v58, %v8268_v9  ;;  %v6784_v1 = vpop.eup %6783  ;;  %5982 = vmatprep.subr.mxu1 %v8797_v51  ;;  %v6704_v58 = vunpack.i.h.bf16 %v8802_v34 }
 0x4c1   : > { %v3129_v56 = vmul.f32 %v6784_v1, %v8247_v19  ;;  %v6689_v19 = vunpack.i.h.bf16 %v8099_v55 }
 0x4c2   : > { %5994 = vmatmul.mubr.msk.f32.vlgmr.msra.gmra.mrb[38].mxu0 %vm2875_vm10, %v3131_v43 }
 0x4c3   : > { %v6786_v24 = vpop.eup %6785  ;;  %6306 = vmatpush3.bf16.msra.mxu0 %v6305_v25  ;;  %6011 = vmatprep.mubr.msk.f32.mxu0 %vm7024_vm4, %v8797_v51 }
 0x4c4   : > { %v3135_v9 = vmul.f32 %v6786_v24, %v8272_v28  ;;  %6009 = vmatprep.subr.mxu0 %v8797_v51  ;;  %5983 = vmatpush3.msk.msra.mxu1 %vm403_vm2, %v7998_v15  ;;  %v6788_v22 = vpop.eup %6787  ;;  %v6688_v28 = vunpack.i.l.bf16 %v8099_v55  ;;  %v6684_v55 = vunpack.i.h.bf16 %v8068_v3  ;;  %v8523_v24 = vpop.permute.xlu0 %6721 }
 0x4c5   : > { %5985 = vmatmul.mubr.msk.f32.vlgmr.msra.gmra.mrb[28].mxu1 %vm2875_vm10, %v3129_v56  ;;  %6301 = vmatprep.subr.bf16.mxu1 %v8798_v23  ;;  %v6790_v15 = vpop.eup %6789  ;;  %v3133_v10 = vmul.f32 %v6788_v22, %v8254_v41  ;;  %v6683_v41 = vunpack.i.l.bf16 %v8068_v3  ;;  %v789_v3 = vsel %vm403_vm2, %v7959_v4, %v788_v61  ;;  %v2993_v4 = vsub.f32 %v8199_v36, %v8341_v39 }
 0x4c6   : > { %6303 = vmatpush3.bf16.msra.mxu1 %v6296_v12  ;;  %6002 = vmatprep.mubr.msk.f32.mxu1 %vm7024_vm4, %v8797_v51  ;;  %v3139_v50 = vmul.f32 %v6790_v15, %v8262_v13  ;;  %v6703_v12 = vunpack.i.l.bf16 %v8802_v34  ;;  %v8804_v15 = vld [vmem:[#allocation21_spill] sm:$0xff] }
 0x4c7   : > { %6010 = vmatpush3.msk.msra.mxu0 %vm403_vm2, %v8085_v27  ;;  %6000 = vmatprep.subr.mxu1 %v8797_v51  ;;  %v6308_v27 = vpack.c.bf16 %v6679_v14, %v6678_v33  ;;  %v6792_v44 = vpop.eup %6791  ;;  %v6314_v13 = vpack.c.bf16 %v6684_v55, %v6683_v41  ;;  %v3038_v30 = vmul.f32 1.442695, %v2993_v4 }
 0x4c8   : > { %6012 = vmatmul.mubr.msk.f32.vlgmr.msra.gmra.mrb[40].mxu0 %vm2875_vm10, %v3135_v9  ;;  %6310 = vmatprep.subr.bf16.mxu0 %v8798_v23  ;;  %v3137_v47 = vmul.f32 %v6792_v44, %v8276_v63  ;;  %v6329_v1 = vpack.c.bf16 %v6704_v58, %v6703_v12  ;;  %v8803_v9 = vld [vmem:[#allocation22_spill] sm:$0xff] }
 0x4c9   : > { %6312 = vmatpush3.bf16.msra.mxu0 %v6305_v25  ;;  %6029 = vmatprep.mubr.msk.f32.mxu0 %vm7024_vm4, %v8797_v51  ;;  %6793 = vpow2.f32 %v3038_v30  ;;  %v6714_v22 = vunpack.i.h.bf16 %v8803_v9  ;;  %v6713_v14 = vunpack.i.l.bf16 %v8803_v9 }
 0x4ca   : > { %6001 = vmatpush3.msk.msra.mxu1 %vm403_vm2, %v8049_v2  ;;  %6027 = vmatprep.subr.mxu0 %v8797_v51  ;;  %v6317_v2 = vpack.c.bf16 %v6689_v19, %v6688_v28  ;;  %v823_v19 = vpop.permute.xlu0 %822 }
 0x4cb   : > { %6003 = vmatmul.mubr.msk.f32.vlgmr.msra.gmra.mrb[30].mxu1 %vm2875_vm10, %v3133_v10  ;;  %6307 = vmatprep.subr.bf16.mxu1 %v8798_v23  ;;  %v8805_v10 = vld [vmem:[#allocation26_spill] sm:$0xff] }
 0x4cc   : > { %6309 = vmatpush3.bf16.msra.mxu1 %v6308_v27  ;;  %6020 = vmatprep.mubr.msk.f32.mxu1 %vm7024_vm4, %v8797_v51 }
 0x4cd   : > { %6028 = vmatpush3.msk.msra.mxu0 %vm403_vm2, %v8079_v45  ;;  %6018 = vmatprep.subr.mxu1 %v8797_v51 }
 0x4ce   : > { %6030 = vmatmul.mubr.msk.f32.vlgmr.msra.gmra.mrb[42].mxu0 %vm2875_vm10, %v3139_v50  ;;  %6316 = vmatprep.subr.bf16.mxu0 %v8798_v23 }
 0x4cf   : > { %828 = vrot.lane.b32.xlu1 %v786_v0, %s7026_s15  ;;  %6318 = vmatpush3.bf16.msra.mxu0 %v6317_v2 }
 0x4d0   : > { %6019 = vmatpush3.msk.msra.mxu1 %vm403_vm2, %v8055_v7  ;;  %830 = vrot.lane.b32.xlu0 %v789_v3, %s7026_s15  ;;  %v2994_v7 = vsub.f32 %v8212_v57, %v8360_v38  ;;  %v8799_v38 = vld [vmem:[#allocation15_spill] sm:$0xff] }
 0x4d1   : > { %6021 = vmatmul.mubr.msk.f32.vlgmr.msra.gmra.mrb[32].mxu1 %vm2875_vm10, %v3137_v47  ;;  %6313 = vmatprep.subr.bf16.mxu1 %v8798_v23  ;;  %v6694_v52 = vunpack.i.h.bf16 %v8799_v38  ;;  %v6693_v59 = vunpack.i.l.bf16 %v8799_v38  ;;  %v8811_v38 = vld [vmem:[#allocation23_spill] sm:$0xff] }
 0x4d2   : > { %6315 = vmatpush3.bf16.msra.mxu1 %v6314_v13  ;;  %6045 = vmatprep.subr.mxu0 %v8797_v51  ;;  %v3040_v45 = vmul.f32 1.442695, %v2994_v7 }
 0x4d3   : > { %6046 = vmatpush3.msk.msra.mxu0 %vm403_vm2, %v8090_v32  ;;  %6036 = vmatprep.subr.mxu1 %v8797_v51  ;;  %v8483_v63 = vpop.eup %6793  ;;  %v6323_v8 = vpack.c.bf16 %v6694_v52, %v6693_v59  ;;  %v6724_v59 = vunpack.i.h.bf16 %v8523_v24 }
 0x4d4   : > { %6038 = vmatprep.mubr.msk.f32.mxu1 %vm7024_vm4, %v8797_v51  ;;  %6047 = vmatprep.mubr.msk.f32.mxu0 %vm7024_vm4, %v8797_v51  ;;  %6795 = vpow2.f32 %v3040_v45 }
 0x4d5   : > { %6322 = vmatprep.subr.bf16.mxu0 %v8798_v23 }
 0x4d6   : > { %6037 = vmatpush3.msk.msra.mxu1 %vm403_vm2, %v8103_v20  ;;  %v3107_v20 = vsel %vm2875_vm10, %v8483_v63, 0.0 }
 0x4d7   : > { %6319 = vmatprep.subr.bf16.mxu1 %v8798_v23 }
 0x4de   : > { %v8487_v16 = vpop.eup %6795 }
 0x4df   : > { %v3110_v36 = vsel %vm2875_vm10, %v8487_v16, 0.0 }
 0x4e9   : > { %v3082_v32 = vpop.xlane.xlu1 %3081 }
 0x4ea   : > { %6797 = vrcp.f32 %v3082_v32 }
 0x4ed   : > { %v3085_v0 = vpop.xlane.xlu1 %3084 }
 0x4ee   : > { %6799 = vrcp.f32 %v3085_v0  ;;  %v8809_v0 = vld [vmem:[#allocation24_spill] sm:$0xff] }
 0x4ef   : > { %3108 = vadd.xlane.f32.xlu0 %v3107_v20  ;;  %v6719_v20 = vunpack.i.h.bf16 %v8809_v0 }
 0x4f3   : > { %3111 = vadd.xlane.f32.xlu0 %v3110_v36  ;;  %v8810_v36 = vld [vmem:[#allocation19_spill] sm:$0xff] }
 0x4f4   : > { %v6798_v39 = vpop.eup %6797 }
 0x4f5   : > { %v3141_v57 = vmul.f32 %v6798_v39, %v8307_v5  ;;  %v8801_v5 = vld [vmem:[#allocation18_spill] sm:$0xff] }
 0x4f7   : > { %6039 = vmatmul.mubr.msk.f32.vlgmr.msra.gmra.mrb[34].mxu1 %vm2875_vm10, %v3141_v57 }
 0x4f8   : > { %v6800_v60 = vpop.eup %6799  ;;  %6321 = vmatpush3.bf16.msra.mxu1 %v6314_v13  ;;  %6056 = vmatprep.mubr.msk.f32.mxu1 %vm7024_vm4, %v8797_v51  ;;  %v8807_v13 = vld [vmem:[#allocation20_spill] sm:$0xff] }
 0x4f9   : > { %v3143_v48 = vmul.f32 %v6800_v60, %v8317_v31  ;;  %6054 = vmatprep.subr.mxu1 %v8797_v51  ;;  %v8512_v31 = vpop.permute.xlu1 %820  ;;  %v6709_v4 = vunpack.i.h.bf16 %v8807_v13  ;;  %v6723_v60 = vunpack.i.l.bf16 %v8523_v24 }
 0x4fb   : > { %6048 = vmatmul.mubr.msk.f32.vlgmr.msra.gmra.mrb[44].mxu0 %vm2875_vm10, %v3143_v48  ;;  %v8812_v48 = vld [vmem:[#allocation25_spill] sm:$0xff] }
 0x4fc   : > { %6055 = vmatpush3.msk.msra.mxu1 %vm403_vm2, %v8800_v6  ;;  %6324 = vmatpush3.bf16.msra.mxu0 %v6323_v8  ;;  %v6344_v6 = vpack.c.bf16 %v6724_v59, %v6723_v60  ;;  %v5081_v60 = vld [vmem:[#allocation7 + $0x30] sm:$0xff] }
 0x4fd   : > { %6063 = vmatprep.subr.mxu0 %v8797_v51  ;;  %6065 = vmatprep.mubr.msk.f32.mxu0 %vm7024_vm4, %v8797_v51 }
 0x4fe   : > { %6325 = vmatprep.subr.bf16.mxu1 %v8798_v23 }
 0x500   : > { %6064 = vmatpush3.msk.msra.mxu0 %vm403_vm2, %v8801_v5 }
 0x501   : > { %6328 = vmatprep.subr.bf16.mxu0 %v8798_v23 }
 0x509   : > { %832 = vrot.lane.b32.xlu0 %v788_v61, %s7026_s15  ;;  %v8806_v61 = vld [vmem:[#allocation17_spill] sm:$0xff]  ;;  %s8652_s15 = scalar_lea.hbm %s8749_s5, %s6366_s26 }
 0x50a   : > { %v6699_v44 = vunpack.i.h.bf16 %v8806_v61  ;;  %v6698_v55 = vunpack.i.l.bf16 %v8806_v61 }
 0x50c   : > { %v6326_v47 = vpack.c.bf16 %v6699_v44, %v6698_v55 }
 0x522   : > { %v3091_v21 = vpop.xlane.xlu1 %3090 }
 0x523   : > { %6801 = vrcp.f32 %v3091_v21 }
 0x526   : > { %v3097_v11 = vpop.xlane.xlu1 %3096 }
 0x527   : > { %6803 = vrcp.f32 %v3097_v11 }
 0x528   : > { %v8514_v35 = vpop.f32.mrb[30].mxu0 }
 0x529   : > { %v5932_v17 = vpop.f32.mrb[31].mxu0 }
 0x52d   : > { %v6802_v43 = vpop.eup %6801 }
 0x52e   : > { %v3147_v53 = vmul.f32 %v6802_v43, %v8333_v29  ;;  %v8521_v40 = vpop.f32.mrb[32].mxu0  ;;  %v6335_v29 = vpack.c.bf16 %v6714_v22, %v6713_v14 }
 0x52f   : > { %v5941_v25 = vpop.f32.mrb[33].mxu0 }
 0x530   : > { %6066 = vmatmul.mubr.msk.f32.vlgmr.msra.gmra.mrb[46].mxu0 %vm2875_vm10, %v3147_v53 }
 0x531   : > { %v6804_v56 = vpop.eup %6803  ;;  %6330 = vmatpush3.bf16.msra.mxu0 %v6329_v1  ;;  %6083 = vmatprep.mubr.msk.f32.mxu0 %vm7024_vm4, %v8797_v51 }
 0x532   : > { %v3151_v33 = vmul.f32 %v6804_v56, %v8337_v54  ;;  %6081 = vmatprep.subr.mxu0 %v8797_v51 }
 0x535   : > { %6082 = vmatpush3.msk.msra.mxu0 %vm403_vm2, %v8804_v15 }
 0x536   : > { %6084 = vmatmul.mubr.msk.f32.vlgmr.msra.gmra.mrb[48].mxu0 %vm2875_vm10, %v3151_v33  ;;  %6334 = vmatprep.subr.bf16.mxu0 %v8798_v23 }
 0x537   : > { %6336 = vmatpush3.bf16.msra.mxu0 %v6335_v29  ;;  %6101 = vmatprep.mubr.msk.f32.mxu0 %vm7024_vm4, %v8797_v51 }
 0x538   : > { %6099 = vmatprep.subr.mxu0 %v8797_v51 }
 0x53a   : > { %v3088_v28 = vpop.xlane.xlu0 %3087 }
 0x53b   : > { %6100 = vmatpush3.msk.msra.mxu0 %vm403_vm2, %v8805_v10  ;;  %6805 = vrcp.f32 %v3088_v28 }
 0x53c   : > { %6340 = vmatprep.subr.bf16.mxu0 %v8798_v23 }
 0x53e   : > { %v3094_v54 = vpop.xlane.xlu0 %3093 }
 0x53f   : > { %6807 = vrcp.f32 %v3094_v54 }
 0x542   : > { %v3103_v27 = vpop.xlane.xlu0 %3102 }
 0x543   : > { %6809 = vrcp.f32 %v3103_v27 }
 0x545   : > { %v6806_v41 = vpop.eup %6805 }
 0x546   : > { %v3145_v50 = vmul.f32 %v6806_v41, %v8356_v37  ;;  %v3100_v2 = vpop.xlane.xlu0 %3099  ;;  %v3106_v30 = vpop.xlane.xlu1 %3105  ;;  %v8808_v37 = vunpack.i.l.bf16 %v8807_v13 }
 0x547   : > { %6811 = vrcp.f32 %v3100_v2 }
 0x548   : > { %6057 = vmatmul.mubr.msk.f32.vlgmr.msra.gmra.mrb[36].mxu1 %vm2875_vm10, %v3145_v50  ;;  %6813 = vrcp.f32 %v3106_v30  ;;  %v6332_v32 = vpack.c.bf16 %v6709_v4, %v8808_v37  ;;  %v5076_v37 = vld [vmem:[#allocation7 + $0x8] sm:$0xff] }
 0x549   : > { %v6808_v3 = vpop.eup %6807  ;;  %6327 = vmatpush3.bf16.msra.mxu1 %v6326_v47  ;;  %6074 = vmatprep.mubr.msk.f32.mxu1 %vm7024_vm4, %v8797_v51 }
 0x54a   : > { %v3149_v7 = vmul.f32 %v6808_v3, %v8366_v26  ;;  %6072 = vmatprep.subr.mxu1 %v8797_v51  ;;  %v6341_v26 = vpack.c.bf16 %v8512_v31, %v6719_v20  ;;  %v3115_v8 = vpop.xlane.xlu1 %3114 }
 0x54d   : > { %v6810_v45 = vpop.eup %6809  ;;  %6073 = vmatpush3.msk.msra.mxu1 %vm403_vm2, %v8810_v36 }
 0x54e   : > { %v3155_v39 = vmul.f32 %v6810_v45, %v8371_v46  ;;  %6075 = vmatmul.mubr.msk.f32.vlgmr.msra.gmra.mrb[38].mxu1 %vm2875_vm10, %v3149_v7  ;;  %6331 = vmatprep.subr.bf16.mxu1 %v8798_v23  ;;  %v829_v5 = vpop.permute.xlu1 %828  ;;  %v5075_v45 = vld [vmem:[#allocation7] sm:$0xff] }
 0x54f   : > { %6333 = vmatpush3.bf16.msra.mxu1 %v6332_v32  ;;  %6092 = vmatprep.mubr.msk.f32.mxu1 %vm7024_vm4, %v8797_v51  ;;  %v5077_v32 = vld [vmem:[#allocation7 + $0x10] sm:$0xff]  ;;  %v6350_v0 = vpack.c.bf16 %v5076_v37, %v5075_v45 }
 0x550   : > { %6102 = vmatmul.mubr.msk.f32.vlgmr.msra.gmra.mrb[50].mxu0 %vm2875_vm10, %v3155_v39  ;;  %6090 = vmatprep.subr.mxu1 %v8797_v51  ;;  %v5079_v39 = vld [vmem:[#allocation7 + $0x20] sm:$0xff] }
 0x551   : > { %6342 = vmatpush3.bf16.msra.mxu0 %v6341_v26  ;;  %6119 = vmatprep.mubr.msk.f32.mxu0 %vm7024_vm4, %v8797_v51  ;;  %v6812_v57 = vpop.eup %6811  ;;  %v5080_v26 = vld [vmem:[#allocation7 + $0x28] sm:$0xff] }
 0x552   : > { %6117 = vmatprep.subr.mxu0 %v8797_v51  ;;  %v3153_v46 = vmul.f32 %v6812_v57, %v8382_v42  ;;  %v6814_v52 = vpop.eup %6813 }
 0x553   : > { %6091 = vmatpush3.msk.msra.mxu1 %vm403_vm2, %v8811_v38  ;;  %v3157_v42 = vmul.f32 %v6814_v52, %v8388_v49  ;;  %v831_v49 = vpop.permute.xlu0 %830  ;;  %v6356_v52 = vpack.c.bf16 %v5080_v26, %v5079_v39 }
 0x554   : > { %6337 = vmatprep.subr.bf16.mxu1 %v8798_v23  ;;  %6093 = vmatmul.mubr.msk.f32.vlgmr.msra.gmra.mrb[40].mxu1 %vm2875_vm10, %v3153_v46  ;;  %v6347_v53 = vpack.c.bf16 %v831_v49, %v6719_v20  ;;  %v5078_v20 = vld [vmem:[#allocation7 + $0x18] sm:$0xff] }
 0x555   : > { %6118 = vmatpush3.msk.msra.mxu0 %vm403_vm2, %v823_v19  ;;  %6339 = vmatpush3.bf16.msra.mxu1 %v8812_v48  ;;  %v6353_v36 = vpack.c.bf16 %v5078_v20, %v5077_v32  ;;  %v5082_v48 = vld [vmem:[#allocation7 + $0x38] sm:$0xff] }
 0x556   : > { %6110 = vmatprep.mubr.msk.f32.mxu1 %vm7024_vm4, %v8797_v51  ;;  %6108 = vmatprep.subr.mxu1 %v8797_v51 }
 0x557   : > { %6346 = vmatprep.subr.bf16.mxu0 %v8798_v23 }
 0x559   : > { %6109 = vmatpush3.msk.msra.mxu1 %vm403_vm2, %v8516_v62 }
 0x55a   : > { %6111 = vmatmul.mubr.msk.f32.vlgmr.msra.gmra.mrb[42].mxu1 %vm2875_vm10, %v3157_v42  ;;  %6343 = vmatprep.subr.bf16.mxu1 %v8798_v23  ;;  %v6359_v42 = vpack.c.bf16 %v5082_v48, %v5081_v60 }
 0x55b   : > { %6345 = vmatpush3.bf16.msra.mxu1 %v6344_v6  ;;  %6128 = vmatprep.mubr.msk.f32.mxu1 %vm7024_vm4, %v8797_v51 }
 0x55c   : > { %6126 = vmatprep.subr.mxu1 %v8797_v51 }
 0x55f   : > { %6127 = vmatpush3.msk.msra.mxu1 %vm403_vm2, %v829_v5 }
 0x560   : > { %6349 = vmatprep.subr.bf16.mxu1 %v8798_v23 }
 0x579   : > { %v8590_v31 = vpop.f32.mrb[24].mxu1 }
 0x57a   : > { %v5950_v21 = vpop.f32.mrb[25].mxu1 }
 0x57c   : > { %v3109_v11 = vpop.xlane.xlu0 %3108 }
 0x57d   : > { %6815 = vrcp.f32 %v3109_v11 }
 0x57e   : > { %6817 = vrcp.f32 %v3115_v8 }
 0x580   : > { %v3112_v17 = vpop.xlane.xlu0 %3111 }
 0x581   : > { %6819 = vrcp.f32 %v3112_v17 }
 0x582   : > { %v3460_v62 = vpop.f32.mrb[34].mxu0 }
 0x583   : > { %4967 = vrot.lane.b32.xlu1 %v3460_v62, %s7027_s7  ;;  %v5959_v34 = vpop.f32.mrb[35].mxu0 }
 0x587   : > { %v6816_v58 = vpop.eup %6815 }
 0x588   : > { %v3159_v12 = vmul.f32 %v6816_v58, %v8483_v63  ;;  %v3610_v43 = vpop.f32.mrb[36].mxu0  ;;  %v6818_v25 = vpop.eup %6817 }
 0x589   : > { %4971 = vrot.lane.b32.xlu0 %v3610_v43, %s7027_s7  ;;  %v5977_v1 = vpop.f32.mrb[37].mxu0  ;;  %v3163_v9 = vmul.f32 %v6818_v25, %v8397_v18  ;;  %v833_v63 = vpop.permute.xlu0 %832 }
 0x58a   : > { %6120 = vmatmul.mubr.msk.f32.vlgmr.msra.gmra.mrb[52].mxu0 %vm2875_vm10, %v3159_v12 }
 0x58b   : > { %v6820_v24 = vpop.eup %6819  ;;  %6348 = vmatpush3.bf16.msra.mxu0 %v6347_v53  ;;  %6137 = vmatprep.mubr.msk.f32.mxu0 %vm7024_vm4, %v8797_v51 }
 0x58c   : > { %v3161_v56 = vmul.f32 %v6820_v24, %v8487_v16  ;;  %6135 = vmatprep.subr.mxu0 %v8797_v51 }
 0x58e   : > { %6129 = vmatmul.mubr.msk.f32.vlgmr.msra.gmra.mrb[44].mxu1 %vm2875_vm10, %v3161_v56 }
 0x58f   : > { %6136 = vmatpush3.msk.msra.mxu0 %vm403_vm2, %v833_v63  ;;  %6156 = vmatprep.mubr.msk.f32.mxu1 %vm7024_vm4, %v8797_v51 }
 0x590   : > { %6138 = vmatmul.mubr.msk.f32.vlgmr.msra.gmra.mrb[54].mxu0 %vm2875_vm10, %v3163_v9  ;;  %6351 = vmatpush3.bf16.msra.mxu1 %v6350_v0 }
 0x591   : > { %v3535_v22 = vpop.f32.mrb[26].mxu1  ;;  %6352 = vmatprep.subr.bf16.mxu1 %v8798_v23 }
 0x592   : > { %v5968_v14 = vpop.f32.mrb[27].mxu1  ;;  %4969 = vrot.lane.b32.xlu1 %v3535_v22, %s7027_s7 }
 0x594   : > { %6354 = vmatpush3.bf16.msra.mxu1 %v6353_v36 }
 0x595   : > { %v3760_v33 = vpop.f32.mrb[38].mxu0  ;;  %6355 = vmatprep.subr.bf16.mxu1 %v8798_v23 }
 0x596   : > { %v5995_v16 = vpop.f32.mrb[39].mxu0  ;;  %4981 = vrot.lane.b32.xlu1 %v3760_v33, %s7028_s28 }
 0x598   : > { %v3685_v29 = vpop.f32.mrb[28].mxu1  ;;  %6357 = vmatpush3.bf16.msra.mxu1 %v6356_v52 }
 0x599   : > { %v5986_v18 = vpop.f32.mrb[29].mxu1  ;;  %4979 = vrot.lane.b32.xlu0 %v3685_v29, %s7028_s28  ;;  %6358 = vmatprep.subr.bf16.mxu1 %v8798_v23 }
 0x59b   : > { %v3910_v15 = vpop.f32.mrb[40].mxu0 }
 0x59c   : > { %4991 = vrot.lane.b32.xlu1 %v3910_v15, %s7029_s12  ;;  %v6013_v19 = vpop.f32.mrb[41].mxu0  ;;  %6360 = vmatpush3.bf16.msra.mxu1 %v6359_v42 }
 0x59e   : > { %v3835_v28 = vpop.f32.mrb[30].mxu1 }
 0x59f   : > { %v6004_v10 = vpop.f32.mrb[31].mxu1  ;;  %4983 = vrot.lane.b32.xlu0 %v3835_v28, %s7028_s28  ;;  %s6907_s28 = scalar_lea.vmem %s8654_s13, 3072 }
 0x5a0   : > { %p6908_p11 = scmp.ne.s32.totalorder %s8654_s13, %s6907_s28 }
 0x5a1   : > { %v4060_v54 = vpop.f32.mrb[42].mxu0 }
 0x5a2   : > { %v6031_v27 = vpop.f32.mrb[43].mxu0  ;;  %p6909_p1 = pnand %p6908_p11, %p8813_p0 }
 0x5a3   : > { %4995 = vrot.lane.b32.xlu0 %v4060_v54, %s7029_s12 }
 0x5a4   : > { %v3985_v61 = vpop.f32.mrb[32].mxu1  ;;  %p6910_p3 = pneg %p6909_p1 }
 0x5a5   : > { %v6022_v44 = vpop.f32.mrb[33].mxu1  ;;  %4993 = vrot.lane.b32.xlu1 %v3985_v61, %s7029_s12  ;;  %s7034_s12 = smov [#allocation9]  }
 0x5ca   : > { %v4135_v55 = vpop.f32.mrb[34].mxu1 }
 0x5cb   : > { %v6040_v41 = vpop.f32.mrb[35].mxu1  ;;  %5003 = vrot.lane.b32.xlu0 %v4135_v55, %s7030_s17 }
 0x5ce   : > { %v4210_v50 = vpop.f32.mrb[44].mxu0 }
 0x5cf   : > { %5005 = vrot.lane.b32.xlu1 %v4210_v50, %s7030_s17  ;;  %v6049_v2 = vpop.f32.mrb[45].mxu0 }
 0x5f5   : > { %v4968_v23 = vpop.permute.xlu1 %4967 }
 0x5f6   : > { %v5048_v29 = vsel %vm854_vm5, %v8514_v35, %v4968_v23 }
 0x5fb   : > { %v4972_v43 = vpop.permute.xlu0 %4971 }
 0x5fc   : > { %v5050_v50 = vsel %vm854_vm5, %v8590_v31, %v4972_v43 }
 0x603   : > { %v4360_v47 = vpop.f32.mrb[46].mxu0 }
 0x604   : > { %5015 = vrot.lane.b32.xlu0 %v4360_v47, %s7031_s9  ;;  %v6067_v3 = vpop.f32.mrb[47].mxu0  ;;  %v4970_v12 = vpop.permute.xlu1 %4969 }
 0x605   : > { %v5049_v10 = vsel %vm854_vm5, %v8521_v40, %v4970_v12 }
 0x608   : > { %v4982_v53 = vpop.permute.xlu1 %4981 }
 0x609   : > { %v4510_v13 = vpop.f32.mrb[48].mxu0  ;;  %v5053_v27 = vsel %vm5051_vm11, %v5049_v10, %v4982_v53 }
 0x60a   : > { %v6085_v4 = vpop.f32.mrb[49].mxu0 }
 0x60b   : > { %v4980_v1 = vpop.permute.xlu0 %4979 }
 0x60c   : > { %v5052_v18 = vsel %vm5051_vm11, %v5048_v29, %v4980_v1 }
 0x60e   : > { %v4992_v25 = vpop.permute.xlu1 %4991 }
 0x60f   : > { %v5056_v19 = vsel %vm5055_vm12, %v5052_v18, %v4992_v25 }
 0x611   : > { %v4984_v24 = vpop.permute.xlu0 %4983 }
 0x612   : > { %v5054_v40 = vsel %vm5051_vm11, %v5050_v50, %v4984_v24 }
 0x615   : > { %v4996_v9 = vpop.permute.xlu0 %4995 }
 0x616   : > { %v5058_v3 = vsel %vm5055_vm12, %v5054_v40, %v4996_v9 }
 0x617   : > { %v4994_v56 = vpop.permute.xlu1 %4993 }
 0x618   : > { %v5057_v55 = vsel %vm5055_vm12, %v5053_v27, %v4994_v56 }
 0x61b   : > { %v4285_v30 = vpop.f32.mrb[36].mxu1 }
 0x61c   : > { %v6058_v7 = vpop.f32.mrb[37].mxu1 }
 0x621   : > { %v4435_v57 = vpop.f32.mrb[38].mxu1 }
 0x622   : > { %v6076_v46 = vpop.f32.mrb[39].mxu1  ;;  %5017 = vrot.lane.b32.xlu1 %v4435_v57, %s7031_s9 }
 0x623   : > { %v4660_v38 = vpop.f32.mrb[50].mxu0 }
 0x624   : > { %v6103_v59 = vpop.f32.mrb[51].mxu0 }
 0x626   : > { %5029 = vrot.lane.b32.xlu1 %v4660_v38, %s7032_s8 }
 0x627   : > { %v4585_v8 = vpop.f32.mrb[40].mxu1 }
 0x628   : > { %v6094_v6 = vpop.f32.mrb[41].mxu1  ;;  %5027 = vrot.lane.b32.xlu0 %v4585_v8, %s7032_s8 }
 0x62a   : > { %5019 = vrot.lane.b32.xlu1 %v4510_v13, %s7031_s9 }
 0x62d   : > { %v4735_v5 = vpop.f32.mrb[42].mxu1 }
 0x62e   : > { %v6112_v49 = vpop.f32.mrb[43].mxu1 }
 0x63d   : > { %v5004_v22 = vpop.permute.xlu0 %5003 }
 0x63e   : > { %v5060_v28 = vsel %vm5059_vm13, %v5056_v19, %v5004_v22 }
 0x641   : > { %v5006_v63 = vpop.permute.xlu1 %5005 }
 0x642   : > { %v5061_v2 = vsel %vm5059_vm13, %v5057_v55, %v5006_v63 }
 0x65d   : > { %v4810_v21 = vpop.f32.mrb[52].mxu0 }
 0x65e   : > { %5039 = vrot.lane.b32.xlu0 %v4810_v21, %s7033_s24  ;;  %v6121_v11 = vpop.f32.mrb[53].mxu0 }
 0x661   : > { %v4885_v17 = vpop.f32.mrb[44].mxu1 }
 0x662   : > { %v6130_v62 = vpop.f32.mrb[45].mxu1  ;;  %5041 = vrot.lane.b32.xlu1 %v4885_v17, %s7033_s24  ;;  %5007 = vrot.lane.b32.xlu0 %v4285_v30, %s7030_s17  ;;  %s6911_s17 = sshll.u32 %s7034_s12, 4  ;;  %s6912_s17 = int_to_ptr.vmem [resolvable:$false] %s6911_s17 }
 0x663   : > { %v4960_v34 = vpop.f32.mrb[54].mxu0  ;;  %s6913_s30 = scalar_lea.vmem %s6912_s17, 6144  ;;  %p6914_p5 = scmp.lt.s32.totalorder %s8654_s13, %s6912_s17 }
 0x664   : > { %v6139_v58 = vpop.f32.mrb[55].mxu0  ;;  %p6915_p9 = scmp.lt.s32.totalorder %s6913_s30, %s6907_s28 }
 0x666   : > { %5031 = vrot.lane.b32.xlu0 %v4735_v5, %s7032_s8  ;;  %5043 = vrot.lane.b32.xlu1 %v4960_v34, %s7033_s24  ;;  %p6916_p12 = por %p6915_p9, %p6914_p5 }
 0x668   : > { %p6917_p2 = pnand %p6916_p12, %p6910_p3 }
 0x676   : > { %v5016_v33 = vpop.permute.xlu0 %5015 }
 0x677   : > { %v5064_v54 = vsel %vm5063_vm14, %v5060_v28, %v5016_v33 }
 0x694   : > { %v5018_v14 = vpop.permute.xlu1 %5017 }
 0x695   : > { %v5065_v47 = vsel %vm5063_vm14, %v5061_v2, %v5018_v14 }
 0x698   : > { %v5030_v16 = vpop.permute.xlu1 %5029 }
 0x699   : > { %v5069_v13 = vsel %vm5067_vm1, %v5065_v47, %v5030_v16 }
 0x69a   : > { %v5028_v15 = vpop.permute.xlu0 %5027 }
 0x69b   : > { %v5068_v35 = vsel %vm5067_vm1, %v5064_v54, %v5028_v15 }
 0x69c   : > { %v5020_v61 = vpop.permute.xlu1 %5019 }
 0x6d0   : > { %v5040_v44 = vpop.permute.xlu0 %5039 }
 0x6d1   : > { %v5072_v41 = vsel %vm5071_vm15, %v5068_v35, %v5040_v44 }
 0x6d2   : > { %6157 = vmatmul.mubr.msk.f32.vlgmr.msra.gmra.mrb[46].mxu1 %vm302_vm0, %v5072_v41 }
 0x6d3   : > { %6159 = vmatprep.mubr.msk.f32.mxu1 %vm7024_vm4, %v8797_v51 }
 0x6d4   : > { %v5042_v4 = vpop.permute.xlu1 %5041  ;;  %v5008_v31 = vpop.permute.xlu0 %5007 }
 0x6d5   : > { %v5073_v30 = vsel %vm5071_vm15, %v5069_v13, %v5042_v4  ;;  %v5062_v7 = vsel %vm5059_vm13, %v5058_v3, %v5008_v31 }
 0x6d6   : > { %6160 = vmatmul.mubr.msk.f32.gmra.mrb[48].mxu1 %vm302_vm0, %v5073_v30  ;;  %v5066_v45 = vsel %vm5063_vm14, %v5062_v7, %v5020_v61 }
 0x6d7   : > { %6162 = vmatprep.mubr.msk.f32.mxu1 %vm7024_vm4, %v8797_v51 }
 0x6d8   : > { %v5032_v37 = vpop.permute.xlu0 %5031  ;;  %v5044_v32 = vpop.permute.xlu1 %5043 }
 0x6d9   : > { %v5070_v0 = vsel %vm5067_vm1, %v5066_v45, %v5032_v37 }
 0x6da   : > { %v5074_v20 = vsel %vm5071_vm15, %v5070_v0, %v5044_v32 }
 0x6db   : > { %6163 = vmatmul.mubr.msk.f32.gmra.mrb[50].mxu1 %vm302_vm0, %v5074_v20 }
 0x6dc   : > { %6920 = shalt.err (!%p6917_p2)
}
 0x6dd   : > { %s6921_s9 = scalar_lea.hbm %s8652_s15, 3072  ;;  %s6925_s26 = scalar_lea.hbm %s8749_s5, 6144 }
 0x6de   : > { %p6922_p13 = scmp.ne.s32.totalorder %s8652_s15, %s6921_s9  ;;  %p6926_p4 = scmp.lt.u32.totalorder %s8652_s15, %s8749_s5 }
 0x6df   : > { %p6927_p7 = scmp.lt.u32.totalorder %s6925_s26, %s6921_s9  ;;  %p6929_p11 = scmp.lt.u32.totalorder %s6921_s9, %s8652_s15 }
 0x6e0   : > { %p6923_p6 = pnand %p6922_p13, %p8813_p0 }
 0x6e1   : > { %p6928_p8 = por %p6927_p7, %p6926_p4 }
 0x6e2   : > { %p6924_p10 = pneg %p6923_p6 }
 0x6e3   : > { %p6930_p1 = por %p6929_p11, %p6928_p8 }
 0x6e5   : > { %p6931_p3 = pnand %p6930_p1, %p6924_p10 }
 0x6e7   : > { %6934 = shalt.err (!%p6931_p3)
}
 0x6e8   : > { %s7035_s28 = smov 128   ;;  %v5497_v51 = vld [vmem:[%s8747_s3] ss:$0 sm:$0xff]  ;;  %s275_s30 = scalar_lea.vmem [#allocation8], %s6363_s6 }
 0x6e9   : > { %6378 = dma.vmem_to_hbm [thread:$0]  (%p8813_p0), %s8654_s13, 3072, %s8652_s15, %s5188_s10, %s7035_s28, %s7035_s28, %s7027_s7  }
 0x6ea   : > { %s5201_s9 = sshll.u32 %s275_s30, 4  ;;  %s6365_s8 = smul.u32 384, %s7088_s22  ;;  %s8691_s9 = int_to_ptr.vmem [resolvable:$true] %s5201_s9 }
 0x6eb   : > { %s5183_s10 = scalar_lea.sflag [#allocation4], %s7245_s23  ;;  %s6935_s24 = scalar_lea.vmem %s8691_s9, 384 }
 0x6ec   : > { %s8696_s15 = scalar_lea.hbm %s8748_s4, %s6365_s8  ;;  %p6936_p5 = scmp.ne.s32.totalorder %s8691_s9, %s6935_s24 }
 0x6ed   : > { %s7036_s22 = smov [#allocation8]  }
 0x6ee   : > { %p6937_p9 = pnand %p6936_p5, %p8813_p0  ;;  %s6939_s26 = sshll.u32 %s7036_s22, 4  ;;  %s6940_s26 = int_to_ptr.vmem [resolvable:$false] %s6939_s26 }
 0x6ef   : > { %s6941_s11 = scalar_lea.vmem %s6940_s26, 768  ;;  %p6942_p2 = scmp.lt.s32.totalorder %s8691_s9, %s6940_s26 }
 0x6f0   : > { %p6938_p12 = pneg %p6937_p9  ;;  %p6943_p13 = scmp.lt.s32.totalorder %s6941_s11, %s6935_s24 }
 0x6f2   : > { %p6944_p6 = por %p6943_p13, %p6942_p2 }
 0x6f4   : > { %p6945_p10 = pnand %p6944_p6, %p6938_p12 }
 0x7a5   : > { %v5165_v36 = vpop.f32.mrb[46].mxu1 }
 0x7a6   : > { %v5166_v39 = vadd.f32 %v5497_v51, %v5165_v36  ;;  %v6158_v26 = vpop.f32.mrb[47].mxu1 }
 0x7a8   : > { %5179 = vst.msk [vmem:[%s275_s30] sm:$0xff] %vm302_vm0, %v5166_v39 }
 0x7a9   : > { %v5170_v57 = vpop.f32.mrb[48].mxu1 }
 0x7aa   : > { %v5171_v46 = vadd.f32 %v5497_v51, %v5170_v57  ;;  %v6161_v38 = vpop.f32.mrb[49].mxu1 }
 0x7ac   : > { %5180 = vst.msk [vmem:[%s275_s30 + $0x8] sm:$0xff] %vm302_vm0, %v5171_v46 }
 0x7ae   : > { %v5175_v52 = vpop.f32.mrb[50].mxu1 }
 0x7af   : > { %v5176_v59 = vadd.f32 %v5497_v51, %v5175_v52  ;;  %v6164_v60 = vpop.f32.mrb[51].mxu1 }
 0x7b1   : > { %5181 = vst.msk [vmem:[%s275_s30 + $0x10] sm:$0xff] %vm302_vm0, %v5176_v59 }
 0x7b2   : > { %6948 = shalt.err (!%p6945_p10)
}
 0x7b3   : > { %s6949_s14 = scalar_lea.hbm %s8696_s15, 384  ;;  %s6953_s30 = scalar_lea.hbm %s8748_s4, 768 }
 0x7b4   : > { %p6950_p4 = scmp.ne.s32.totalorder %s8696_s15, %s6949_s14  ;;  %p6954_p11 = scmp.lt.u32.totalorder %s8696_s15, %s8748_s4 }
 0x7b5   : > { %p6955_p1 = scmp.lt.u32.totalorder %s6953_s30, %s6949_s14  ;;  %p6957_p5 = scmp.lt.u32.totalorder %s6949_s14, %s8696_s15 }
 0x7b6   : > { %p6951_p7 = pnand %p6950_p4, %p8813_p0 }
 0x7b7   : > { %p6956_p3 = por %p6955_p1, %p6954_p11 }
 0x7b8   : > { %p6952_p8 = pneg %p6951_p7 }
 0x7b9   : > { %p6958_p9 = por %p6957_p5, %p6956_p3 }
 0x7bb   : > { %p6959_p12 = pnand %p6958_p9, %p6952_p8 }
 0x7bd   : > { %6962 = shalt.err (!%p6959_p12)
}
 0x7be   : > { %6377 = dma.vmem_to_hbm [thread:$0]  (%p8813_p0), %s8691_s9, 384, %s8696_s15, %s5183_s10, %s7035_s28, %s7035_s28, %s7027_s7  }
 0x7bf PF: > { %s5232_s6 = sand.u32 1, %s6997_s18   ;;  %p8814_p2 = scmp.ne.s32.totalorder %s8768_s25, 0 }
 0x7c0   : > { %p8815_p13 = scmp.ge.s32.totalorder %s7009_s21, 2  ;;  %s5233_s24 = scalar_lea.sflag [#allocation4], %s5232_s6 }
 0x7c2   : > { %p6393_p6 = pnand %p8815_p13, %p8814_p2 }
 0x7c4   : > { %6988 = dma.done.wait (!%p6393_p6), %s5233_s24, 384  }
 0x7c5   : > { %6990 = vsyncadd (!%p6393_p6), %s5233_s24, 4294966912  ;;  %s5242_s29 = scalar_lea.sflag [#allocation10], %s5232_s6 }
 0x7c6   : > { %6992 = dma.done.wait (!%p6393_p6), %s5242_s29, 3072  }
 0x7c7   : > { %6994 = vsyncadd (!%p6393_p6), %s5242_s29, 4294964224  ;;  %p23_p0 = scmp.ge.s32.totalorder %s7180_s16, 4   ;;  %s8816_s18 = smov %s7001_s19 }
 0x7c8   : > { %s8817_s19 = smov %s7005_s20  ;;  %s8818_s20 = smov %s7189_s27 }
 0x7c9   : > { %s8819_s21 = smov %s7180_s16  ;;  %25 = sbr.rel (!%p23_p0) target bundleno = 8 (0x8), region = 106 }
 0x7d0   :  { %5247 = vsyncpa [#allocation3], 1 }
 0x7d1   :  { %5249 = vsyncpa [#allocation3 + $0x1], 1 }
 0x7d2   :  { %5250 = vsyncpa [#allocation6], 1 }
 0x7d3   :  { %5251 = vsyncpa [#allocation4], 1 }
 0x7d4   :  { %5253 = vsyncpa [#allocation4 + $0x1], 1 }
 0x7d5   :  { %5254 = vsyncpa [#allocation10], 1 }
 0x7d6   :  { %5256 = vsyncpa [#allocation10 + $0x1], 1 }

</bundles_post_ra>
